<compile_context>
chip_gen: v6e
topology: v6e:2x2x1
jax: 0.10.0
libtpu: 0.0.40
codegen_flags: <defaults>
</compile_context>

<pallas_src>
import functools

import jax
import jax.numpy as jnp
import numpy as np
from jax.experimental import pallas as pl
from jax.experimental.pallas import tpu as pltpu


def dense_sgc_kernel(adj_ref, x_ref, eye_ref, rep_ref, bd_ref, mean_ref,
                     repc_ref, sel_ref, wc_ref, bc_ref, wl_ref, bl_ref,
                     out_ref, *, K, compute_dtype):
    # adj_ref : (Bt*N, N)      bf16/int8 adjacency rows of Bt graphs (tall slab)
    # x_ref   : (Bt*N, F)      node features
    # eye_ref : (Bt*N, N)      tall identity mask (self loops)
    # rep_ref : (N, Bt*N)      column replicator   rep[j, c]  = (c % N == j)
    # bd_ref  : (Bt*N, Bt*N)   block-diag mask     bd[r, c]   = (r//N == c//N)
    # mean_ref: (Bt, Bt*N)     per-graph ones      mean[b, c] = (c//N == b)
    # repc_ref: (H, Bt*H)      class replicator    repc[h, c] = (c % H == h)
    # sel_ref : (Bt, Bt*H)     per-graph selector  sel[b, c]  = (c//H == b)
    # wc/bc, wl/bl : conv.lin and lins[0] weights (compute_dtype) / biases (f32)
    # out_ref : (1, 1, Bt*H)   lane-dense log-softmax row for this grid step
    n_nodes = adj_ref.shape[-1]

    # --- self loops (torch: adj[:, idx, idx] = 1) + symmetric normalization ---
    adj = jnp.where(eye_ref[...] != 0.0, 1.0, adj_ref[...].astype(jnp.float32))
    deg = jnp.sum(adj, axis=-1, keepdims=True)                     # (Bt*N, 1)
    dinv = jax.lax.rsqrt(jnp.maximum(deg, 1.0))                    # (Bt*N, 1)
    adj_l = dinv * adj                                             # D^-1/2 A  (left-scaled)

    # --- pack the Bt graphs block-diagonally into one (Bt*N, Bt*N) operand ----
    # adj_rep[r, c] = adj_l[r, c % N]  (exact: a single {0,1} entry per column)
    adj_rep = jnp.dot(adj_l, rep_ref[...], preferred_element_type=jnp.float32)
    a_bd = (adj_rep * bd_ref[...]).astype(compute_dtype)           # (Bt*N, Bt*N)

    # --- K propagation rounds: y <- (D^-1/2 A)(D^-1/2 y), one wide MXU matmul -
    y = x_ref[...].astype(jnp.float32)                             # (Bt*N, F)
    for _ in range(K):
        y = jnp.dot(a_bd, (dinv * y).astype(compute_dtype),
                    preferred_element_type=jnp.float32)

    # --- MLP head: conv.lin + ReLU, lins[0] + ReLU (norms are Identity) -------
    h = jnp.maximum(
        jnp.dot(y.astype(compute_dtype), wc_ref[...],
                preferred_element_type=jnp.float32) + bc_ref[...], 0.0)
    h = jnp.maximum(
        jnp.dot(h.astype(compute_dtype), wl_ref[...],
                preferred_element_type=jnp.float32) + bl_ref[...], 0.0)

    # --- mean over nodes via MXU (exact block-of-ones sum, then * 1/N) --------
    m = jnp.dot(mean_ref[...], h, preferred_element_type=jnp.float32) * (1.0 / n_nodes)

    # --- log_softmax over features (lin_final is identity when ntrans != 0) ---
    z = m - jnp.max(m, axis=-1, keepdims=True)
    logp = z - jnp.log(jnp.sum(jnp.exp(z), axis=-1, keepdims=True))   # (Bt, H)

    # --- lane-dense store: scatter row b into lanes [b*H, (b+1)*H) ------------
    # (two exact {0,1} matmuls + a mask; avoids a sublane->lane reshape and the
    #  masked 32-lane vst.msk stores of a (Bt, H) block)
    scat = jnp.dot(logp, repc_ref[...], preferred_element_type=jnp.float32)
    flat = jnp.sum(scat * sel_ref[...], axis=0, keepdims=True)        # (1, Bt*H)
    out_ref[0] = flat.astype(out_ref.dtype)


def dense_sgc_forward(x, adj, wc, bc, wl, bl, *, K=3, block_rows=256,
                      compute_dtype=jnp.float32, adj_dtype=jnp.bfloat16,
                      adj_buffers=2):
    """DenseSGC forward.

    block_rows : MXU row target per grid step (256 for v6e/v7x, 128 for v5e).
    adj_dtype  : HBM storage dtype of the {0,1} adjacency (bf16 exact; int8 -> 4x
                 less DMA).  Use f32 for weighted adjacencies.
    adj_buffers: >2 deepens the adjacency pipeline (pl.Buffered) for HBM-bound
                 v5e-style shapes; default 2 = standard double buffering.
    """
    B, N, F = x.shape
    H = wc.shape[1]

    Bt = max(1, min(B, block_rows // N))
    grid_b = pl.cdiv(B, Bt)
    B_pad = grid_b * Bt
    if B_pad != B:
        pad = B_pad - B
        x = jnp.pad(x, ((0, pad), (0, 0), (0, 0)))
        adj = jnp.pad(adj, ((0, pad), (0, 0), (0, 0)))
    NT = Bt * N

    # Tall 2-D views (pure row-major metadata reshape in HBM) -> no in-kernel
    # reshapes; kernel works on lane/sublane-friendly slabs.
    adj_flat = adj.reshape(B_pad * N, N).astype(adj_dtype)
    x_flat = x.reshape(B_pad * N, F).astype(jnp.float32)

    # Resident {0,1} helper matrices (DMA'd once, reused by every grid step).
    r_nt = jnp.arange(NT, dtype=jnp.int32)
    r_bh = jnp.arange(Bt * H, dtype=jnp.int32)
    eye_tall = jnp.tile(jnp.eye(N, dtype=jnp.float32), (Bt, 1))                       # (NT, N)
    rep_mat = (jnp.arange(N)[:, None] == (r_nt[None, :] % N)).astype(jnp.float32)     # (N, NT)
    bd_mask = ((r_nt[:, None] // N) == (r_nt[None, :] // N)).astype(jnp.float32)      # (NT, NT)
    mean_ones = (jnp.arange(Bt)[:, None] == (r_nt[None, :] // N)).astype(jnp.float32)  # (Bt, NT)
    rep_cls = (jnp.arange(H)[:, None] == (r_bh[None, :] % H)).astype(jnp.float32)     # (H, Bt*H)
    sel_cls = (jnp.arange(Bt)[:, None] == (r_bh[None, :] // H)).astype(jnp.float32)   # (Bt, Bt*H)

    # Pre-cast weights once (no per-step casts inside the kernel).
    wc_c = wc.astype(compute_dtype)
    wl_c = wl.astype(compute_dtype)
    bc2 = bc.reshape(1, H).astype(jnp.float32)
    bl2 = bl.reshape(1, H).astype(jnp.float32)

    adj_bytes = jnp.dtype(adj_dtype).itemsize
    cd_bytes = jnp.dtype(compute_dtype).itemsize

    cost = pl.CostEstimate(
        flops=2 * grid_b * (NT * N * NT + K * NT * NT * F + NT * F * H
                            + NT * H * H + Bt * NT * H + Bt * H * Bt * H),
        transcendentals=grid_b * (NT + Bt * H + Bt),
        bytes_accessed=(grid_b * (NT * N * adj_bytes + 4 * NT * F + 4 * Bt * H)
                        + 4 * (NT * N + N * NT + NT * NT + Bt * NT
                               + H * Bt * H + Bt * Bt * H + 2 * H)
                        + cd_bytes * (F * H + H * H)),
    )

    # VMEM budget: streamed blocks (multi-buffered) + residents + temporaries,
    # with headroom; capped at v7x's 64 MiB physical VMEM.
    resident = (4 * (NT * N + N * NT + NT * NT + Bt * NT + H * Bt * H
                     + Bt * Bt * H + 2 * H) + cd_bytes * (F * H + H * H))
    streamed = (max(2, adj_buffers) * NT * N * adj_bytes
                + 2 * (4 * NT * F + 4 * Bt * H))
    scratch = 4 * (3 * NT * NT + 4 * NT * max(F, H) + 3 * Bt * Bt * H)
    vmem_limit = int(min(64 * 2 ** 20,
                         max(16 * 2 ** 20, 2 * (resident + streamed + scratch))))

    adj_spec_kwargs = {}
    if adj_buffers > 2:
        adj_spec_kwargs["pipeline_mode"] = pl.Buffered(adj_buffers)

    resident_2d = lambda b: (0, 0)
    kernel = functools.partial(dense_sgc_kernel, K=K, compute_dtype=compute_dtype)
    out = pl.pallas_call(
        kernel,
        out_shape=jax.ShapeDtypeStruct((grid_b, 1, Bt * H), jnp.float32),
        grid=(grid_b,),
        in_specs=[
            pl.BlockSpec((NT, N), lambda b: (b, 0), **adj_spec_kwargs),  # adj slab
            pl.BlockSpec((NT, F), lambda b: (b, 0)),      # x slab
            pl.BlockSpec((NT, N), resident_2d),           # eye_tall
            pl.BlockSpec((N, NT), resident_2d),           # rep_mat
            pl.BlockSpec((NT, NT), resident_2d),          # bd_mask
            pl.BlockSpec((Bt, NT), resident_2d),          # mean_ones
            pl.BlockSpec((H, Bt * H), resident_2d),       # rep_cls
            pl.BlockSpec((Bt, Bt * H), resident_2d),      # sel_cls
            pl.BlockSpec((F, H), resident_2d),            # conv.lin weight
            pl.BlockSpec((1, H), resident_2d),            # conv.lin bias
            pl.BlockSpec((H, H), resident_2d),            # lins[0] weight
            pl.BlockSpec((1, H), resident_2d),            # lins[0] bias
        ],
        out_specs=pl.BlockSpec((1, 1, Bt * H), lambda b: (b, 0, 0)),
        compiler_params=pltpu.CompilerParams(
            dimension_semantics=("parallel",),            # v7x: shard across 2 TCs
            vmem_limit_bytes=vmem_limit),
        cost_estimate=cost,
    )(adj_flat, x_flat, eye_tall, rep_mat, bd_mask, mean_ones, rep_cls, sel_cls,
      wc_c, bc2, wl_c, bl2)

    return out.reshape(B_pad, H)[:B]


def dense_sgc_reference(x, adj, wc, bc, wl, bl, *, K=3):
    eye = jnp.eye(adj.shape[-1], dtype=bool)[None]
    adj = jnp.where(eye, 1.0, adj)
    deg = adj.sum(-1)
    dinv = jnp.maximum(deg, 1.0) ** -0.5
    adj = dinv[..., :, None] * adj * dinv[..., None, :]
    for _ in range(K):
        x = adj @ x
    h = jnp.maximum(x @ wc + bc, 0.0)
    h = jnp.maximum(h @ wl + bl, 0.0)
    m = h.mean(axis=1)
    return jax.nn.log_softmax(m, axis=-1)


if __name__ == "__main__":
    # Small shapes consistent with the module; Bt*N = 256 MXU rows per grid step,
    # grid of 4 steps (>= 2 per TensorCore on v7x).
    B, N = 64, 16
    nfeat, nhid, nclass = 32, 32, 7   # nclass unused (ntrans=1 -> lin_final identity)
    nconvs = 3                        # K of DenseSGConv

    key = jax.random.PRNGKey(0)
    kx, ka, k1, k2, k3 = jax.random.split(key, 5)

    x = jax.random.normal(kx, (B, N, nfeat), dtype=jnp.float32)
    adj = (jax.random.uniform(ka, (B, N, N)) > 0.7).astype(jnp.float32)
    adj = jnp.maximum(adj, jnp.swapaxes(adj, -1, -2))  # symmetric {0,1} adjacency

    # conv.lin: glorot-uniform weight (in, out) + zero bias
    glorot = float(np.sqrt(6.0 / (nfeat + nhid)))
    wc = jax.random.uniform(k1, (nfeat, nhid), minval=-glorot, maxval=glorot,
                            dtype=jnp.float32)
    bc = jnp.zeros((nhid,), dtype=jnp.float32)

    # lins[0]: torch.nn.Linear default-style uniform init, stored as (in, out)
    bound = float(1.0 / np.sqrt(nhid))
    wl = jax.random.uniform(k2, (nhid, nhid), minval=-bound, maxval=bound,
                            dtype=jnp.float32)
    bl = jax.random.uniform(k3, (nhid,), minval=-bound, maxval=bound,
                            dtype=jnp.float32)

    ref = dense_sgc_reference(x, adj, wc, bc, wl, bl, K=nconvs)

    # f32 path: tight check against the module semantics.
    out = dense_sgc_forward(x, adj, wc, bc, wl, bl, K=nconvs,
                            compute_dtype=jnp.float32)
    out = jax.block_until_ready(out)
    np.testing.assert_allclose(np.asarray(out), np.asarray(ref),
                               rtol=5e-4, atol=5e-4)

    # bf16-operand / f32-accumulate path (MXU rate path), loose check.
    out_bf16 = dense_sgc_forward(x, adj, wc, bc, wl, bl, K=nconvs,
                                 compute_dtype=jnp.bfloat16)
    out_bf16 = jax.block_until_ready(out_bf16)
    np.testing.assert_allclose(np.asarray(out_bf16), np.asarray(ref),
                               rtol=1e-1, atol=1e-1)

    print("KERNEL_OK")
</pallas_src>

<mosaic_0001>
module attributes {stable_mosaic.version = 11 : i64} {
  func.func @dense_sgc_kernel(%arg0: i32, %arg1: memref<256x16xbf16, #tpu.memory_space<vmem>>, %arg2: memref<256x32xf32, #tpu.memory_space<vmem>>, %arg3: memref<256x16xf32, #tpu.memory_space<vmem>>, %arg4: memref<16x256xf32, #tpu.memory_space<vmem>>, %arg5: memref<256x256xf32, #tpu.memory_space<vmem>>, %arg6: memref<16x256xf32, #tpu.memory_space<vmem>>, %arg7: memref<32x512xf32, #tpu.memory_space<vmem>>, %arg8: memref<16x512xf32, #tpu.memory_space<vmem>>, %arg9: memref<32x32xf32, #tpu.memory_space<vmem>>, %arg10: memref<1x32xf32, #tpu.memory_space<vmem>>, %arg11: memref<32x32xf32, #tpu.memory_space<vmem>>, %arg12: memref<1x32xf32, #tpu.memory_space<vmem>>, %arg13: memref<1x1x512xf32, #tpu.memory_space<vmem>>) attributes {dimension_semantics = [#tpu.dimension_semantics<parallel>], iteration_bounds = array<i64: 4>, scalar_prefetch = 0 : i64, scratch_operands = 0 : i64, tpu.core_type = #tpu.core_type<tc>, window_params = [{transform_indices = @transform_0, window_bounds = array<i64: 256, 16>}, {transform_indices = @transform_1, window_bounds = array<i64: 256, 32>}, {pipeline_mode = #tpu.pipeline_mode<synchronous>, transform_indices = @transform_2, window_bounds = array<i64: 256, 16>}, {pipeline_mode = #tpu.pipeline_mode<synchronous>, transform_indices = @transform_3, window_bounds = array<i64: 16, 256>}, {pipeline_mode = #tpu.pipeline_mode<synchronous>, transform_indices = @transform_4, window_bounds = array<i64: 256, 256>}, {pipeline_mode = #tpu.pipeline_mode<synchronous>, transform_indices = @transform_5, window_bounds = array<i64: 16, 256>}, {pipeline_mode = #tpu.pipeline_mode<synchronous>, transform_indices = @transform_6, window_bounds = array<i64: 32, 512>}, {pipeline_mode = #tpu.pipeline_mode<synchronous>, transform_indices = @transform_7, window_bounds = array<i64: 16, 512>}, {pipeline_mode = #tpu.pipeline_mode<synchronous>, transform_indices = @transform_8, window_bounds = array<i64: 32, 32>}, {pipeline_mode = #tpu.pipeline_mode<synchronous>, transform_indices = @transform_9, window_bounds = array<i64: 1, 32>}, {pipeline_mode = #tpu.pipeline_mode<synchronous>, transform_indices = @transform_10, window_bounds = array<i64: 32, 32>}, {pipeline_mode = #tpu.pipeline_mode<synchronous>, transform_indices = @transform_11, window_bounds = array<i64: 1, 32>}, {transform_indices = @transform_12, window_bounds = array<i64: 1, 1, 512>}]} {
    %c0 = arith.constant 0 : index
    %c0_0 = arith.constant 0 : index
    %0 = vector.load %arg3[%c0, %c0_0] : memref<256x16xf32, #tpu.memory_space<vmem>>, vector<256x16xf32>
    %cst = arith.constant 0.000000e+00 : f32
    %1 = vector.broadcast %cst : f32 to vector<256x16xf32>
    %2 = arith.cmpf one, %0, %1 : vector<256x16xf32>
    %c0_1 = arith.constant 0 : index
    %c0_2 = arith.constant 0 : index
    %3 = vector.load %arg1[%c0_1, %c0_2] : memref<256x16xbf16, #tpu.memory_space<vmem>>, vector<256x16xbf16>
    %4 = arith.extf %3 : vector<256x16xbf16> to vector<256x16xf32>
    %cst_3 = arith.constant 1.000000e+00 : f32
    %5 = vector.broadcast %cst_3 : f32 to vector<256x16xf32>
    %6 = arith.select %2, %5, %4 : vector<256x16xi1>, vector<256x16xf32>
    %cst_4 = arith.constant dense<0.000000e+00> : vector<256xf32>
    %7 = vector.multi_reduction <add>, %6, %cst_4 [1] : vector<256x16xf32> to vector<256xf32>
    %8 = vector.shape_cast %7 : vector<256xf32> to vector<256x1xf32>
    %cst_5 = arith.constant 1.000000e+00 : f32
    %9 = vector.broadcast %cst_5 : f32 to vector<256x1xf32>
    %10 = arith.maximumf %8, %9 : vector<256x1xf32>
    %11 = math.rsqrt %10 : vector<256x1xf32>
    %12 = vector.broadcast %11 : vector<256x1xf32> to vector<256x16xf32>
    %13 = arith.mulf %12, %6 : vector<256x16xf32>
    %c0_6 = arith.constant 0 : index
    %c0_7 = arith.constant 0 : index
    %14 = vector.load %arg4[%c0_6, %c0_7] : memref<16x256xf32, #tpu.memory_space<vmem>>, vector<16x256xf32>
    %cst_8 = arith.constant dense<0.000000e+00> : vector<256x256xf32>
    %15 = tpu.matmul %13, %14, %cst_8 {dimension_numbers = #tpu.dot_dimension_numbers<[1], [0], [0], [1], [0, 0, 1, 1], [], []>} : vector<256x16xf32>, vector<16x256xf32>, vector<256x256xf32> -> vector<256x256xf32>
    %c0_9 = arith.constant 0 : index
    %c0_10 = arith.constant 0 : index
    %16 = vector.load %arg5[%c0_9, %c0_10] : memref<256x256xf32, #tpu.memory_space<vmem>>, vector<256x256xf32>
    %17 = arith.mulf %15, %16 : vector<256x256xf32>
    %c0_11 = arith.constant 0 : index
    %c0_12 = arith.constant 0 : index
    %18 = vector.load %arg2[%c0_11, %c0_12] : memref<256x32xf32, #tpu.memory_space<vmem>>, vector<256x32xf32>
    %19 = vector.broadcast %11 : vector<256x1xf32> to vector<256x32xf32>
    %20 = arith.mulf %19, %18 : vector<256x32xf32>
    %cst_13 = arith.constant dense<0.000000e+00> : vector<256x32xf32>
    %21 = tpu.matmul %17, %20, %cst_13 {dimension_numbers = #tpu.dot_dimension_numbers<[1], [0], [0], [1], [0, 0, 1, 1], [], []>} : vector<256x256xf32>, vector<256x32xf32>, vector<256x32xf32> -> vector<256x32xf32>
    %22 = vector.broadcast %11 : vector<256x1xf32> to vector<256x32xf32>
    %23 = arith.mulf %22, %21 : vector<256x32xf32>
    %cst_14 = arith.constant dense<0.000000e+00> : vector<256x32xf32>
    %24 = tpu.matmul %17, %23, %cst_14 {dimension_numbers = #tpu.dot_dimension_numbers<[1], [0], [0], [1], [0, 0, 1, 1], [], []>} : vector<256x256xf32>, vector<256x32xf32>, vector<256x32xf32> -> vector<256x32xf32>
    %25 = vector.broadcast %11 : vector<256x1xf32> to vector<256x32xf32>
    %26 = arith.mulf %25, %24 : vector<256x32xf32>
    %cst_15 = arith.constant dense<0.000000e+00> : vector<256x32xf32>
    %27 = tpu.matmul %17, %26, %cst_15 {dimension_numbers = #tpu.dot_dimension_numbers<[1], [0], [0], [1], [0, 0, 1, 1], [], []>} : vector<256x256xf32>, vector<256x32xf32>, vector<256x32xf32> -> vector<256x32xf32>
    %c0_16 = arith.constant 0 : index
    %c0_17 = arith.constant 0 : index
    %28 = vector.load %arg9[%c0_16, %c0_17] : memref<32x32xf32, #tpu.memory_space<vmem>>, vector<32x32xf32>
    %cst_18 = arith.constant dense<0.000000e+00> : vector<256x32xf32>
    %29 = tpu.matmul %27, %28, %cst_18 {dimension_numbers = #tpu.dot_dimension_numbers<[1], [0], [0], [1], [0, 0, 1, 1], [], []>} : vector<256x32xf32>, vector<32x32xf32>, vector<256x32xf32> -> vector<256x32xf32>
    %c0_19 = arith.constant 0 : index
    %c0_20 = arith.constant 0 : index
    %30 = vector.load %arg10[%c0_19, %c0_20] : memref<1x32xf32, #tpu.memory_space<vmem>>, vector<1x32xf32>
    %31 = vector.broadcast %30 : vector<1x32xf32> to vector<256x32xf32>
    %32 = arith.addf %29, %31 : vector<256x32xf32>
    %cst_21 = arith.constant 0.000000e+00 : f32
    %33 = vector.broadcast %cst_21 : f32 to vector<256x32xf32>
    %34 = arith.maximumf %32, %33 : vector<256x32xf32>
    %c0_22 = arith.constant 0 : index
    %c0_23 = arith.constant 0 : index
    %35 = vector.load %arg11[%c0_22, %c0_23] : memref<32x32xf32, #tpu.memory_space<vmem>>, vector<32x32xf32>
    %cst_24 = arith.constant dense<0.000000e+00> : vector<256x32xf32>
    %36 = tpu.matmul %34, %35, %cst_24 {dimension_numbers = #tpu.dot_dimension_numbers<[1], [0], [0], [1], [0, 0, 1, 1], [], []>} : vector<256x32xf32>, vector<32x32xf32>, vector<256x32xf32> -> vector<256x32xf32>
    %c0_25 = arith.constant 0 : index
    %c0_26 = arith.constant 0 : index
    %37 = vector.load %arg12[%c0_25, %c0_26] : memref<1x32xf32, #tpu.memory_space<vmem>>, vector<1x32xf32>
    %38 = vector.broadcast %37 : vector<1x32xf32> to vector<256x32xf32>
    %39 = arith.addf %36, %38 : vector<256x32xf32>
    %cst_27 = arith.constant 0.000000e+00 : f32
    %40 = vector.broadcast %cst_27 : f32 to vector<256x32xf32>
    %41 = arith.maximumf %39, %40 : vector<256x32xf32>
    %c0_28 = arith.constant 0 : index
    %c0_29 = arith.constant 0 : index
    %42 = vector.load %arg6[%c0_28, %c0_29] : memref<16x256xf32, #tpu.memory_space<vmem>>, vector<16x256xf32>
    %cst_30 = arith.constant dense<0.000000e+00> : vector<16x32xf32>
    %43 = tpu.matmul %42, %41, %cst_30 {dimension_numbers = #tpu.dot_dimension_numbers<[1], [0], [0], [1], [0, 0, 1, 1], [], []>} : vector<16x256xf32>, vector<256x32xf32>, vector<16x32xf32> -> vector<16x32xf32>
    %cst_31 = arith.constant 6.250000e-02 : f32
    %44 = vector.broadcast %cst_31 : f32 to vector<16x32xf32>
    %45 = arith.mulf %43, %44 : vector<16x32xf32>
    %cst_32 = arith.constant dense<0xFF800000> : vector<16xf32>
    %46 = vector.multi_reduction <maximumf>, %45, %cst_32 [1] : vector<16x32xf32> to vector<16xf32>
    %47 = vector.shape_cast %46 : vector<16xf32> to vector<16x1xf32>
    %48 = vector.broadcast %47 : vector<16x1xf32> to vector<16x32xf32>
    %49 = arith.subf %45, %48 : vector<16x32xf32>
    %50 = math.exp %49 : vector<16x32xf32>
    %cst_33 = arith.constant dense<0.000000e+00> : vector<16xf32>
    %51 = vector.multi_reduction <add>, %50, %cst_33 [1] : vector<16x32xf32> to vector<16xf32>
    %52 = vector.shape_cast %51 : vector<16xf32> to vector<16x1xf32>
    %53 = math.log %52 : vector<16x1xf32>
    %54 = vector.broadcast %53 : vector<16x1xf32> to vector<16x32xf32>
    %55 = arith.subf %49, %54 : vector<16x32xf32>
    %c0_34 = arith.constant 0 : index
    %c0_35 = arith.constant 0 : index
    %56 = vector.load %arg7[%c0_34, %c0_35] : memref<32x512xf32, #tpu.memory_space<vmem>>, vector<32x512xf32>
    %cst_36 = arith.constant dense<0.000000e+00> : vector<16x512xf32>
    %57 = tpu.matmul %55, %56, %cst_36 {dimension_numbers = #tpu.dot_dimension_numbers<[1], [0], [0], [1], [0, 0, 1, 1], [], []>} : vector<16x32xf32>, vector<32x512xf32>, vector<16x512xf32> -> vector<16x512xf32>
    %c0_37 = arith.constant 0 : index
    %c0_38 = arith.constant 0 : index
    %58 = vector.load %arg8[%c0_37, %c0_38] : memref<16x512xf32, #tpu.memory_space<vmem>>, vector<16x512xf32>
    %59 = arith.mulf %57, %58 : vector<16x512xf32>
    %cst_39 = arith.constant dense<0.000000e+00> : vector<512xf32>
    %60 = vector.multi_reduction <add>, %59, %cst_39 [0] : vector<16x512xf32> to vector<512xf32>
    %61 = vector.shape_cast %60 : vector<512xf32> to vector<1x512xf32>
    %c0_40 = arith.constant 0 : index
    %c0_41 = arith.constant 0 : index
    %c0_42 = arith.constant 0 : index
    %62 = vector.load %arg13[%c0_40, %c0_41, %c0_42] : memref<1x1x512xf32, #tpu.memory_space<vmem>>, vector<1x1x512xf32>
    %63 = vector.shape_cast %62 : vector<1x1x512xf32> to vector<1x512xf32>
    %64 = vector.shape_cast %61 : vector<1x512xf32> to vector<1x1x512xf32>
    tpu.vector_store %arg13[%c0_40, %c0_41, %c0_42], %64 {strides = array<i32>} : memref<1x1x512xf32, #tpu.memory_space<vmem>>, vector<1x1x512xf32>,
    return
  }
  func.func @transform_0(%arg0: i32) -> (i32, i32) {
    %c0_i32 = arith.constant 0 : i32
    %c0_i32_0 = arith.constant 0 : i32
    return %arg0, %c0_i32 : i32, i32
  }
  func.func @transform_1(%arg0: i32) -> (i32, i32) {
    %c0_i32 = arith.constant 0 : i32
    %c0_i32_0 = arith.constant 0 : i32
    return %arg0, %c0_i32 : i32, i32
  }
  func.func @transform_2(%arg0: i32) -> (i32, i32) {
    %c0_i32 = arith.constant 0 : i32
    %c0_i32_0 = arith.constant 0 : i32
    %c0_i32_1 = arith.constant 0 : i32
    return %c0_i32, %c0_i32_0 : i32, i32
  }
  func.func @transform_3(%arg0: i32) -> (i32, i32) {
    %c0_i32 = arith.constant 0 : i32
    %c0_i32_0 = arith.constant 0 : i32
    %c0_i32_1 = arith.constant 0 : i32
    return %c0_i32, %c0_i32_0 : i32, i32
  }
  func.func @transform_4(%arg0: i32) -> (i32, i32) {
    %c0_i32 = arith.constant 0 : i32
    %c0_i32_0 = arith.constant 0 : i32
    %c0_i32_1 = arith.constant 0 : i32
    return %c0_i32, %c0_i32_0 : i32, i32
  }
  func.func @transform_5(%arg0: i32) -> (i32, i32) {
    %c0_i32 = arith.constant 0 : i32
    %c0_i32_0 = arith.constant 0 : i32
    %c0_i32_1 = arith.constant 0 : i32
    return %c0_i32, %c0_i32_0 : i32, i32
  }
  func.func @transform_6(%arg0: i32) -> (i32, i32) {
    %c0_i32 = arith.constant 0 : i32
    %c0_i32_0 = arith.constant 0 : i32
    %c0_i32_1 = arith.constant 0 : i32
    return %c0_i32, %c0_i32_0 : i32, i32
  }
  func.func @transform_7(%arg0: i32) -> (i32, i32) {
    %c0_i32 = arith.constant 0 : i32
    %c0_i32_0 = arith.constant 0 : i32
    %c0_i32_1 = arith.constant 0 : i32
    return %c0_i32, %c0_i32_0 : i32, i32
  }
  func.func @transform_8(%arg0: i32) -> (i32, i32) {
    %c0_i32 = arith.constant 0 : i32
    %c0_i32_0 = arith.constant 0 : i32
    %c0_i32_1 = arith.constant 0 : i32
    return %c0_i32, %c0_i32_0 : i32, i32
  }
  func.func @transform_9(%arg0: i32) -> (i32, i32) {
    %c0_i32 = arith.constant 0 : i32
    %c0_i32_0 = arith.constant 0 : i32
    %c0_i32_1 = arith.constant 0 : i32
    return %c0_i32, %c0_i32_0 : i32, i32
  }
  func.func @transform_10(%arg0: i32) -> (i32, i32) {
    %c0_i32 = arith.constant 0 : i32
    %c0_i32_0 = arith.constant 0 : i32
    %c0_i32_1 = arith.constant 0 : i32
    return %c0_i32, %c0_i32_0 : i32, i32
  }
  func.func @transform_11(%arg0: i32) -> (i32, i32) {
    %c0_i32 = arith.constant 0 : i32
    %c0_i32_0 = arith.constant 0 : i32
    %c0_i32_1 = arith.constant 0 : i32
    return %c0_i32, %c0_i32_0 : i32, i32
  }
  func.func @transform_12(%arg0: i32) -> (i32, i32, i32) {
    %c0_i32 = arith.constant 0 : i32
    %c0_i32_0 = arith.constant 0 : i32
    %c0_i32_1 = arith.constant 0 : i32
    return %arg0, %c0_i32, %c0_i32_0 : i32, i32, i32
  }
}

</mosaic_0001>

<bundles_post_ra>
// kernel: tpu_custom_call.1
= control target key start
LH: loop header
LB: loop body
LE: loop exit
PB: predicated region body
PF: predicated region fallthrough
CT: control target
= control target key end

     0   :  { %17 = vsyncpa [#allocation3], 0  ;;  %s5694_s0 = inlined_call_operand.vmem [shape: bf16[1024,16], index: 0, kind: input, shape index: {}]   ;;  %s5695_s1 = inlined_call_operand.vmem [shape: f32[1024,32], index: 1, kind: input, shape index: {}]   ;;  %s5696_s2 = inlined_call_operand.vmem [shape: f32[256,16], index: 2, kind: input, shape index: {}]   ;;  %s5697_s3 = inlined_call_operand.vmem [shape: f32[16,256], index: 3, kind: input, shape index: {}]   ;;  %s5698_s4 = inlined_call_operand.vmem [shape: f32[256,256], index: 4, kind: input, shape index: {}]   ;;  %s5699_s5 = inlined_call_operand.vmem [shape: f32[16,256], index: 5, kind: input, shape index: {}]   ;;  %s5700_s6 = inlined_call_operand.vmem [shape: f32[32,512], index: 6, kind: input, shape index: {}]   ;;  %s5701_s7 = inlined_call_operand.vmem [shape: f32[16,512], index: 7, kind: input, shape index: {}]   ;;  %s5702_s8 = inlined_call_operand.vmem [shape: f32[32,32], index: 8, kind: input, shape index: {}]   ;;  %s5703_s9 = inlined_call_operand.vmem [shape: f32[1,32], index: 9, kind: input, shape index: {}]   ;;  %s5704_s10 = inlined_call_operand.vmem [shape: f32[32,32], index: 10, kind: input, shape index: {}]   ;;  %s5705_s11 = inlined_call_operand.vmem [shape: f32[1,32], index: 11, kind: input, shape index: {}]   ;;  %s5706_s12 = inlined_call_operand.hbm [shape: f32[4,1,512], index: 12, kind: output, shape index: {}]  }
   0x1   :  { %19 = vsyncpa [#allocation3 + $0x1], 0  ;;  %s3976_s21 = smov 0   ;;  %s3978_s22 = smov 0  }
   0x2   :  { %s3980_s23 = smov 0   ;;  %s3982_s24 = smov 0  }
   0x3 LB: > { %5831 = sst [smem:[#allocation5_spill]] %s3902_s23  ;;  %s3997_s25 = sadd.s32 4294967295, %s3906_s24   ;;  %s3906_s24 = sphi %s3982_s24, %s6016_s24   ;;  %s3902_s23 = sphi %s3980_s23, %s6018_s23   ;;  %s3898_s22 = sphi %s3978_s22, %s6020_s22   ;;  %s3894_s21 = sphi %s3976_s21, %s6019_s21  }
   0x4   : > { %s3251_s26 = sadd.s32 4294967294, %s3906_s24   ;;  %s4001_s27 = sadd.s32 1, %s3906_s24  }
   0x5   : > { %5832 = sst [smem:[#allocation6_spill]] %s4001_s27  ;;  %s294_s28 = sadd.s32 1, %s3902_s23 }
   0x6   : > { %s291_s29 = ssub.s32 %s3906_s24, %s4001_s27  ;;  %p304_p0 = scmp.ne.s32.totalorder %s3902_s23, %s3898_s22 }
   0x7   : > { %p292_p1 = scmp.eq.s32.totalorder %s291_s29, 0  ;;  %p305_p2 = scmp.eq.s32.totalorder %s3997_s25, 3 }
   0x8   : > { %p310_p3 = scmp.ne.s32.totalorder %s3898_s22, %s3894_s21  ;;  %p311_p4 = scmp.eq.s32.totalorder %s3251_s26, 3 }
   0x9   : > { %s4012_s30 = scalar_select %p292_p1, %s3902_s23, %s294_s28  }
   0xa   : > { %p4014_p5 = por %p305_p2, %p304_p0  ;;  %p4018_p6 = por %p311_p4, %p310_p3 }
   0xb   : > { %5833 = sst [smem:[#allocation7_spill]] %s4012_s30  ;;  %p3254_p7 = scmp.ge.s32.totalorder %s3906_s24, 1 }
   0xc   : > { %s5835_s14 = scalar_select %p4018_p6, 1, 0 }
   0xd   : > { %p377_p8 = scmp.lt.s32.totalorder %s3906_s24, 5 }
   0xe   : > { %5836 = sst [smem:[#allocation8_spill]] %s5835_s14 }
   0xf   : > { %p378_p9 = pnand %p3254_p7, %p377_p8 }
  0x11   : > { %381 = sbr.rel (%p378_p9) target bundleno = 2575 (0xa0f), region = 68 }
  0x16   : > { %s3256_s15 = sshll.u32 %s3997_s25, 5  ;;  %v438_v0 = vld [vmem:[%s5696_s2 + $0x10] sm:$0xff]  ;;  %v436_v1 = vld [vmem:[%s5696_s2] sm:$0xff]  ;;  %v439_v2 = vld [vmem:[%s5696_s2 + $0x18] sm:$0xff]  ;;  %vm596_vm1 = vcmask 130048   ;;  %s3367_s29 = sshll.u32 %s3997_s25, 6 }
  0x17   : > { %p425_p10 = scmp.lt.s32.totalorder %s3256_s15, 127  ;;  %v437_v3 = vld [vmem:[%s5696_s2 + $0x8] sm:$0xff]  ;;  %vm470_vm0 = vcmp.ne.f32.partialorder %v438_v0, 0.0  ;;  %vm468_vm2 = vcmp.ne.f32.partialorder %v436_v1, 0.0  ;;  %vm471_vm3 = vcmp.ne.f32.partialorder %v439_v2, 0.0  ;;  %v440_v12 = vld [vmem:[%s5696_s2 + $0x20] sm:$0xff] }
  0x18   : > { %vm469_vm4 = vcmp.ne.f32.partialorder %v437_v3, 0.0  ;;  %v441_v11 = vld [vmem:[%s5696_s2 + $0x28] sm:$0xff]  ;;  %vm472_vm6 = vcmp.ne.f32.partialorder %v440_v12, 0.0  ;;  %v443_v22 = vld [vmem:[%s5696_s2 + $0x38] sm:$0xff]  ;;  %v442_v23 = vld [vmem:[%s5696_s2 + $0x30] sm:$0xff]  ;;  %s3910_s19 = smov [#allocation2]  }
  0x19   : > { %s6022_s15 = smov (!%p425_p10, %s3256_s15), 127  ;;  %vm473_vm5 = vcmp.ne.f32.partialorder %v441_v11, 0.0  ;;  %vm475_vm7 = vcmp.ne.f32.partialorder %v443_v22, 0.0  ;;  %vm474_vm8 = vcmp.ne.f32.partialorder %v442_v23, 0.0  ;;  %v445_v31 = vld [vmem:[%s5696_s2 + $0x48] sm:$0xff]  ;;  %v444_v32 = vld [vmem:[%s5696_s2 + $0x40] sm:$0xff] }
  0x1a   : > { %s3257_s30 = sshll.u32 %s6022_s15, 2  ;;  %vm477_vm9 = vcmp.ne.f32.partialorder %v445_v31, 0.0  ;;  %vm476_vm10 = vcmp.ne.f32.partialorder %v444_v32, 0.0  ;;  %v447_v40 = vld [vmem:[%s5696_s2 + $0x58] sm:$0xff]  ;;  %v446_v41 = vld [vmem:[%s5696_s2 + $0x50] sm:$0xff]  ;;  %v449_v49 = vld [vmem:[%s5696_s2 + $0x68] sm:$0xff] }
  0x1b   : > { %s4043_s14 = scalar_lea.vmem %s5694_s0, %s3257_s30  ;;  %vm479_vm11 = vcmp.ne.f32.partialorder %v447_v40, 0.0  ;;  %vm478_vm12 = vcmp.ne.f32.partialorder %v446_v41, 0.0  ;;  %v448_v50 = vld [vmem:[%s5696_s2 + $0x60] sm:$0xff]  ;;  %vm481_vm13 = vcmp.ne.f32.partialorder %v449_v49, 0.0  ;;  %v451_v58 = vld [vmem:[%s5696_s2 + $0x78] sm:$0xff]  ;;  %v450_v59 = vld [vmem:[%s5696_s2 + $0x70] sm:$0xff]  ;;  %s3178_s30 = scalar_lea.hbm %s5706_s12, %s3367_s29 }
  0x1c   : > { %v3432_v4 = vld [vmem:[%s4043_s14 + $0x8] sm:$0xff]   ;;  %v3369_v5 = vld [vmem:[%s4043_s14] sm:$0xff]   ;;  %v3433_v6 = vld [vmem:[%s4043_s14 + $0x10] sm:$0xff]   ;;  %vm480_vm14 = vcmp.ne.f32.partialorder %v448_v50, 0.0  ;;  %vm483_vm15 = vcmp.ne.f32.partialorder %v451_v58, 0.0  ;;  %s3850_s20 = sshll.u32 %s3910_s19, 4  ;;  %s3851_s20 = int_to_ptr.vmem [resolvable:$false] %s3850_s20 }
  0x1d   : > { %v3374_v7 = vunpack.c.l.bf16 %v3432_v4  ;;  %v3370_v8 = vunpack.c.l.bf16 %v3369_v5  ;;  %v3375_v9 = vunpack.c.h.bf16 %v3432_v4  ;;  %v3371_v10 = vunpack.c.h.bf16 %v3369_v5  ;;  %v3434_v21 = vld [vmem:[%s4043_s14 + $0x18] sm:$0xff]   ;;  %v3435_v30 = vld [vmem:[%s4043_s14 + $0x20] sm:$0xff]   ;;  %v3436_v39 = vld [vmem:[%s4043_s14 + $0x28] sm:$0xff]   ;;  %s3852_s25 = scalar_lea.vmem %s3851_s20, 128 }
  0x1e   : > { %v3379_v13 = vunpack.c.h.bf16 %v3433_v6  ;;  %v3378_v14 = vunpack.c.l.bf16 %v3433_v6  ;;  %v3383_v28 = vunpack.c.h.bf16 %v3434_v21  ;;  %v3382_v29 = vunpack.c.l.bf16 %v3434_v21  ;;  %v3437_v48 = vld [vmem:[%s4043_s14 + $0x30] sm:$0xff]   ;;  %v3438_v57 = vld [vmem:[%s4043_s14 + $0x38] sm:$0xff]   ;;  %v3439_v2 = vld [vmem:[%s4043_s14 + $0x40] sm:$0xff]  }
  0x1f   : > { %v4055_v15 = vsel %vm470_vm0, 1.0, %v3374_v7  ;;  %v4057_v16 = vsel %vm468_vm2, 1.0, %v3370_v8  ;;  %v4059_v17 = vsel %vm471_vm3, 1.0, %v3375_v9  ;;  %v4061_v18 = vsel %vm469_vm4, 1.0, %v3371_v10  ;;  %v453_v3 = vld [vmem:[%s5696_s2 + $0x88] sm:$0xff]  ;;  %v452_v4 = vld [vmem:[%s5696_s2 + $0x80] sm:$0xff] }
  0x20   : > { %v603_v19 = vsel %vm596_vm1, %v4055_v15, 0.0  ;;  %v597_v20 = vsel %vm596_vm1, %v4057_v16, 0.0  ;;  %v606_v24 = vsel %vm596_vm1, %v4059_v17, 0.0  ;;  %v600_v25 = vsel %vm596_vm1, %v4061_v18, 0.0  ;;  %v3440_v11 = vld [vmem:[%s4043_s14 + $0x48] sm:$0xff]   ;;  %v455_v12 = vld [vmem:[%s5696_s2 + $0x98] sm:$0xff] }
  0x21   : > { %604 = vadd.xlane.f32.xlu1 %v603_v19  ;;  %598 = vadd.xlane.f32.xlu0 %v597_v20  ;;  %v4078_v26 = vsel %vm473_vm5, 1.0, %v3379_v13  ;;  %v4080_v27 = vsel %vm472_vm6, 1.0, %v3378_v14  ;;  %v4093_v35 = vsel %vm475_vm7, 1.0, %v3383_v28  ;;  %v4095_v36 = vsel %vm474_vm8, 1.0, %v3382_v29  ;;  %v454_v13 = vld [vmem:[%s5696_s2 + $0x90] sm:$0xff]  ;;  %v792_v14 = vld [vmem:[%s5697_s3 + $0x18] sm:$0xff] }
  0x22   : > { %v612_v33 = vsel %vm596_vm1, %v4078_v26, 0.0  ;;  %v609_v34 = vsel %vm596_vm1, %v4080_v27, 0.0  ;;  %v3387_v37 = vunpack.c.h.bf16 %v3435_v30  ;;  %v3386_v38 = vunpack.c.l.bf16 %v3435_v30  ;;  %917 = vmatprep.subr.mxu0 %v792_v14  ;;  %v791_v21 = vld [vmem:[%s5697_s3 + $0x10] sm:$0xff]  ;;  %v790_v28 = vld [vmem:[%s5697_s3 + $0x8] sm:$0xff]  ;;  %v789_v30 = vld [vmem:[%s5697_s3] sm:$0xff] }
  0x23   : > { %v618_v42 = vsel %vm596_vm1, %v4093_v35, 0.0  ;;  %v615_v43 = vsel %vm596_vm1, %v4095_v36, 0.0  ;;  %v3391_v46 = vunpack.c.h.bf16 %v3436_v39  ;;  %v3390_v47 = vunpack.c.l.bf16 %v3436_v39  ;;  %918 = vmatpush1.msra.mxu0 %v791_v21  ;;  %v3441_v29 = vld [vmem:[%s4043_s14 + $0x50] sm:$0xff]   ;;  %v457_v31 = vld [vmem:[%s5696_s2 + $0xa8] sm:$0xff]  ;;  %v456_v32 = vld [vmem:[%s5696_s2 + $0xa0] sm:$0xff] }
  0x24   : > { %v4108_v44 = vsel %vm477_vm9, 1.0, %v3387_v37  ;;  %v4110_v45 = vsel %vm476_vm10, 1.0, %v3386_v38  ;;  %v3395_v55 = vunpack.c.h.bf16 %v3437_v48  ;;  %v3394_v56 = vunpack.c.l.bf16 %v3437_v48  ;;  %919 = vmatprep.subr.mxu0 %v790_v28  ;;  %v465_v14 = vld [vmem:[%s5696_s2 + $0xe8] sm:$0xff] }
  0x25   : > { %607 = vadd.xlane.f32.xlu1 %v606_v24  ;;  %601 = vadd.xlane.f32.xlu0 %v600_v25  ;;  %v624_v51 = vsel %vm596_vm1, %v4108_v44, 0.0  ;;  %v621_v52 = vsel %vm596_vm1, %v4110_v45, 0.0  ;;  %v4123_v53 = vsel %vm479_vm11, 1.0, %v3391_v46  ;;  %v4125_v54 = vsel %vm478_vm12, 1.0, %v3390_v47  ;;  %v458_v46 = vld [vmem:[%s5696_s2 + $0xb0] sm:$0xff] }
  0x26   : > { %v630_v60 = vsel %vm596_vm1, %v4123_v53, 0.0  ;;  %v627_v61 = vsel %vm596_vm1, %v4125_v54, 0.0  ;;  %v4138_v62 = vsel %vm481_vm13, 1.0, %v3395_v55  ;;  %v4140_v63 = vsel %vm480_vm14, 1.0, %v3394_v56  ;;  %920 = vmatpush1.msra.mxu0 %v789_v30  ;;  %v3443_v55 = vld [vmem:[%s4043_s14 + $0x60] sm:$0xff]   ;;  %v461_v56 = vld [vmem:[%s5696_s2 + $0xc8] sm:$0xff] }
  0x27   : > { %v3399_v0 = vunpack.c.h.bf16 %v3438_v57  ;;  %v3398_v1 = vunpack.c.l.bf16 %v3438_v57  ;;  %vm482_vm0 = vcmp.ne.f32.partialorder %v450_v59, 0.0  ;;  %v636_v5 = vsel %vm596_vm1, %v4138_v62, 0.0  ;;  %v460_v57 = vld [vmem:[%s5696_s2 + $0xc0] sm:$0xff]  ;;  %v3446_v30 = vld [vmem:[%s4043_s14 + $0x78] sm:$0xff]  }
  0x28   : > { %v633_v6 = vsel %vm596_vm1, %v4140_v63, 0.0  ;;  %v3403_v9 = vunpack.c.h.bf16 %v3439_v2  ;;  %v3402_v10 = vunpack.c.l.bf16 %v3439_v2  ;;  %vm485_vm2 = vcmp.ne.f32.partialorder %v453_v3, 0.0  ;;  %v3444_v2 = vld [vmem:[%s4043_s14 + $0x68] sm:$0xff]   ;;  %v463_v3 = vld [vmem:[%s5696_s2 + $0xd8] sm:$0xff] }
  0x29   : > { %613 = vadd.xlane.f32.xlu1 %v612_v33  ;;  %610 = vadd.xlane.f32.xlu0 %v609_v34  ;;  %v4153_v7 = vsel %vm483_vm15, 1.0, %v3399_v0  ;;  %v4155_v8 = vsel %vm482_vm0, 1.0, %v3398_v1  ;;  %vm484_vm3 = vcmp.ne.f32.partialorder %v452_v4, 0.0  ;;  %v3407_v24 = vunpack.c.h.bf16 %v3440_v11  ;;  %v462_v4 = vld [vmem:[%s5696_s2 + $0xd0] sm:$0xff] }
  0x2a   : > { %v642_v19 = vsel %vm596_vm1, %v4153_v7, 0.0  ;;  %v639_v20 = vsel %vm596_vm1, %v4155_v8, 0.0  ;;  %v4174_v22 = vsel %vm485_vm2, 1.0, %v3403_v9  ;;  %v4176_v23 = vsel %vm484_vm3, 1.0, %v3402_v10 }
  0x2b   : > { %v3406_v25 = vunpack.c.l.bf16 %v3440_v11  ;;  %vm487_vm4 = vcmp.ne.f32.partialorder %v455_v12, 0.0  ;;  %vm486_vm5 = vcmp.ne.f32.partialorder %v454_v13, 0.0  ;;  %v648_v33 = vsel %vm596_vm1, %v4174_v22, 0.0  ;;  %v3445_v13 = vld [vmem:[%s4043_s14 + $0x70] sm:$0xff]  }
  0x2c   : > { %v645_v34 = vsel %vm596_vm1, %v4176_v23, 0.0  ;;  %v5711_v37 = vmov 0.0   ;;  %v4196_v38 = vsel %vm487_vm4, 1.0, %v3407_v24  ;;  %v3411_v40 = vunpack.c.h.bf16 %v3441_v29 }
  0x2d   : > { %619 = vadd.xlane.f32.xlu1 %v618_v42  ;;  %616 = vadd.xlane.f32.xlu0 %v615_v43  ;;  %v4198_v39 = vsel %vm486_vm5, 1.0, %v3406_v25  ;;  %v3410_v41 = vunpack.c.l.bf16 %v3441_v29  ;;  %vm489_vm6 = vcmp.ne.f32.partialorder %v457_v31, 0.0  ;;  %vm488_vm7 = vcmp.ne.f32.partialorder %v456_v32, 0.0  ;;  %v3442_v42 = vld [vmem:[%s4043_s14 + $0x58] sm:$0xff]   ;;  %v466_v32 = vld [vmem:[%s5696_s2 + $0xf0] sm:$0xff]  ;;  %s3259_s14 = sshll.u32 %s6022_s15, 3 }
  0x2e   : > { %953 = vmatprep.mubr.f32.mxu0 %v5711_v37  ;;  %1338 = vmatprep.subr.mxu1 %v5711_v37  ;;  %v459_v43 = vld [vmem:[%s5696_s2 + $0xb8] sm:$0xff]  ;;  %v654_v47 = vsel %vm596_vm1, %v4196_v38, 0.0  ;;  %v651_v48 = vsel %vm596_vm1, %v4198_v39, 0.0  ;;  %v4213_v49 = vsel %vm489_vm6, 1.0, %v3411_v40  ;;  %vm490_vm9 = vcmp.ne.f32.partialorder %v458_v46, 0.0  ;;  %s4346_s16 = scalar_lea.vmem %s5695_s1, %s3259_s14  ;;  %s421_s14 = sand.u32 1, %s3898_s22  }
  0x2f   : > { %1595 = vmatprep.subr.mxu0 %v5711_v37  ;;  %v4215_v50 = vsel %vm488_vm7, 1.0, %v3410_v41  ;;  %vm491_vm8 = vcmp.ne.f32.partialorder %v459_v43, 0.0  ;;  %v660_v58 = vsel %vm596_vm1, %v4213_v49, 0.0  ;;  %v3419_v0 = vunpack.c.h.bf16 %v3443_v55  ;;  %v467_v31 = vld [vmem:[%s5696_s2 + $0xf8] sm:$0xff]  ;;  %s3255_s28 = sshll.u32 %s421_s14, 2  ;;  %s3166_s17 = scalar_lea.sflag [#allocation3], %s421_s14 }
  0x30   : > { %v657_v59 = vsel %vm596_vm1, %v4215_v50, 0.0  ;;  %v3418_v1 = vunpack.c.l.bf16 %v3443_v55  ;;  %vm493_vm10 = vcmp.ne.f32.partialorder %v461_v56, 0.0  ;;  %vm492_vm11 = vcmp.ne.f32.partialorder %v460_v57, 0.0 }
  0x31   : > { %625 = vadd.xlane.f32.xlu1 %v624_v51  ;;  %622 = vadd.xlane.f32.xlu0 %v621_v52  ;;  %v3415_v51 = vunpack.c.h.bf16 %v3442_v42  ;;  %v3414_v52 = vunpack.c.l.bf16 %v3442_v42  ;;  %v4243_v9 = vsel %vm493_vm10, 1.0, %v3419_v0  ;;  %v3423_v11 = vunpack.c.h.bf16 %v3444_v2 }
  0x32   : > { %v4245_v10 = vsel %vm492_vm11, 1.0, %v3418_v1  ;;  %v3422_v12 = vunpack.c.l.bf16 %v3444_v2  ;;  %vm495_vm12 = vcmp.ne.f32.partialorder %v463_v3, 0.0  ;;  %vm494_vm13 = vcmp.ne.f32.partialorder %v462_v4, 0.0 }
  0x33   : > { %v669_v21 = vsel %vm596_vm1, %v4245_v10, 0.0  ;;  %v4258_v24 = vsel %vm495_vm12, 1.0, %v3423_v11  ;;  %v3427_v28 = vunpack.c.h.bf16 %v3445_v13  ;;  %v3426_v29 = vunpack.c.l.bf16 %v3445_v13 }
  0x34   : > { %v4260_v25 = vsel %vm494_vm13, 1.0, %v3422_v12  ;;  %vm497_vm14 = vcmp.ne.f32.partialorder %v465_v14, 0.0  ;;  %v3431_v42 = vunpack.c.h.bf16 %v3446_v30  ;;  %v3430_v43 = vunpack.c.l.bf16 %v3446_v30 }
  0x35   : > { %631 = vadd.xlane.f32.xlu1 %v630_v60  ;;  %628 = vadd.xlane.f32.xlu0 %v627_v61  ;;  %v4228_v60 = vsel %vm491_vm8, 1.0, %v3415_v51  ;;  %v4230_v61 = vsel %vm490_vm9, 1.0, %v3414_v52  ;;  %v4273_v40 = vsel %vm497_vm14, 1.0, %v3427_v28  ;;  %vm499_vm0 = vcmp.ne.f32.partialorder %v467_v31, 0.0 }
  0x36   : > { %vm498_vm2 = vcmp.ne.f32.partialorder %v466_v32, 0.0  ;;  %v684_v46 = vsel %vm596_vm1, %v4273_v40, 0.0 }
  0x37   : > { %v4283_v51 = vsel %vm498_vm2, 1.0, %v3430_v43 }
  0x38   : > { %v687_v55 = vsel %vm596_vm1, %v4283_v51, 0.0 }
  0x39   : > { %637 = vadd.xlane.f32.xlu1 %v636_v5  ;;  %634 = vadd.xlane.f32.xlu0 %v633_v6  ;;  %v666_v5 = vsel %vm596_vm1, %v4228_v60, 0.0  ;;  %v663_v6 = vsel %vm596_vm1, %v4230_v61, 0.0 }
  0x3d   : > { %643 = vadd.xlane.f32.xlu1 %v642_v19  ;;  %640 = vadd.xlane.f32.xlu0 %v639_v20  ;;  %v464_v19 = vld [vmem:[%s5696_s2 + $0xe0] sm:$0xff]  ;;  %v672_v20 = vsel %vm596_vm1, %v4243_v9, 0.0 }
  0x3e   : > { %vm496_vm15 = vcmp.ne.f32.partialorder %v464_v19, 0.0 }
  0x3f   : > { %v4275_v41 = vsel %vm496_vm15, 1.0, %v3426_v29 }
  0x41   : > { %649 = vadd.xlane.f32.xlu1 %v648_v33  ;;  %646 = vadd.xlane.f32.xlu0 %v645_v34  ;;  %v678_v33 = vsel %vm596_vm1, %v4258_v24, 0.0  ;;  %v675_v34 = vsel %vm596_vm1, %v4260_v25, 0.0 }
  0x45   : > { %655 = vadd.xlane.f32.xlu1 %v654_v47  ;;  %652 = vadd.xlane.f32.xlu0 %v651_v48  ;;  %v681_v47 = vsel %vm596_vm1, %v4275_v41, 0.0  ;;  %v4281_v48 = vsel %vm499_vm0, 1.0, %v3431_v42 }
  0x46   : > { %v690_v52 = vsel %vm596_vm1, %v4281_v48, 0.0 }
  0x49   : > { %661 = vadd.xlane.f32.xlu1 %v660_v58  ;;  %658 = vadd.xlane.f32.xlu0 %v657_v59 }
  0x4d   : > { %667 = vadd.xlane.f32.xlu1 %v666_v5  ;;  %664 = vadd.xlane.f32.xlu0 %v663_v6 }
  0x51   : > { %673 = vadd.xlane.f32.xlu1 %v672_v20  ;;  %670 = vadd.xlane.f32.xlu0 %v669_v21 }
  0x55   : > { %679 = vadd.xlane.f32.xlu1 %v678_v33  ;;  %676 = vadd.xlane.f32.xlu0 %v675_v34 }
  0x59   : > { %685 = vadd.xlane.f32.xlu1 %v684_v46  ;;  %682 = vadd.xlane.f32.xlu0 %v681_v47 }
  0x5d   : > { %691 = vadd.xlane.f32.xlu1 %v690_v52  ;;  %688 = vadd.xlane.f32.xlu0 %v687_v55 }
  0xaa   : > { %v605_v56 = vpop.xlane.xlu1 %604  ;;  %v599_v57 = vpop.xlane.xlu0 %598 }
  0xab   : > { %v693_v58 = vmax.f32 %v599_v57, 1.0  ;;  %v695_v59 = vmax.f32 %v605_v56, 1.0 }
  0xad   : > { %3774 = vrsqrt.f32 %v693_v58 }
  0xae   : > { %v608_v0 = vpop.xlane.xlu1 %607  ;;  %v602_v1 = vpop.xlane.xlu0 %601  ;;  %3776 = vrsqrt.f32 %v695_v59 }
  0xaf   : > { %v694_v2 = vmax.f32 %v602_v1, 1.0  ;;  %v696_v3 = vmax.f32 %v608_v0, 1.0 }
  0xb1   : > { %3778 = vrsqrt.f32 %v694_v2 }
  0xb2   : > { %v614_v4 = vpop.xlane.xlu1 %613  ;;  %v611_v5 = vpop.xlane.xlu0 %610  ;;  %3780 = vrsqrt.f32 %v696_v3 }
  0xb3   : > { %v697_v6 = vmax.f32 %v611_v5, 1.0  ;;  %v698_v13 = vmax.f32 %v614_v4, 1.0 }
  0xb5   : > { %3782 = vrsqrt.f32 %v697_v6 }
  0xb6   : > { %v620_v11 = vpop.xlane.xlu1 %619  ;;  %v617_v12 = vpop.xlane.xlu0 %616  ;;  %3784 = vrsqrt.f32 %v698_v13 }
  0xb7   : > { %v699_v29 = vmax.f32 %v617_v12, 1.0  ;;  %v700_v34 = vmax.f32 %v620_v11, 1.0 }
  0xb9   : > { %3786 = vrsqrt.f32 %v699_v29  ;;  %v1289_v29 = vld [vmem:[%s4346_s16 + $0x78] sm:$0xff] }
  0xba   : > { %v626_v14 = vpop.xlane.xlu1 %625  ;;  %v623_v19 = vpop.xlane.xlu0 %622  ;;  %3788 = vrsqrt.f32 %v700_v34 }
  0xbb   : > { %v4289_v20 = vpop.eup %3774  ;;  %v701_v47 = vmax.f32 %v623_v19, 1.0  ;;  %v702_v1 = vmax.f32 %v626_v14, 1.0 }
  0xbc   : > { %5837 = vst [vmem:[#allocation9_spill] sm:$0xff] %v4289_v20  ;;  %v757_v21 = vmul.f32 %v4289_v20, %v4057_v16  ;;  %v4293_v28 = vpop.eup %3776 }
  0xbd   : > { %v759_v43 = vmul.f32 %v4293_v28, %v4055_v15  ;;  %3790 = vrsqrt.f32 %v701_v47 }
  0xbe   : > { %3260 = vmatmul.mubr.msk.f32.vlgmr.msra.gmra.mxu0 %vm596_vm1, %v757_v21  ;;  %v632_v30 = vpop.xlane.xlu1 %631  ;;  %v629_v31 = vpop.xlane.xlu0 %628 }
  0xbf   : > { %v4296_v32 = vpop.eup %3778  ;;  %959 = vmatprep.mubr.f32.mxu0 %v5711_v37  ;;  %v704_v0 = vmax.f32 %v632_v30, 1.0  ;;  %v703_v5 = vmax.f32 %v629_v31, 1.0  ;;  %v1288_v31 = vld [vmem:[%s4346_s16 + $0x70] sm:$0xff] }
  0xc0   : > { %v758_v33 = vmul.f32 %v4296_v32, %v4061_v18  ;;  %v4304_v46 = vpop.eup %3780 }
  0xc1   : > { %v760_v56 = vmul.f32 %v4304_v46, %v4059_v17 }
  0xc2   : > { %3261 = vmatmul.mubr.msk.f32.gmra.mxu0 %vm596_vm1, %v758_v33  ;;  %v638_v16 = vpop.xlane.xlu1 %637  ;;  %v635_v42 = vpop.xlane.xlu0 %634 }
  0xc3   : > { %965 = vmatprep.mubr.f32.mxu0 %v5711_v37  ;;  %v706_v52 = vmax.f32 %v638_v16, 1.0  ;;  %v4310_v57 = vpop.eup %3782  ;;  %v705_v58 = vmax.f32 %v635_v42, 1.0  ;;  %v1287_v42 = vld [vmem:[%s4346_s16 + $0x68] sm:$0xff] }
  0xc4   : > { %v761_v17 = vmul.f32 %v4310_v57, %v4080_v27  ;;  %v4320_v4 = vpop.eup %3784 }
  0xc5   : > { %3792 = vrsqrt.f32 %v706_v52  ;;  %v762_v12 = vmul.f32 %v4320_v4, %v4078_v26 }
  0xc6   : > { %3262 = vmatmul.mubr.msk.f32.gmra.mxu0 %vm596_vm1, %v759_v43  ;;  %v644_v55 = vpop.xlane.xlu1 %643  ;;  %v641_v18 = vpop.xlane.xlu0 %640 }
  0xc7   : > { %v708_v59 = vmax.f32 %v644_v55, 1.0  ;;  %971 = vmatprep.mubr.f32.mxu0 %v5711_v37  ;;  %v707_v15 = vmax.f32 %v641_v18, 1.0  ;;  %v4330_v13 = vpop.eup %3786  ;;  %v1286_v18 = vld [vmem:[%s4346_s16 + $0x60] sm:$0xff] }
  0xc8   : > { %v763_v19 = vmul.f32 %v4330_v13, %v4095_v36  ;;  %v4341_v21 = vpop.eup %3788 }
  0xc9   : > { %3794 = vrsqrt.f32 %v708_v59  ;;  %v764_v16 = vmul.f32 %v4341_v21, %v4093_v35 }
  0xca   : > { %3796 = vrsqrt.f32 %v707_v15  ;;  %3263 = vmatmul.mubr.msk.f32.gmra.mxu0 %vm596_vm1, %v760_v56  ;;  %v4314_v2 = vpop.xlane.xlu1 %649  ;;  %v4316_v3 = vpop.xlane.xlu0 %646 }
  0xcb   : > { %3798 = vrsqrt.f32 %v705_v58  ;;  %977 = vmatprep.mubr.f32.mxu0 %v5711_v37  ;;  %v4349_v26 = vpop.eup %3790 }
  0xcc   : > { %3800 = vrsqrt.f32 %v704_v0  ;;  %v765_v15 = vmul.f32 %v4349_v26, %v4110_v45  ;;  %v1285_v0 = vld [vmem:[%s4346_s16 + $0x58] sm:$0xff] }
  0xcd   : > { %3802 = vrsqrt.f32 %v702_v1 }
  0xce   : > { %3264 = vmatmul.mubr.msk.f32.gmra.mxu0 %vm596_vm1, %v761_v17  ;;  %v4324_v6 = vpop.xlane.xlu1 %655  ;;  %v4326_v11 = vpop.xlane.xlu0 %652  ;;  %3804 = vrsqrt.f32 %v703_v5 }
  0xcf   : > { %983 = vmatprep.mubr.f32.mxu0 %v5711_v37 }
  0xd2   : > { %3265 = vmatmul.mubr.msk.f32.gmra.mxu0 %vm596_vm1, %v762_v12  ;;  %v4335_v27 = vpop.xlane.xlu1 %661  ;;  %v4337_v14 = vpop.xlane.xlu0 %658  ;;  %v1284_v12 = vld [vmem:[%s4346_s16 + $0x50] sm:$0xff] }
  0xd3   : > { %989 = vmatprep.mubr.f32.mxu0 %v5711_v37  ;;  %v4352_v30 = vpop.eup %3792 }
  0xd4   : > { %v1319_v56 = vmul.f32 %v4352_v30, %v1287_v42  ;;  %v1283_v42 = vld [vmem:[%s4346_s16 + $0x48] sm:$0xff] }
  0xd6   : > { %v4355_v36 = vpop.eup %3794  ;;  %3266 = vmatmul.mubr.msk.f32.gmra.mxu0 %vm596_vm1, %v763_v19  ;;  %v4358_v33 = vpop.xlane.xlu1 %667 }
  0xd7   : > { %v4360_v34 = vpop.xlane.xlu0 %664  ;;  %v4365_v43 = vpop.eup %3796  ;;  %995 = vmatprep.mubr.f32.mxu0 %v5711_v37  ;;  %v1321_v47 = vmul.f32 %v4355_v36, %v1289_v29 }
  0xd8   : > { %v4369_v52 = vpop.eup %3798  ;;  %v1320_v55 = vmul.f32 %v4365_v43, %v1288_v31 }
  0xd9   : > { %1339 = vmatpush1.msra.mxu1 %v1321_v47  ;;  %v4374_v58 = vpop.eup %3800  ;;  %v1318_v17 = vmul.f32 %v4369_v52, %v1286_v18 }
  0xda   : > { %3267 = vmatmul.mubr.msk.f32.gmra.mxu0 %vm596_vm1, %v764_v16  ;;  %1340 = vmatprep.subr.mxu1 %v5711_v37  ;;  %v4378_v35 = vpop.xlane.xlu1 %673  ;;  %v4385_v1 = vpop.eup %3802  ;;  %v1317_v19 = vmul.f32 %v4374_v58, %v1285_v0  ;;  %v1281_v0 = vld [vmem:[%s4346_s16 + $0x38] sm:$0xff] }
  0xdb   : > { %v4380_v59 = vpop.xlane.xlu0 %670  ;;  %1341 = vmatpush1.msra.mxu1 %v1320_v55  ;;  %1001 = vmatprep.mubr.f32.mxu0 %v5711_v37  ;;  %v4389_v5 = vpop.eup %3804  ;;  %v766_v31 = vmul.f32 %v4385_v1, %v4108_v44  ;;  %v1282_v44 = vld [vmem:[%s4346_s16 + $0x40] sm:$0xff] }
  0xdc   : > { %1342 = vmatprep.subr.mxu1 %v5711_v37  ;;  %v1316_v16 = vmul.f32 %v4389_v5, %v1284_v12  ;;  %v767_v18 = vmul.f32 %v4389_v5, %v4125_v54  ;;  %v1314_v12 = vmul.f32 %v4349_v26, %v1282_v44 }
  0xdd   : > { %1343 = vmatpush1.msra.mxu1 %v1319_v56  ;;  %v709_v56 = vmax.f32 %v4316_v3, 1.0  ;;  %v768_v3 = vmul.f32 %v4374_v58, %v4123_v53 }
  0xde   : > { %3268 = vmatmul.mubr.msk.f32.gmra.mxu0 %vm596_vm1, %v765_v15  ;;  %v680_v45 = vpop.xlane.xlu1 %679  ;;  %1344 = vmatprep.subr.mxu1 %v5711_v37  ;;  %v1315_v15 = vmul.f32 %v4385_v1, %v1283_v42 }
  0xdf   : > { %v4396_v29 = vpop.xlane.xlu0 %676  ;;  %1345 = vmatpush1.msra.mxu1 %v1318_v17  ;;  %1007 = vmatprep.mubr.f32.mxu0 %v5711_v37  ;;  %3806 = vrsqrt.f32 %v709_v56  ;;  %v1278_v56 = vld [vmem:[%s4346_s16 + $0x20] sm:$0xff] }
  0xe0   : > { %1346 = vmatprep.subr.mxu1 %v5711_v37 }
  0xe1   : > { %1347 = vmatpush1.msra.mxu1 %v1317_v19 }
  0xe2   : > { %3269 = vmatmul.mubr.msk.f32.gmra.mxu0 %vm596_vm1, %v766_v31  ;;  %v686_v47 = vpop.xlane.xlu1 %685  ;;  %1348 = vmatprep.subr.mxu1 %v5711_v37  ;;  %v1313_v31 = vmul.f32 %v4341_v21, %v1281_v0  ;;  %v710_v0 = vmax.f32 %v4314_v2, 1.0  ;;  %v1277_v2 = vld [vmem:[%s4346_s16 + $0x18] sm:$0xff] }
  0xe3   : > { %v683_v55 = vpop.xlane.xlu0 %682  ;;  %1349 = vmatpush1.msra.mxu1 %v1316_v16  ;;  %1013 = vmatprep.mubr.f32.mxu0 %v5711_v37  ;;  %v722_v17 = vmax.f32 %v686_v47, 1.0  ;;  %v1280_v16 = vld [vmem:[%s4346_s16 + $0x30] sm:$0xff] }
  0xe4   : > { %1350 = vmatprep.subr.mxu1 %v5711_v37  ;;  %v721_v42 = vmax.f32 %v683_v55, 1.0  ;;  %v1312_v53 = vmul.f32 %v4330_v13, %v1280_v16  ;;  %v769_v55 = vmul.f32 %v4369_v52, %v4140_v63  ;;  %v1310_v63 = vmul.f32 %v4310_v57, %v1278_v56  ;;  %v1303_v56 = vld [vmem:[%s4346_s16 + $0xe8] sm:$0xff] }
  0xe5   : > { %1351 = vmatpush1.msra.mxu1 %v1315_v15  ;;  %3808 = vrsqrt.f32 %v722_v17  ;;  %v720_v15 = vmax.f32 %v680_v45, 1.0  ;;  %v719_v17 = vmax.f32 %v4396_v29, 1.0  ;;  %v711_v29 = vmax.f32 %v4326_v11, 1.0  ;;  %v1275_v11 = vld [vmem:[%s4346_s16 + $0x8] sm:$0xff] }
  0xe6   : > { %3270 = vmatmul.mubr.msk.f32.gmra.mxu0 %vm596_vm1, %v767_v18  ;;  %v692_v54 = vpop.xlane.xlu1 %691  ;;  %1352 = vmatprep.subr.mxu1 %v5711_v37  ;;  %v1279_v18 = vld [vmem:[%s4346_s16 + $0x28] sm:$0xff]  ;;  %v712_v16 = vmax.f32 %v4324_v6, 1.0 }
  0xe7   : > { %v689_v19 = vpop.xlane.xlu0 %688  ;;  %v724_v47 = vmax.f32 %v692_v54, 1.0  ;;  %1353 = vmatpush1.msra.mxu1 %v1314_v12  ;;  %1019 = vmatprep.mubr.f32.mxu0 %v5711_v37  ;;  %v1311_v45 = vmul.f32 %v4320_v4, %v1279_v18  ;;  %v718_v12 = vmax.f32 %v4378_v35, 1.0  ;;  %v770_v54 = vmul.f32 %v4352_v30, %v4138_v62 }
  0xe8   : > { %v723_v44 = vmax.f32 %v689_v19, 1.0  ;;  %1354 = vmatprep.subr.mxu1 %v5711_v37  ;;  %v1276_v19 = vld [vmem:[%s4346_s16 + $0x10] sm:$0xff]  ;;  %v1309_v35 = vmul.f32 %v4304_v46, %v1277_v2  ;;  %v1302_v2 = vld [vmem:[%s4346_s16 + $0xe0] sm:$0xff] }
  0xe9   : > { %3810 = vrsqrt.f32 %v724_v47  ;;  %1355 = vmatpush1.msra.mxu1 %v1313_v31  ;;  %v716_v31 = vmax.f32 %v4358_v33, 1.0  ;;  %v1308_v62 = vmul.f32 %v4293_v28, %v1276_v19  ;;  %v715_v47 = vmax.f32 %v4360_v34, 1.0  ;;  %v1304_v34 = vld [vmem:[%s4346_s16 + $0xf0] sm:$0xff] }
  0xea   : > { %3812 = vrsqrt.f32 %v723_v44  ;;  %3271 = vmatmul.mubr.msk.f32.gmra.mxu0 %vm596_vm1, %v768_v3  ;;  %1356 = vmatprep.subr.mxu1 %v5711_v37  ;;  %v717_v3 = vmax.f32 %v4380_v59, 1.0  ;;  %v771_v59 = vmul.f32 %v4365_v43, %v4155_v8  ;;  %v1307_v33 = vmul.f32 %v4296_v32, %v1275_v11  ;;  %v1305_v44 = vld [vmem:[%s4346_s16 + $0xf8] sm:$0xff] }
  0xeb   : > { %3814 = vrsqrt.f32 %v721_v42  ;;  %1357 = vmatpush1.msra.mxu1 %v1312_v53  ;;  %1025 = vmatprep.mubr.f32.mxu0 %v5711_v37  ;;  %v1274_v42 = vld [vmem:[%s4346_s16] sm:$0xff] }
  0xec   : > { %1358 = vmatprep.subr.mxu1 %v5711_v37  ;;  %3816 = vrsqrt.f32 %v720_v15  ;;  %v4460_v6 = vpop.eup %3806  ;;  %v714_v15 = vmax.f32 %v4335_v27, 1.0  ;;  %v1306_v8 = vmul.f32 %v4289_v20, %v1274_v42 }
  0xed   : > { %1359 = vmatpush1.msra.mxu1 %v1311_v45  ;;  %3818 = vrsqrt.f32 %v710_v0  ;;  %v713_v0 = vmax.f32 %v4337_v14, 1.0 }
  0xee   : > { %3272 = vmatmul.mubr.msk.f32.gmra.mxu0 %vm596_vm1, %v769_v55  ;;  %1360 = vmatprep.subr.mxu1 %v5711_v37  ;;  %3820 = vrsqrt.f32 %v719_v17  ;;  %v772_v55 = vmul.f32 %v4355_v36, %v4153_v7 }
  0xef   : > { %1361 = vmatpush1.msra.mxu1 %v1310_v63  ;;  %1031 = vmatprep.mubr.f32.mxu0 %v5711_v37  ;;  %3822 = vrsqrt.f32 %v718_v12  ;;  %v773_v63 = vmul.f32 %v4460_v6, %v4176_v23 }
  0xf0   : > { %1362 = vmatprep.subr.mxu1 %v5711_v37  ;;  %3824 = vrsqrt.f32 %v711_v29  ;;  %v1301_v29 = vld [vmem:[%s4346_s16 + $0xd8] sm:$0xff] }
  0xf1   : > { %1363 = vmatpush1.msra.mxu1 %v1309_v35  ;;  %3826 = vrsqrt.f32 %v717_v3  ;;  %v1300_v35 = vld [vmem:[%s4346_s16 + $0xd0] sm:$0xff] }
  0xf2   : > { %3273 = vmatmul.mubr.msk.f32.gmra.mxu0 %vm596_vm1, %v770_v54  ;;  %1364 = vmatprep.subr.mxu1 %v5711_v37  ;;  %v4464_v18 = vpop.eup %3808  ;;  %3828 = vrsqrt.f32 %v716_v31 }
  0xf3   : > { %1365 = vmatpush1.msra.mxu1 %v1308_v62  ;;  %1037 = vmatprep.mubr.f32.mxu0 %v5711_v37  ;;  %3830 = vrsqrt.f32 %v712_v16  ;;  %v1335_v7 = vmul.f32 %v4464_v18, %v1303_v56  ;;  %v1299_v62 = vld [vmem:[%s4346_s16 + $0xc8] sm:$0xff] }
  0xf4   : > { %1366 = vmatprep.subr.mxu1 %v5711_v37  ;;  %3832 = vrsqrt.f32 %v715_v47  ;;  %v1298_v47 = vld [vmem:[%s4346_s16 + $0xc0] sm:$0xff] }
  0xf5   : > { %1367 = vmatpush1.msra.mxu1 %v1307_v33  ;;  %3834 = vrsqrt.f32 %v714_v15  ;;  %v1297_v15 = vld [vmem:[%s4346_s16 + $0xb8] sm:$0xff] }
  0xf6   : > { %v4469_v53 = vpop.eup %3810  ;;  %3274 = vmatmul.mubr.msk.f32.gmra.mxu0 %vm596_vm1, %v771_v59  ;;  %1368 = vmatprep.subr.mxu1 %v5711_v37  ;;  %3836 = vrsqrt.f32 %v713_v0 }
  0xf7   : > { %v4477_v27 = vpop.eup %3812  ;;  %1369 = vmatpush1.msra.mxu1 %v1306_v8  ;;  %1043 = vmatprep.mubr.f32.mxu0 %v5711_v37  ;;  %v1337_v17 = vmul.f32 %v4469_v53, %v1305_v44 }
  0xf8   : > { %v4481_v45 = vpop.eup %3814  ;;  %1370 = vmatprep.subr.mxu1 %v5711_v37  ;;  %v1336_v14 = vmul.f32 %v4477_v27, %v1304_v34 }
  0xf9   : > { %1371 = vmatpush2.msra.mxu1 %v1337_v17  ;;  %v4487_v12 = vpop.eup %3816  ;;  %v1334_v19 = vmul.f32 %v4481_v45, %v1302_v2 }
  0xfa   : > { %3275 = vmatmul.mubr.msk.f32.gmra.mxu0 %vm596_vm1, %v772_v55  ;;  %1372 = vmatprep.subr.mxu1 %v5711_v37  ;;  %v4494_v54 = vpop.eup %3818  ;;  %v1333_v11 = vmul.f32 %v4487_v12, %v1301_v29  ;;  %v1296_v55 = vld [vmem:[%s4346_s16 + $0xb0] sm:$0xff]  ;;  %v1294_v29 = vld [vmem:[%s4346_s16 + $0xa0] sm:$0xff] }
  0xfb   : > { %1373 = vmatpush2.msra.mxu1 %v1336_v14  ;;  %1049 = vmatprep.mubr.f32.mxu0 %v5711_v37  ;;  %v4498_v3 = vpop.eup %3820  ;;  %v774_v23 = vmul.f32 %v4494_v54, %v4174_v22  ;;  %v1295_v14 = vld [vmem:[%s4346_s16 + $0xa8] sm:$0xff] }
  0xfc   : > { %1374 = vmatprep.subr.mxu1 %v5711_v37  ;;  %v4503_v31 = vpop.eup %3822  ;;  %v1332_v59 = vmul.f32 %v4498_v3, %v1300_v35 }
  0xfd   : > { %1375 = vmatpush2.msra.mxu1 %v1335_v7  ;;  %v4510_v16 = vpop.eup %3824  ;;  %v1331_v33 = vmul.f32 %v4503_v31, %v1299_v62  ;;  %v1291_v62 = vld [vmem:[%s4346_s16 + $0x88] sm:$0xff] }
  0xfe   : > { %3276 = vmatmul.mubr.msk.f32.gmra.mxu0 %vm596_vm1, %v773_v63  ;;  %1376 = vmatprep.subr.mxu1 %v5711_v37  ;;  %v4514_v42 = vpop.eup %3826  ;;  %v775_v22 = vmul.f32 %v4510_v16, %v4198_v39 }
  0xff   : > { %1377 = vmatpush2.msra.mxu1 %v1334_v19  ;;  %1055 = vmatprep.mubr.f32.mxu0 %v5711_v37  ;;  %v4519_v44 = vpop.eup %3828  ;;  %v1330_v34 = vmul.f32 %v4514_v42, %v1298_v47  ;;  %v1293_v19 = vld [vmem:[%s4346_s16 + $0x98] sm:$0xff] }
 0x100   : > { %1378 = vmatprep.subr.mxu1 %v5711_v37  ;;  %v4526_v8 = vpop.eup %3830  ;;  %v1329_v56 = vmul.f32 %v4519_v44, %v1297_v15  ;;  %v780_v15 = vmul.f32 %v4519_v44, %v4228_v60  ;;  %v783_v60 = vmul.f32 %v4498_v3, %v4260_v25  ;;  %v786_v25 = vmul.f32 %v4464_v18, %v4273_v40  ;;  %v1147_v40 = vld [vmem:[%s5698_s4 + $0x8] sm:$0xff] }
 0x101   : > { %1379 = vmatpush2.msra.mxu1 %v1333_v11  ;;  %v4530_v0 = vpop.eup %3832  ;;  %v776_v39 = vmul.f32 %v4526_v8, %v4196_v38 }
 0x102   : > { %3277 = vmatmul.mubr.msk.f32.gmra.mxu0 %vm596_vm1, %v774_v23  ;;  %1380 = vmatprep.subr.mxu1 %v5711_v37  ;;  %v4535_v17 = vpop.eup %3834  ;;  %v1328_v7 = vmul.f32 %v4530_v0, %v1296_v55  ;;  %v1325_v23 = vmul.f32 %v4526_v8, %v1293_v19  ;;  %v779_v47 = vmul.f32 %v4530_v0, %v4230_v61 }
 0x103   : > { %1381 = vmatpush2.msra.mxu1 %v1332_v59  ;;  %1061 = vmatprep.mubr.f32.mxu0 %v5711_v37  ;;  %v4542_v2 = vpop.eup %3836  ;;  %v1327_v63 = vmul.f32 %v4535_v17, %v1295_v14  ;;  %v778_v11 = vmul.f32 %v4535_v17, %v4213_v49  ;;  %v1290_v49 = vld [vmem:[%s4346_s16 + $0x80] sm:$0xff]  ;;  %v781_v61 = vmul.f32 %v4514_v42, %v4245_v10 }
 0x104   : > { %1382 = vmatprep.subr.mxu1 %v5711_v37  ;;  %v777_v38 = vmul.f32 %v4542_v2, %v4215_v50  ;;  %v1326_v35 = vmul.f32 %v4542_v2, %v1294_v29  ;;  %v1292_v50 = vld [vmem:[%s4346_s16 + $0x90] sm:$0xff]  ;;  %v784_v10 = vmul.f32 %v4487_v12, %v4258_v24  ;;  %v787_v24 = vmul.f32 %v4477_v27, %v4283_v51  ;;  %v1146_v51 = vld [vmem:[%s5698_s4] sm:$0xff]  ;;  %s423_s16 = scalar_lea.vmem [#allocation2], %s3255_s28 }
 0x105   : > { %1383 = vmatpush2.msra.mxu1 %v1331_v33  ;;  %v1324_v59 = vmul.f32 %v4510_v16, %v1292_v50  ;;  %v1323_v33 = vmul.f32 %v4494_v54, %v1291_v62  ;;  %v1150_v50 = vld [vmem:[%s5698_s4 + $0x20] sm:$0xff]  ;;  %s3180_s15 = sshll.u32 %s423_s16, 4  ;;  %s3181_s15 = int_to_ptr.vmem [resolvable:$true] %s3180_s15 }
 0x106   : > { %3278 = vmatmul.mubr.msk.f32.gmra.mxu0 %vm596_vm1, %v775_v22  ;;  %1384 = vmatprep.subr.mxu1 %v5711_v37  ;;  %v1322_v22 = vmul.f32 %v4460_v6, %v1290_v49  ;;  %v1153_v49 = vld [vmem:[%s5698_s4 + $0x38] sm:$0xff]  ;;  %s3846_s18 = scalar_lea.vmem %s3181_s15, 64  ;;  %p3853_p0 = scmp.lt.s32.totalorder %s3181_s15, %s3851_s20 }
 0x107   : > { %1385 = vmatpush2.msra.mxu1 %v1330_v34  ;;  %1067 = vmatprep.mubr.f32.mxu0 %v5711_v37  ;;  %v782_v34 = vmul.f32 %v4503_v31, %v4243_v9  ;;  %v785_v9 = vmul.f32 %v4481_v45, %v4275_v41  ;;  %v788_v41 = vmul.f32 %v4469_v53, %v4281_v48  ;;  %v1149_v48 = vld [vmem:[%s5698_s4 + $0x18] sm:$0xff]  ;;  %p3847_p11 = scmp.ne.s32.totalorder %s3181_s15, %s3846_s18  ;;  %p3854_p1 = scmp.lt.s32.totalorder %s3852_s25, %s3846_s18 }
 0x108   : > { %1386 = vmatprep.subr.mxu1 %v5711_v37 }
 0x109   : > { %1387 = vmatpush2.msra.mxu1 %v1329_v56  ;;  %p3848_p12 = pnand %p3847_p11, %p4014_p5  ;;  %p3855_p2 = por %p3854_p1, %p3853_p0 }
 0x10a   : > { %3279 = vmatmul.mubr.msk.f32.gmra.mxu0 %vm596_vm1, %v776_v39  ;;  %1388 = vmatprep.subr.mxu1 %v5711_v37 }
 0x10b   : > { %1389 = vmatpush2.msra.mxu1 %v1328_v7  ;;  %1073 = vmatprep.mubr.f32.mxu0 %v5711_v37  ;;  %p3849_p13 = pneg %p3848_p12 }
 0x10c   : > { %1390 = vmatprep.subr.mxu1 %v5711_v37 }
 0x10d   : > { %1391 = vmatpush2.msra.mxu1 %v1327_v63  ;;  %v1148_v63 = vld [vmem:[%s5698_s4 + $0x10] sm:$0xff]  ;;  %p3856_p3 = pnand %p3855_p2, %p3849_p13 }
 0x10e   : > { %3280 = vmatmul.mubr.msk.f32.gmra.mxu0 %vm596_vm1, %v777_v38  ;;  %1392 = vmatprep.subr.mxu1 %v5711_v37 }
 0x10f   : > { %1393 = vmatpush2.msra.mxu1 %v1326_v35  ;;  %1079 = vmatprep.mubr.f32.mxu0 %v5711_v37 }
 0x110   : > { %1394 = vmatprep.subr.mxu1 %v5711_v37 }
 0x111   : > { %1395 = vmatpush2.msra.mxu1 %v1325_v23 }
 0x112   : > { %3281 = vmatmul.mubr.msk.f32.gmra.mxu0 %vm596_vm1, %v778_v11  ;;  %1396 = vmatprep.subr.mxu1 %v5711_v37  ;;  %v1151_v11 = vld [vmem:[%s5698_s4 + $0x28] sm:$0xff] }
 0x113   : > { %1397 = vmatpush2.msra.mxu1 %v1324_v59  ;;  %1085 = vmatprep.mubr.f32.mxu0 %v5711_v37 }
 0x114   : > { %1398 = vmatprep.subr.mxu1 %v5711_v37 }
 0x115   : > { %1399 = vmatpush2.msra.mxu1 %v1323_v33  ;;  %v1152_v33 = vld [vmem:[%s5698_s4 + $0x30] sm:$0xff] }
 0x116   : > { %3282 = vmatmul.mubr.msk.f32.gmra.mxu0 %vm596_vm1, %v779_v47  ;;  %1400 = vmatprep.subr.mxu1 %v5711_v37 }
 0x117   : > { %1401 = vmatpush2.msra.mxu1 %v1322_v22  ;;  %1091 = vmatprep.mubr.f32.mxu0 %v5711_v37 }
 0x118   : > { %3669 = vmatprep.subr.mxu1 %v5711_v37 }
 0x11a   : > { %3283 = vmatmul.mubr.msk.f32.gmra.mxu0 %vm596_vm1, %v780_v15 }
 0x11b   : > { %1097 = vmatprep.mubr.f32.mxu0 %v5711_v37 }
 0x11e   : > { %3284 = vmatmul.mubr.msk.f32.gmra.mxu0 %vm596_vm1, %v781_v61 }
 0x11f   : > { %1103 = vmatprep.mubr.f32.mxu0 %v5711_v37 }
 0x122   : > { %3285 = vmatmul.mubr.msk.f32.gmra.mxu0 %vm596_vm1, %v782_v34 }
 0x123   : > { %1109 = vmatprep.mubr.f32.mxu0 %v5711_v37 }
 0x126   : > { %3286 = vmatmul.mubr.msk.f32.gmra.mxu0 %vm596_vm1, %v783_v60  ;;  %v1155_v60 = vld [vmem:[%s5698_s4 + $0x48] sm:$0xff] }
 0x127   : > { %1115 = vmatprep.mubr.f32.mxu0 %v5711_v37 }
 0x12a   : > { %3287 = vmatmul.mubr.msk.f32.gmra.mxu0 %vm596_vm1, %v784_v10  ;;  %v1154_v10 = vld [vmem:[%s5698_s4 + $0x40] sm:$0xff] }
 0x12b   : > { %1121 = vmatprep.mubr.f32.mxu0 %v5711_v37 }
 0x12e   : > { %3288 = vmatmul.mubr.msk.f32.gmra.mxu0 %vm596_vm1, %v785_v9 }
 0x12f   : > { %1127 = vmatprep.mubr.f32.mxu0 %v5711_v37 }
 0x132   : > { %3289 = vmatmul.mubr.msk.f32.gmra.mxu0 %vm596_vm1, %v786_v25 }
 0x133   : > { %1133 = vmatprep.mubr.f32.mxu0 %v5711_v37 }
 0x136   : > { %3290 = vmatmul.mubr.msk.f32.gmra.mxu0 %vm596_vm1, %v787_v24 }
 0x137   : > { %1139 = vmatprep.mubr.f32.mxu0 %v5711_v37 }
 0x13a   : > { %3291 = vmatmul.mubr.msk.f32.gmra.mxu0 %vm596_vm1, %v788_v41  ;;  %vm2088_vm1 = vcmask 261120  }
 0x17e   : > { %v955_v55 = vpop.f32.mrf.mxu0 }
 0x17f   : > { %v4623_v14 = vmul.f32 %v1146_v51, %v955_v55  ;;  %v1157_v55 = vld [vmem:[%s5698_s4 + $0x58] sm:$0xff] }
 0x180   : > { %v957_v56 = vpop.f32.mrf.mxu0 }
 0x181   : > { %v4621_v39 = vmul.f32 %v1147_v40, %v957_v56  ;;  %v1156_v40 = vld [vmem:[%s5698_s4 + $0x50] sm:$0xff] }
 0x182   : > { %v961_v7 = vpop.f32.mrf.mxu0 }
 0x183   : > { %5838 = vst [vmem:[#allocation10_spill] sm:$0xff] %v4621_v39  ;;  %1402 = vmatprep.mubr.f32.mxu1 %v4621_v39  ;;  %1659 = vmatprep.mubr.f32.mxu0 %v4621_v39  ;;  %v4636_v19 = vmul.f32 %v1148_v63, %v961_v7  ;;  %v1159_v63 = vld [vmem:[%s5698_s4 + $0x68] sm:$0xff] }
 0x184   : > { %v963_v38 = vpop.f32.mrf.mxu0  ;;  %1403 = vmatmul.mubr.f32.vlgmr.msra.gmra.mxu1 %v4623_v14 }
 0x185   : > { %v4634_v29 = vmul.f32 %v1149_v48, %v963_v38  ;;  %v1158_v38 = vld [vmem:[%s5698_s4 + $0x60] sm:$0xff] }
 0x186   : > { %v967_v35 = vpop.f32.mrf.mxu0 }
 0x187   : > { %1407 = vmatprep.mubr.f32.mxu1 %v4634_v29  ;;  %v4648_v59 = vmul.f32 %v1150_v50, %v967_v35 }
 0x188   : > { %v969_v23 = vpop.f32.mrf.mxu0  ;;  %1408 = vmatmul.mubr.f32.gmra.mxu1 %v4636_v19 }
 0x189   : > { %v4646_v62 = vmul.f32 %v1151_v11, %v969_v23  ;;  %5840 = vst [vmem:[#allocation12_spill] sm:$0xff] %v4648_v59 }
 0x18a   : > { %v973_v47 = vpop.f32.mrf.mxu0 }
 0x18b   : > { %5839 = vst [vmem:[#allocation11_spill] sm:$0xff] %v4646_v62  ;;  %1412 = vmatprep.mubr.f32.mxu1 %v4646_v62  ;;  %v4660_v61 = vmul.f32 %v1152_v33, %v973_v47  ;;  %v1161_v47 = vld [vmem:[%s5698_s4 + $0x78] sm:$0xff] }
 0x18c   : > { %v975_v22 = vpop.f32.mrf.mxu0  ;;  %1413 = vmatmul.mubr.f32.gmra.mxu1 %v4648_v59 }
 0x18d   : > { %v4658_v15 = vmul.f32 %v1153_v49, %v975_v22  ;;  %5842 = vst [vmem:[#allocation14_spill] sm:$0xff] %v4660_v61  ;;  %v1160_v49 = vld [vmem:[%s5698_s4 + $0x70] sm:$0xff] }
 0x18e   : > { %v979_v34 = vpop.f32.mrf.mxu0 }
 0x18f   : > { %5841 = vst [vmem:[#allocation13_spill] sm:$0xff] %v4658_v15  ;;  %1417 = vmatprep.mubr.f32.mxu1 %v4658_v15  ;;  %v4672_v24 = vmul.f32 %v1154_v10, %v979_v34  ;;  %v1163_v10 = vld [vmem:[%s5698_s4 + $0x88] sm:$0xff] }
 0x190   : > { %v981_v9 = vpop.f32.mrf.mxu0  ;;  %1418 = vmatmul.mubr.f32.gmra.mxu1 %v4660_v61 }
 0x191   : > { %v4670_v25 = vmul.f32 %v1155_v60, %v981_v9  ;;  %5844 = vst [vmem:[#allocation16_spill] sm:$0xff] %v4672_v24  ;;  %v1162_v9 = vld [vmem:[%s5698_s4 + $0x80] sm:$0xff] }
 0x192   : > { %v985_v41 = vpop.f32.mrf.mxu0 }
 0x193   : > { %5843 = vst [vmem:[#allocation15_spill] sm:$0xff] %v4670_v25  ;;  %1422 = vmatprep.mubr.f32.mxu1 %v4670_v25  ;;  %v4684_v7 = vmul.f32 %v1156_v40, %v985_v41 }
 0x194   : > { %v987_v51 = vpop.f32.mrf.mxu0  ;;  %1423 = vmatmul.mubr.f32.gmra.mxu1 %v4672_v24 }
 0x195   : > { %v4682_v56 = vmul.f32 %v1157_v55, %v987_v51  ;;  %5846 = vst [vmem:[#allocation18_spill] sm:$0xff] %v4684_v7 }
 0x196   : > { %v991_v48 = vpop.f32.mrf.mxu0 }
 0x197   : > { %5845 = vst [vmem:[#allocation17_spill] sm:$0xff] %v4682_v56  ;;  %1427 = vmatprep.mubr.f32.mxu1 %v4682_v56  ;;  %v4696_v50 = vmul.f32 %v1158_v38, %v991_v48  ;;  %v1165_v48 = vld [vmem:[%s5698_s4 + $0x98] sm:$0xff] }
 0x198   : > { %v993_v35 = vpop.f32.mrf.mxu0  ;;  %1428 = vmatmul.mubr.f32.gmra.mxu1 %v4684_v7 }
 0x199   : > { %v4694_v11 = vmul.f32 %v1159_v63, %v993_v35  ;;  %5848 = vst [vmem:[#allocation20_spill] sm:$0xff] %v4696_v50  ;;  %v1164_v63 = vld [vmem:[%s5698_s4 + $0x90] sm:$0xff] }
 0x19a   : > { %v997_v23 = vpop.f32.mrf.mxu0 }
 0x19b   : > { %5847 = vst [vmem:[#allocation19_spill] sm:$0xff] %v4694_v11  ;;  %1432 = vmatprep.mubr.f32.mxu1 %v4694_v11  ;;  %v4708_v34 = vmul.f32 %v1160_v49, %v997_v23  ;;  %v1167_v49 = vld [vmem:[%s5698_s4 + $0xa8] sm:$0xff] }
 0x19c   : > { %v999_v33 = vpop.f32.mrf.mxu0  ;;  %1433 = vmatmul.mubr.f32.gmra.mxu1 %v4696_v50 }
 0x19d   : > { %v4706_v22 = vmul.f32 %v1161_v47, %v999_v33  ;;  %5850 = vst [vmem:[#allocation22_spill] sm:$0xff] %v4708_v34  ;;  %v1166_v33 = vld [vmem:[%s5698_s4 + $0xa0] sm:$0xff] }
 0x19e   : > { %v1003_v60 = vpop.f32.mrf.mxu0 }
 0x19f   : > { %5849 = vst [vmem:[#allocation21_spill] sm:$0xff] %v4706_v22  ;;  %1437 = vmatprep.mubr.f32.mxu1 %v4706_v22  ;;  %v4720_v40 = vmul.f32 %v1162_v9, %v1003_v60 }
 0x1a0   : > { %v1005_v41 = vpop.f32.mrf.mxu0  ;;  %1438 = vmatmul.mubr.f32.gmra.mxu1 %v4708_v34 }
 0x1a1   : > { %v4718_v55 = vmul.f32 %v1163_v10, %v1005_v41  ;;  %5852 = vst [vmem:[#allocation24_spill] sm:$0xff] %v4720_v40 }
 0x1a2   : > { %v1009_v51 = vpop.f32.mrf.mxu0 }
 0x1a3   : > { %5851 = vst [vmem:[#allocation23_spill] sm:$0xff] %v4718_v55  ;;  %1442 = vmatprep.mubr.f32.mxu1 %v4718_v55  ;;  %v4732_v23 = vmul.f32 %v1164_v63, %v1009_v51  ;;  %v1169_v51 = vld [vmem:[%s5698_s4 + $0xb8] sm:$0xff] }
 0x1a4   : > { %v1011_v38 = vpop.f32.mrf.mxu0  ;;  %1443 = vmatmul.mubr.f32.gmra.mxu1 %v4720_v40 }
 0x1a5   : > { %v4730_v35 = vmul.f32 %v1165_v48, %v1011_v38  ;;  %5854 = vst [vmem:[#allocation26_spill] sm:$0xff] %v4732_v23  ;;  %v1168_v48 = vld [vmem:[%s5698_s4 + $0xb0] sm:$0xff] }
 0x1a6   : > { %v1015_v47 = vpop.f32.mrf.mxu0 }
 0x1a7   : > { %5853 = vst [vmem:[#allocation25_spill] sm:$0xff] %v4730_v35  ;;  %1447 = vmatprep.mubr.f32.mxu1 %v4730_v35  ;;  %v4744_v9 = vmul.f32 %v1166_v33, %v1015_v47  ;;  %v1171_v33 = vld [vmem:[%s5698_s4 + $0xc8] sm:$0xff] }
 0x1a8   : > { %v1017_v60 = vpop.f32.mrf.mxu0  ;;  %1448 = vmatmul.mubr.f32.gmra.mxu1 %v4732_v23 }
 0x1a9   : > { %v4742_v10 = vmul.f32 %v1167_v49, %v1017_v60  ;;  %5856 = vst [vmem:[#allocation28_spill] sm:$0xff] %v4744_v9  ;;  %v1170_v60 = vld [vmem:[%s5698_s4 + $0xc0] sm:$0xff] }
 0x1aa   : > { %v1021_v41 = vpop.f32.mrf.mxu0 }
 0x1ab   : > { %5855 = vst [vmem:[#allocation27_spill] sm:$0xff] %v4742_v10  ;;  %1452 = vmatprep.mubr.f32.mxu1 %v4742_v10  ;;  %v4756_v49 = vmul.f32 %v1168_v48, %v1021_v41  ;;  %v1173_v48 = vld [vmem:[%s5698_s4 + $0xd8] sm:$0xff] }
 0x1ac   : > { %v1023_v63 = vpop.f32.mrf.mxu0  ;;  %1453 = vmatmul.mubr.f32.gmra.mxu1 %v4744_v9 }
 0x1ad   : > { %v4754_v38 = vmul.f32 %v1169_v51, %v1023_v63  ;;  %5858 = vst [vmem:[#allocation30_spill] sm:$0xff] %v4756_v49  ;;  %v1172_v63 = vld [vmem:[%s5698_s4 + $0xd0] sm:$0xff] }
 0x1ae   : > { %v1027_v47 = vpop.f32.mrf.mxu0 }
 0x1af   : > { %5857 = vst [vmem:[#allocation29_spill] sm:$0xff] %v4754_v38  ;;  %1457 = vmatprep.mubr.f32.mxu1 %v4754_v38  ;;  %v4768_v51 = vmul.f32 %v1170_v60, %v1027_v47  ;;  %v1174_v60 = vld [vmem:[%s5698_s4 + $0xe0] sm:$0xff] }
 0x1b0   : > { %v1029_v37 = vpop.f32.mrf.mxu0  ;;  %1458 = vmatmul.mubr.f32.gmra.mxu1 %v4756_v49 }
 0x1b1   : > { %v4766_v39 = vmul.f32 %v1171_v33, %v1029_v37  ;;  %5860 = vst [vmem:[#allocation32_spill] sm:$0xff] %v4768_v51  ;;  %v1175_v33 = vld [vmem:[%s5698_s4 + $0xe8] sm:$0xff] }
 0x1b2   : > { %v1033_v41 = vpop.f32.mrf.mxu0 }
 0x1b3   : > { %5859 = vst [vmem:[#allocation31_spill] sm:$0xff] %v4766_v39  ;;  %1462 = vmatprep.mubr.f32.mxu1 %v4766_v39  ;;  %v4780_v37 = vmul.f32 %v1172_v63, %v1033_v41  ;;  %v1176_v63 = vld [vmem:[%s5698_s4 + $0xf0] sm:$0xff] }
 0x1b4   : > { %v1035_v9 = vpop.f32.mrf.mxu0  ;;  %1463 = vmatmul.mubr.f32.gmra.mxu1 %v4768_v51 }
 0x1b5   : > { %v4778_v38 = vmul.f32 %v1173_v48, %v1035_v9  ;;  %5862 = vst [vmem:[#allocation34_spill] sm:$0xff] %v4780_v37  ;;  %v1177_v48 = vld [vmem:[%s5698_s4 + $0xf8] sm:$0xff] }
 0x1b6   : > { %v1039_v47 = vpop.f32.mrf.mxu0 }
 0x1b7   : > { %5861 = vst [vmem:[#allocation33_spill] sm:$0xff] %v4778_v38  ;;  %1467 = vmatprep.mubr.f32.mxu1 %v4778_v38  ;;  %v4792_v9 = vmul.f32 %v1174_v60, %v1039_v47  ;;  %v1178_v60 = vld [vmem:[%s5698_s4 + $0x100] sm:$0xff] }
 0x1b8   : > { %v1041_v49 = vpop.f32.mrf.mxu0  ;;  %1468 = vmatmul.mubr.f32.gmra.mxu1 %v4780_v37 }
 0x1b9   : > { %v4790_v39 = vmul.f32 %v1175_v33, %v1041_v49  ;;  %5864 = vst [vmem:[#allocation36_spill] sm:$0xff] %v4792_v9  ;;  %v1179_v33 = vld [vmem:[%s5698_s4 + $0x108] sm:$0xff] }
 0x1ba   : > { %v1045_v41 = vpop.f32.mrf.mxu0 }
 0x1bb   : > { %5863 = vst [vmem:[#allocation35_spill] sm:$0xff] %v4790_v39  ;;  %1472 = vmatprep.mubr.f32.mxu1 %v4790_v39  ;;  %v4804_v49 = vmul.f32 %v1176_v63, %v1045_v41  ;;  %v1180_v63 = vld [vmem:[%s5698_s4 + $0x110] sm:$0xff] }
 0x1bc   : > { %v1047_v51 = vpop.f32.mrf.mxu0  ;;  %1473 = vmatmul.mubr.f32.gmra.mxu1 %v4792_v9 }
 0x1bd   : > { %v4802_v38 = vmul.f32 %v1177_v48, %v1047_v51  ;;  %5866 = vst [vmem:[#allocation38_spill] sm:$0xff] %v4804_v49  ;;  %v1181_v48 = vld [vmem:[%s5698_s4 + $0x118] sm:$0xff] }
 0x1be   : > { %v1051_v47 = vpop.f32.mrf.mxu0 }
 0x1bf   : > { %5865 = vst [vmem:[#allocation37_spill] sm:$0xff] %v4802_v38  ;;  %1477 = vmatprep.mubr.f32.mxu1 %v4802_v38  ;;  %v4816_v51 = vmul.f32 %v1178_v60, %v1051_v47  ;;  %v1182_v60 = vld [vmem:[%s5698_s4 + $0x120] sm:$0xff] }
 0x1c0   : > { %v1053_v37 = vpop.f32.mrf.mxu0  ;;  %1478 = vmatmul.mubr.f32.gmra.mxu1 %v4804_v49 }
 0x1c1   : > { %v4814_v39 = vmul.f32 %v1179_v33, %v1053_v37  ;;  %5868 = vst [vmem:[#allocation40_spill] sm:$0xff] %v4816_v51  ;;  %v1183_v33 = vld [vmem:[%s5698_s4 + $0x128] sm:$0xff] }
 0x1c2   : > { %v1057_v41 = vpop.f32.mrf.mxu0 }
 0x1c3   : > { %5867 = vst [vmem:[#allocation39_spill] sm:$0xff] %v4814_v39  ;;  %1482 = vmatprep.mubr.f32.mxu1 %v4814_v39  ;;  %v4828_v37 = vmul.f32 %v1180_v63, %v1057_v41  ;;  %v1184_v63 = vld [vmem:[%s5698_s4 + $0x130] sm:$0xff] }
 0x1c4   : > { %v1059_v9 = vpop.f32.mrf.mxu0  ;;  %1483 = vmatmul.mubr.f32.gmra.mxu1 %v4816_v51 }
 0x1c5   : > { %v4826_v38 = vmul.f32 %v1181_v48, %v1059_v9  ;;  %5870 = vst [vmem:[#allocation42_spill] sm:$0xff] %v4828_v37  ;;  %v1185_v48 = vld [vmem:[%s5698_s4 + $0x138] sm:$0xff] }
 0x1c6   : > { %v1063_v47 = vpop.f32.mrf.mxu0 }
 0x1c7   : > { %5869 = vst [vmem:[#allocation41_spill] sm:$0xff] %v4826_v38  ;;  %1487 = vmatprep.mubr.f32.mxu1 %v4826_v38  ;;  %v4840_v9 = vmul.f32 %v1182_v60, %v1063_v47  ;;  %v1186_v60 = vld [vmem:[%s5698_s4 + $0x140] sm:$0xff] }
 0x1c8   : > { %v1065_v49 = vpop.f32.mrf.mxu0  ;;  %1488 = vmatmul.mubr.f32.gmra.mxu1 %v4828_v37 }
 0x1c9   : > { %v4838_v39 = vmul.f32 %v1183_v33, %v1065_v49  ;;  %5872 = vst [vmem:[#allocation44_spill] sm:$0xff] %v4840_v9  ;;  %v1187_v33 = vld [vmem:[%s5698_s4 + $0x148] sm:$0xff] }
 0x1ca   : > { %v1069_v41 = vpop.f32.mrf.mxu0 }
 0x1cb   : > { %5871 = vst [vmem:[#allocation43_spill] sm:$0xff] %v4838_v39  ;;  %1492 = vmatprep.mubr.f32.mxu1 %v4838_v39  ;;  %v4852_v49 = vmul.f32 %v1184_v63, %v1069_v41  ;;  %v1188_v63 = vld [vmem:[%s5698_s4 + $0x150] sm:$0xff] }
 0x1cc   : > { %v1071_v51 = vpop.f32.mrf.mxu0  ;;  %1493 = vmatmul.mubr.f32.gmra.mxu1 %v4840_v9 }
 0x1cd   : > { %v4850_v38 = vmul.f32 %v1185_v48, %v1071_v51  ;;  %5874 = vst [vmem:[#allocation46_spill] sm:$0xff] %v4852_v49  ;;  %v1189_v48 = vld [vmem:[%s5698_s4 + $0x158] sm:$0xff] }
 0x1ce   : > { %v1075_v47 = vpop.f32.mrf.mxu0 }
 0x1cf   : > { %5873 = vst [vmem:[#allocation45_spill] sm:$0xff] %v4850_v38  ;;  %1497 = vmatprep.mubr.f32.mxu1 %v4850_v38  ;;  %v4864_v51 = vmul.f32 %v1186_v60, %v1075_v47  ;;  %v1190_v60 = vld [vmem:[%s5698_s4 + $0x160] sm:$0xff] }
 0x1d0   : > { %v1077_v37 = vpop.f32.mrf.mxu0  ;;  %1498 = vmatmul.mubr.f32.gmra.mxu1 %v4852_v49 }
 0x1d1   : > { %v4862_v39 = vmul.f32 %v1187_v33, %v1077_v37  ;;  %5876 = vst [vmem:[#allocation48_spill] sm:$0xff] %v4864_v51  ;;  %v1191_v33 = vld [vmem:[%s5698_s4 + $0x168] sm:$0xff] }
 0x1d2   : > { %v1081_v41 = vpop.f32.mrf.mxu0 }
 0x1d3   : > { %5875 = vst [vmem:[#allocation47_spill] sm:$0xff] %v4862_v39  ;;  %1502 = vmatprep.mubr.f32.mxu1 %v4862_v39  ;;  %v4876_v37 = vmul.f32 %v1188_v63, %v1081_v41  ;;  %v1192_v63 = vld [vmem:[%s5698_s4 + $0x170] sm:$0xff] }
 0x1d4   : > { %v1083_v9 = vpop.f32.mrf.mxu0  ;;  %1503 = vmatmul.mubr.f32.gmra.mxu1 %v4864_v51 }
 0x1d5   : > { %v4874_v38 = vmul.f32 %v1189_v48, %v1083_v9  ;;  %5878 = vst [vmem:[#allocation50_spill] sm:$0xff] %v4876_v37  ;;  %v1193_v48 = vld [vmem:[%s5698_s4 + $0x178] sm:$0xff] }
 0x1d6   : > { %v1087_v47 = vpop.f32.mrf.mxu0 }
 0x1d7   : > { %5877 = vst [vmem:[#allocation49_spill] sm:$0xff] %v4874_v38  ;;  %1507 = vmatprep.mubr.f32.mxu1 %v4874_v38  ;;  %v4888_v9 = vmul.f32 %v1190_v60, %v1087_v47  ;;  %v1194_v60 = vld [vmem:[%s5698_s4 + $0x180] sm:$0xff] }
 0x1d8   : > { %v1089_v49 = vpop.f32.mrf.mxu0  ;;  %1508 = vmatmul.mubr.f32.gmra.mxu1 %v4876_v37 }
 0x1d9   : > { %v4886_v39 = vmul.f32 %v1191_v33, %v1089_v49  ;;  %5880 = vst [vmem:[#allocation52_spill] sm:$0xff] %v4888_v9  ;;  %v1195_v33 = vld [vmem:[%s5698_s4 + $0x188] sm:$0xff] }
 0x1da   : > { %v1093_v41 = vpop.f32.mrf.mxu0 }
 0x1db   : > { %5879 = vst [vmem:[#allocation51_spill] sm:$0xff] %v4886_v39  ;;  %1512 = vmatprep.mubr.f32.mxu1 %v4886_v39  ;;  %v4900_v49 = vmul.f32 %v1192_v63, %v1093_v41  ;;  %v1196_v63 = vld [vmem:[%s5698_s4 + $0x190] sm:$0xff] }
 0x1dc   : > { %v1095_v51 = vpop.f32.mrf.mxu0  ;;  %1513 = vmatmul.mubr.f32.gmra.mxu1 %v4888_v9 }
 0x1dd   : > { %v4898_v38 = vmul.f32 %v1193_v48, %v1095_v51  ;;  %5882 = vst [vmem:[#allocation54_spill] sm:$0xff] %v4900_v49  ;;  %v1197_v48 = vld [vmem:[%s5698_s4 + $0x198] sm:$0xff] }
 0x1de   : > { %v1099_v47 = vpop.f32.mrf.mxu0 }
 0x1df   : > { %5881 = vst [vmem:[#allocation53_spill] sm:$0xff] %v4898_v38  ;;  %1517 = vmatprep.mubr.f32.mxu1 %v4898_v38  ;;  %v4912_v51 = vmul.f32 %v1194_v60, %v1099_v47  ;;  %v1198_v60 = vld [vmem:[%s5698_s4 + $0x1a0] sm:$0xff] }
 0x1e0   : > { %v1101_v37 = vpop.f32.mrf.mxu0  ;;  %1518 = vmatmul.mubr.f32.gmra.mxu1 %v4900_v49 }
 0x1e1   : > { %v4910_v39 = vmul.f32 %v1195_v33, %v1101_v37  ;;  %5884 = vst [vmem:[#allocation56_spill] sm:$0xff] %v4912_v51  ;;  %v1199_v33 = vld [vmem:[%s5698_s4 + $0x1a8] sm:$0xff] }
 0x1e2   : > { %v1105_v41 = vpop.f32.mrf.mxu0 }
 0x1e3   : > { %5883 = vst [vmem:[#allocation55_spill] sm:$0xff] %v4910_v39  ;;  %1522 = vmatprep.mubr.f32.mxu1 %v4910_v39  ;;  %v4924_v37 = vmul.f32 %v1196_v63, %v1105_v41  ;;  %v1200_v63 = vld [vmem:[%s5698_s4 + $0x1b0] sm:$0xff] }
 0x1e4   : > { %v1107_v9 = vpop.f32.mrf.mxu0  ;;  %1523 = vmatmul.mubr.f32.gmra.mxu1 %v4912_v51 }
 0x1e5   : > { %v4922_v38 = vmul.f32 %v1197_v48, %v1107_v9  ;;  %5886 = vst [vmem:[#allocation58_spill] sm:$0xff] %v4924_v37  ;;  %v1201_v48 = vld [vmem:[%s5698_s4 + $0x1b8] sm:$0xff] }
 0x1e6   : > { %v1111_v47 = vpop.f32.mrf.mxu0 }
 0x1e7   : > { %5885 = vst [vmem:[#allocation57_spill] sm:$0xff] %v4922_v38  ;;  %1527 = vmatprep.mubr.f32.mxu1 %v4922_v38  ;;  %v4936_v9 = vmul.f32 %v1198_v60, %v1111_v47  ;;  %v1202_v60 = vld [vmem:[%s5698_s4 + $0x1c0] sm:$0xff] }
 0x1e8   : > { %v1113_v49 = vpop.f32.mrf.mxu0  ;;  %1528 = vmatmul.mubr.f32.gmra.mxu1 %v4924_v37 }
 0x1e9   : > { %v4934_v39 = vmul.f32 %v1199_v33, %v1113_v49  ;;  %5888 = vst [vmem:[#allocation60_spill] sm:$0xff] %v4936_v9  ;;  %v1203_v33 = vld [vmem:[%s5698_s4 + $0x1c8] sm:$0xff] }
 0x1ea   : > { %v1117_v41 = vpop.f32.mrf.mxu0 }
 0x1eb   : > { %5887 = vst [vmem:[#allocation59_spill] sm:$0xff] %v4934_v39  ;;  %1532 = vmatprep.mubr.f32.mxu1 %v4934_v39  ;;  %v4948_v49 = vmul.f32 %v1200_v63, %v1117_v41  ;;  %v1204_v63 = vld [vmem:[%s5698_s4 + $0x1d0] sm:$0xff] }
 0x1ec   : > { %v1119_v51 = vpop.f32.mrf.mxu0  ;;  %1533 = vmatmul.mubr.f32.gmra.mxu1 %v4936_v9 }
 0x1ed   : > { %v4946_v38 = vmul.f32 %v1201_v48, %v1119_v51  ;;  %5890 = vst [vmem:[#allocation62_spill] sm:$0xff] %v4948_v49  ;;  %v1205_v48 = vld [vmem:[%s5698_s4 + $0x1d8] sm:$0xff] }
 0x1ee   : > { %v1123_v47 = vpop.f32.mrf.mxu0 }
 0x1ef   : > { %5889 = vst [vmem:[#allocation61_spill] sm:$0xff] %v4946_v38  ;;  %1537 = vmatprep.mubr.f32.mxu1 %v4946_v38  ;;  %v4960_v51 = vmul.f32 %v1202_v60, %v1123_v47  ;;  %v1206_v60 = vld [vmem:[%s5698_s4 + $0x1e0] sm:$0xff] }
 0x1f0   : > { %v1125_v37 = vpop.f32.mrf.mxu0  ;;  %1538 = vmatmul.mubr.f32.gmra.mxu1 %v4948_v49 }
 0x1f1   : > { %v4958_v39 = vmul.f32 %v1203_v33, %v1125_v37  ;;  %5892 = vst [vmem:[#allocation64_spill] sm:$0xff] %v4960_v51  ;;  %v1207_v33 = vld [vmem:[%s5698_s4 + $0x1e8] sm:$0xff] }
 0x1f2   : > { %v1129_v41 = vpop.f32.mrf.mxu0 }
 0x1f3   : > { %5891 = vst [vmem:[#allocation63_spill] sm:$0xff] %v4958_v39  ;;  %1542 = vmatprep.mubr.f32.mxu1 %v4958_v39  ;;  %v4972_v37 = vmul.f32 %v1204_v63, %v1129_v41  ;;  %v1208_v63 = vld [vmem:[%s5698_s4 + $0x1f0] sm:$0xff] }
 0x1f4   : > { %v1131_v9 = vpop.f32.mrf.mxu0  ;;  %1543 = vmatmul.mubr.f32.gmra.mxu1 %v4960_v51 }
 0x1f5   : > { %v4970_v38 = vmul.f32 %v1205_v48, %v1131_v9  ;;  %5894 = vst [vmem:[#allocation66_spill] sm:$0xff] %v4972_v37  ;;  %v1209_v48 = vld [vmem:[%s5698_s4 + $0x1f8] sm:$0xff] }
 0x1f6   : > { %v1135_v47 = vpop.f32.mrf.mxu0 }
 0x1f7   : > { %5893 = vst [vmem:[#allocation65_spill] sm:$0xff] %v4970_v38  ;;  %1547 = vmatprep.mubr.f32.mxu1 %v4970_v38  ;;  %v4984_v9 = vmul.f32 %v1206_v60, %v1135_v47 }
 0x1f8   : > { %v1137_v49 = vpop.f32.mrf.mxu0  ;;  %1548 = vmatmul.mubr.f32.gmra.mxu1 %v4972_v37 }
 0x1f9   : > { %v4982_v39 = vmul.f32 %v1207_v33, %v1137_v49  ;;  %5896 = vst [vmem:[#allocation68_spill] sm:$0xff] %v4984_v9 }
 0x1fa   : > { %v1141_v41 = vpop.f32.mrf.mxu0 }
 0x1fb   : > { %5895 = vst [vmem:[#allocation67_spill] sm:$0xff] %v4982_v39  ;;  %1552 = vmatprep.mubr.f32.mxu1 %v4982_v39  ;;  %v4996_v49 = vmul.f32 %v1208_v63, %v1141_v41 }
 0x1fc   : > { %v1143_v51 = vpop.f32.mrf.mxu0  ;;  %1553 = vmatmul.mubr.f32.gmra.mxu1 %v4984_v9 }
 0x1fd   : > { %v4994_v38 = vmul.f32 %v1209_v48, %v1143_v51  ;;  %5898 = vst [vmem:[#allocation70_spill] sm:$0xff] %v4996_v49 }
 0x1ff   : > { %5897 = vst [vmem:[#allocation69_spill] sm:$0xff] %v4994_v38  ;;  %1557 = vmatprep.mubr.f32.mxu1 %v4994_v38 }
 0x200   : > { %1558 = vmatmul.mubr.f32.gmra.mxu1 %v4996_v49 }
 0x201   : > { %1936 = vmatprep.mubr.f32.mxu1 %v4670_v25 }
 0x244   : > { %v5001_v47 = vpop.f32.mrf.mxu1 }
 0x246   : > { %v1406_v33 = vpop.f32.mrf.mxu1 }
 0x248   : > { %v5003_v60 = vpop.f32.mrf.mxu1 }
 0x24a   : > { %v1411_v37 = vpop.f32.mrf.mxu1 }
 0x24c   : > { %v5005_v39 = vpop.f32.mrf.mxu1 }
 0x24e   : > { %v1416_v10 = vpop.f32.mrf.mxu1 }
 0x250   : > { %v5007_v9 = vpop.f32.mrf.mxu1 }
 0x252   : > { %v1421_v51 = vpop.f32.mrf.mxu1 }
 0x254   : > { %v5009_v41 = vpop.f32.mrf.mxu1 }
 0x256   : > { %v1426_v48 = vpop.f32.mrf.mxu1 }
 0x258   : > { %v1429_v63 = vpop.f32.mrf.mxu1 }
 0x25a   : > { %v1431_v38 = vpop.f32.mrf.mxu1 }
 0x25c   : > { %v1434_v49 = vpop.f32.mrf.mxu1 }
 0x25e   : > { %v1436_v23 = vpop.f32.mrf.mxu1 }
 0x260   : > { %v1439_v35 = vpop.f32.mrf.mxu1 }
 0x262   : > { %v1441_v40 = vpop.f32.mrf.mxu1 }
 0x264   : > { %v1444_v55 = vpop.f32.mrf.mxu1 }
 0x266   : > { %v1446_v33 = vpop.f32.mrf.mxu1 }
 0x268   : > { %v1449_v34 = vpop.f32.mrf.mxu1 }
 0x26a   : > { %v1451_v22 = vpop.f32.mrf.mxu1 }
 0x26b   : > { %v5899_v22 = vmov 0.0  }
 0x26c   : > { %v1454_v37 = vpop.f32.mrf.mxu1 }
 0x26e   : > { %v1456_v50 = vpop.f32.mrf.mxu1 }
 0x270   : > { %v1459_v11 = vpop.f32.mrf.mxu1 }
 0x272   : > { %v1461_v10 = vpop.f32.mrf.mxu1 }
 0x274   : > { %v1464_v7 = vpop.f32.mrf.mxu1 }
 0x276   : > { %v1466_v56 = vpop.f32.mrf.mxu1 }
 0x278   : > { %v1469_v51 = vpop.f32.mrf.mxu1 }
 0x279   : > { %v1576_v50 = vmul.f32 %v4352_v30, %v1469_v51 }
 0x27a   : > { %v1471_v24 = vpop.f32.mrf.mxu1 }
 0x27b   : > { %v1575_v24 = vmul.f32 %v4369_v52, %v1464_v7  ;;  %v1572_v7 = vmul.f32 %v4385_v1, %v1449_v34 }
 0x27c   : > { %v1474_v25 = vpop.f32.mrf.mxu1 }
 0x27d   : > { %v1577_v40 = vmul.f32 %v4365_v43, %v1474_v25 }
 0x27e   : > { %v1476_v48 = vpop.f32.mrf.mxu1 }
 0x27f   : > { %v1573_v48 = vmul.f32 %v4389_v5, %v1454_v37  ;;  %v1570_v37 = vmul.f32 %v4341_v21, %v1439_v35  ;;  %v1567_v35 = vmul.f32 %v4310_v57, %v5009_v41  ;;  %v1564_v41 = vmul.f32 %v4296_v32, %v5003_v60 }
 0x280   : > { %v1479_v61 = vpop.f32.mrf.mxu1 }
 0x281   : > { %v1578_v38 = vmul.f32 %v4355_v36, %v1479_v61  ;;  %v1574_v61 = vmul.f32 %v4374_v58, %v1459_v11 }
 0x282   : > { %v1481_v23 = vpop.f32.mrf.mxu1 }
 0x283   : > { %1596 = vmatpush1.msra.mxu0 %v1578_v38  ;;  %v1571_v23 = vmul.f32 %v4349_v26, %v1444_v55  ;;  %v1568_v55 = vmul.f32 %v4320_v4, %v1429_v63  ;;  %v1565_v63 = vmul.f32 %v4293_v28, %v5005_v39 }
 0x284   : > { %v5013_v33 = vpop.f32.mrf.mxu1  ;;  %1597 = vmatprep.subr.mxu0 %v5899_v22 }
 0x285   : > { %1598 = vmatpush1.msra.mxu0 %v1577_v40 }
 0x286   : > { %v1486_v10 = vpop.f32.mrf.mxu1  ;;  %1599 = vmatprep.subr.mxu0 %v5899_v22 }
 0x287   : > { %1600 = vmatpush1.msra.mxu0 %v1576_v50  ;;  %v1569_v50 = vmul.f32 %v4330_v13, %v1434_v49  ;;  %v1566_v49 = vmul.f32 %v4304_v46, %v5007_v9  ;;  %v1563_v9 = vmul.f32 %v4289_v20, %v5001_v47 }
 0x288   : > { %v5019_v56 = vpop.f32.mrf.mxu1  ;;  %1601 = vmatprep.subr.mxu0 %v5899_v22 }
 0x289   : > { %1602 = vmatpush1.msra.mxu0 %v1575_v24 }
 0x28a   : > { %v1491_v25 = vpop.f32.mrf.mxu1  ;;  %1603 = vmatprep.subr.mxu0 %v5899_v22 }
 0x28b   : > { %1604 = vmatpush1.msra.mxu0 %v1574_v61 }
 0x28c   : > { %v5025_v51 = vpop.f32.mrf.mxu1  ;;  %1605 = vmatprep.subr.mxu0 %v5899_v22 }
 0x28d   : > { %1606 = vmatpush1.msra.mxu0 %v1573_v48 }
 0x28e   : > { %v1496_v38 = vpop.f32.mrf.mxu1  ;;  %1607 = vmatprep.subr.mxu0 %v5899_v22 }
 0x28f   : > { %1608 = vmatpush1.msra.mxu0 %v1572_v7 }
 0x290   : > { %v5031_v11 = vpop.f32.mrf.mxu1  ;;  %1609 = vmatprep.subr.mxu0 %v5899_v22 }
 0x291   : > { %1610 = vmatpush1.msra.mxu0 %v1571_v23 }
 0x292   : > { %v1501_v40 = vpop.f32.mrf.mxu1  ;;  %1611 = vmatprep.subr.mxu0 %v5899_v22 }
 0x293   : > { %1612 = vmatpush1.msra.mxu0 %v1570_v37 }
 0x294   : > { %v5037_v34 = vpop.f32.mrf.mxu1  ;;  %1613 = vmatprep.subr.mxu0 %v5899_v22 }
 0x295   : > { %1614 = vmatpush1.msra.mxu0 %v1569_v50 }
 0x296   : > { %v1506_v10 = vpop.f32.mrf.mxu1  ;;  %1615 = vmatprep.subr.mxu0 %v5899_v22 }
 0x297   : > { %1616 = vmatpush1.msra.mxu0 %v1568_v55 }
 0x298   : > { %v5044_v24 = vpop.f32.mrf.mxu1  ;;  %1617 = vmatprep.subr.mxu0 %v5899_v22 }
 0x299   : > { %1618 = vmatpush1.msra.mxu0 %v1567_v35 }
 0x29a   : > { %v1511_v61 = vpop.f32.mrf.mxu1  ;;  %1619 = vmatprep.subr.mxu0 %v5899_v22 }
 0x29b   : > { %1620 = vmatpush1.msra.mxu0 %v1566_v49 }
 0x29c   : > { %v1514_v25 = vpop.f32.mrf.mxu1  ;;  %1621 = vmatprep.subr.mxu0 %v5899_v22 }
 0x29d   : > { %1622 = vmatpush1.msra.mxu0 %v1565_v63 }
 0x29e   : > { %v1516_v48 = vpop.f32.mrf.mxu1  ;;  %1623 = vmatprep.subr.mxu0 %v5899_v22 }
 0x29f   : > { %1624 = vmatpush1.msra.mxu0 %v1564_v41 }
 0x2a0   : > { %v1519_v7 = vpop.f32.mrf.mxu1  ;;  %1625 = vmatprep.subr.mxu0 %v5899_v22 }
 0x2a1   : > { %1626 = vmatpush1.msra.mxu0 %v1563_v9 }
 0x2a2   : > { %v1521_v39 = vpop.f32.mrf.mxu1  ;;  %1627 = vmatprep.subr.mxu0 %v5899_v22 }
 0x2a4   : > { %v1524_v38 = vpop.f32.mrf.mxu1 }
 0x2a6   : > { %v1526_v23 = vpop.f32.mrf.mxu1 }
 0x2a8   : > { %v1529_v37 = vpop.f32.mrf.mxu1 }
 0x2aa   : > { %v1531_v40 = vpop.f32.mrf.mxu1 }
 0x2ac   : > { %v1534_v60 = vpop.f32.mrf.mxu1 }
 0x2ae   : > { %v1536_v50 = vpop.f32.mrf.mxu1 }
 0x2b0   : > { %v1539_v55 = vpop.f32.mrf.mxu1 }
 0x2b1   : > { %v1590_v50 = vmul.f32 %v4487_v12, %v1539_v55  ;;  %v1586_v55 = vmul.f32 %v4519_v44, %v1519_v7  ;;  %v1582_v7 = vmul.f32 %v4526_v8, %v5031_v11  ;;  %v5903_v11 = vld [vmem:[#allocation17_spill] sm:$0xff] }
 0x2b2   : > { %v1541_v10 = vpop.f32.mrf.mxu1 }
 0x2b3   : > { %v1589_v10 = vmul.f32 %v4498_v3, %v1534_v60  ;;  %v1585_v60 = vmul.f32 %v4530_v0, %v1514_v25  ;;  %v1581_v25 = vmul.f32 %v4510_v16, %v5025_v51  ;;  %v5902_v51 = vld [vmem:[#allocation16_spill] sm:$0xff] }
 0x2b4   : > { %v1544_v35 = vpop.f32.mrf.mxu1 }
 0x2b5   : > { %v1591_v40 = vmul.f32 %v4481_v45, %v1544_v35  ;;  %v5904_v35 = vld [vmem:[#allocation18_spill] sm:$0xff] }
 0x2b6   : > { %v1546_v49 = vpop.f32.mrf.mxu1 }
 0x2b7   : > { %v1588_v49 = vmul.f32 %v4503_v31, %v1529_v37  ;;  %v1584_v37 = vmul.f32 %v4535_v17, %v5044_v24  ;;  %v1580_v24 = vmul.f32 %v4494_v54, %v5019_v56  ;;  %v5900_v56 = vld [vmem:[#allocation14_spill] sm:$0xff] }
 0x2b8   : > { %v1549_v61 = vpop.f32.mrf.mxu1 }
 0x2b9   : > { %v1592_v23 = vmul.f32 %v4464_v18, %v1549_v61  ;;  %v5905_v61 = vld [vmem:[#allocation19_spill] sm:$0xff] }
 0x2ba   : > { %v1551_v47 = vpop.f32.mrf.mxu1 }
 0x2bb   : > { %v5906_v47 = vld [vmem:[#allocation20_spill] sm:$0xff] }
 0x2bc   : > { %v1554_v63 = vpop.f32.mrf.mxu1 }
 0x2bd   : > { %v1593_v20 = vmul.f32 %v4477_v27, %v1554_v63  ;;  %v5907_v63 = vld [vmem:[#allocation21_spill] sm:$0xff] }
 0x2be   : > { %v1556_v41 = vpop.f32.mrf.mxu1 }
 0x2bf   : > { %v5908_v41 = vld [vmem:[#allocation22_spill] sm:$0xff] }
 0x2c0   : > { %v1559_v48 = vpop.f32.mrf.mxu1 }
 0x2c1   : > { %v1594_v9 = vmul.f32 %v4469_v53, %v1559_v48  ;;  %v5909_v48 = vld [vmem:[#allocation23_spill] sm:$0xff] }
 0x2c2   : > { %v1561_v39 = vpop.f32.mrf.mxu1 }
 0x2c3   : > { %1628 = vmatpush2.msra.mxu0 %v1594_v9  ;;  %v5910_v9 = vld [vmem:[#allocation24_spill] sm:$0xff]  ;;  %v5911_v39 = vld [vmem:[#allocation25_spill] sm:$0xff] }
 0x2c4   : > { %1629 = vmatprep.subr.mxu0 %v5899_v22 }
 0x2c5   : > { %1630 = vmatpush2.msra.mxu0 %v1593_v20  ;;  %v1587_v20 = vmul.f32 %v4514_v42, %v1524_v38  ;;  %v1583_v38 = vmul.f32 %v4542_v2, %v5037_v34  ;;  %v1579_v34 = vmul.f32 %v4460_v6, %v5013_v33  ;;  %v5901_v33 = vld [vmem:[#allocation15_spill] sm:$0xff] }
 0x2c6   : > { %1631 = vmatprep.subr.mxu0 %v5899_v22 }
 0x2c7   : > { %1632 = vmatpush2.msra.mxu0 %v1592_v23  ;;  %v5912_v23 = vld [vmem:[#allocation26_spill] sm:$0xff] }
 0x2c8   : > { %1633 = vmatprep.subr.mxu0 %v5899_v22 }
 0x2c9   : > { %1634 = vmatpush2.msra.mxu0 %v1591_v40  ;;  %v5913_v40 = vld [vmem:[#allocation27_spill] sm:$0xff] }
 0x2ca   : > { %1635 = vmatprep.subr.mxu0 %v5899_v22 }
 0x2cb   : > { %1636 = vmatpush2.msra.mxu0 %v1590_v50  ;;  %v5914_v50 = vld [vmem:[#allocation28_spill] sm:$0xff] }
 0x2cc   : > { %1637 = vmatprep.subr.mxu0 %v5899_v22 }
 0x2cd   : > { %1638 = vmatpush2.msra.mxu0 %v1589_v10  ;;  %v5915_v10 = vld [vmem:[#allocation29_spill] sm:$0xff] }
 0x2ce   : > { %1639 = vmatprep.subr.mxu0 %v5899_v22 }
 0x2cf   : > { %1640 = vmatpush2.msra.mxu0 %v1588_v49  ;;  %v5916_v49 = vld [vmem:[#allocation30_spill] sm:$0xff] }
 0x2d0   : > { %1641 = vmatprep.subr.mxu0 %v5899_v22 }
 0x2d1   : > { %1642 = vmatpush2.msra.mxu0 %v1587_v20  ;;  %v5917_v20 = vld [vmem:[#allocation31_spill] sm:$0xff] }
 0x2d2   : > { %1643 = vmatprep.subr.mxu0 %v5899_v22 }
 0x2d3   : > { %1644 = vmatpush2.msra.mxu0 %v1586_v55  ;;  %v5918_v55 = vld [vmem:[#allocation32_spill] sm:$0xff] }
 0x2d4   : > { %1645 = vmatprep.subr.mxu0 %v5899_v22 }
 0x2d5   : > { %1646 = vmatpush2.msra.mxu0 %v1585_v60  ;;  %v5919_v60 = vld [vmem:[#allocation33_spill] sm:$0xff] }
 0x2d6   : > { %1647 = vmatprep.subr.mxu0 %v5899_v22 }
 0x2d7   : > { %1648 = vmatpush2.msra.mxu0 %v1584_v37  ;;  %v5920_v37 = vld [vmem:[#allocation34_spill] sm:$0xff] }
 0x2d8   : > { %1649 = vmatprep.subr.mxu0 %v5899_v22 }
 0x2d9   : > { %1650 = vmatpush2.msra.mxu0 %v1583_v38  ;;  %v5921_v38 = vld [vmem:[#allocation35_spill] sm:$0xff] }
 0x2da   : > { %1651 = vmatprep.subr.mxu0 %v5899_v22 }
 0x2db   : > { %1652 = vmatpush2.msra.mxu0 %v1582_v7  ;;  %v5922_v7 = vld [vmem:[#allocation36_spill] sm:$0xff] }
 0x2dc   : > { %1653 = vmatprep.subr.mxu0 %v5899_v22 }
 0x2dd   : > { %1654 = vmatpush2.msra.mxu0 %v1581_v25  ;;  %v5923_v25 = vld [vmem:[#allocation37_spill] sm:$0xff] }
 0x2de   : > { %1655 = vmatprep.subr.mxu0 %v5899_v22 }
 0x2df   : > { %1656 = vmatpush2.msra.mxu0 %v1580_v24  ;;  %v5924_v24 = vld [vmem:[#allocation38_spill] sm:$0xff] }
 0x2e0   : > { %1657 = vmatprep.subr.mxu0 %v5899_v22 }
 0x2e1   : > { %1658 = vmatpush2.msra.mxu0 %v1579_v34  ;;  %v5925_v34 = vld [vmem:[#allocation39_spill] sm:$0xff] }
 0x2e2   : > { %1660 = vmatmul.mubr.f32.vlgmr.msra.gmra.mxu0 %v4623_v14  ;;  %1852 = vmatprep.subr.mxu0 %v5899_v22 }
 0x2e3   : > { %1664 = vmatprep.mubr.f32.mxu0 %v4634_v29 }
 0x2e6   : > { %1665 = vmatmul.mubr.f32.gmra.mxu0 %v4636_v19 }
 0x2e7   : > { %1669 = vmatprep.mubr.f32.mxu0 %v4646_v62 }
 0x2ea   : > { %1670 = vmatmul.mubr.f32.gmra.mxu0 %v4648_v59 }
 0x2eb   : > { %1674 = vmatprep.mubr.f32.mxu0 %v4658_v15 }
 0x2ee   : > { %1675 = vmatmul.mubr.f32.gmra.mxu0 %v5900_v56 }
 0x2ef   : > { %1679 = vmatprep.mubr.f32.mxu0 %v5901_v33  ;;  %v5926_v33 = vld [vmem:[#allocation40_spill] sm:$0xff] }
 0x2f2   : > { %1680 = vmatmul.mubr.f32.gmra.mxu0 %v5902_v51 }
 0x2f3   : > { %1684 = vmatprep.mubr.f32.mxu0 %v5903_v11 }
 0x2f6   : > { %1685 = vmatmul.mubr.f32.gmra.mxu0 %v5904_v35 }
 0x2f7   : > { %1689 = vmatprep.mubr.f32.mxu0 %v5905_v61 }
 0x2fa   : > { %1690 = vmatmul.mubr.f32.gmra.mxu0 %v5906_v47 }
 0x2fb   : > { %1694 = vmatprep.mubr.f32.mxu0 %v5907_v63 }
 0x2fe   : > { %1695 = vmatmul.mubr.f32.gmra.mxu0 %v5908_v41 }
 0x2ff   : > { %1699 = vmatprep.mubr.f32.mxu0 %v5909_v48 }
 0x302   : > { %1700 = vmatmul.mubr.f32.gmra.mxu0 %v5910_v9 }
 0x303   : > { %1704 = vmatprep.mubr.f32.mxu0 %v5911_v39 }
 0x306   : > { %1705 = vmatmul.mubr.f32.gmra.mxu0 %v5912_v23 }
 0x307   : > { %1709 = vmatprep.mubr.f32.mxu0 %v5913_v40 }
 0x30a   : > { %1710 = vmatmul.mubr.f32.gmra.mxu0 %v5914_v50 }
 0x30b   : > { %1714 = vmatprep.mubr.f32.mxu0 %v5915_v10 }
 0x30e   : > { %1715 = vmatmul.mubr.f32.gmra.mxu0 %v5916_v49  ;;  %v5927_v49 = vld [vmem:[#allocation41_spill] sm:$0xff] }
 0x30f   : > { %1719 = vmatprep.mubr.f32.mxu0 %v5917_v20  ;;  %v5928_v20 = vld [vmem:[#allocation42_spill] sm:$0xff] }
 0x312   : > { %1720 = vmatmul.mubr.f32.gmra.mxu0 %v5918_v55  ;;  %v5929_v55 = vld [vmem:[#allocation43_spill] sm:$0xff] }
 0x313   : > { %1724 = vmatprep.mubr.f32.mxu0 %v5919_v60  ;;  %v5930_v60 = vld [vmem:[#allocation44_spill] sm:$0xff] }
 0x316   : > { %1725 = vmatmul.mubr.f32.gmra.mxu0 %v5920_v37  ;;  %v5931_v37 = vld [vmem:[#allocation45_spill] sm:$0xff] }
 0x317   : > { %1729 = vmatprep.mubr.f32.mxu0 %v5921_v38  ;;  %v5932_v38 = vld [vmem:[#allocation46_spill] sm:$0xff] }
 0x31a   : > { %1730 = vmatmul.mubr.f32.gmra.mxu0 %v5922_v7  ;;  %v5933_v7 = vld [vmem:[#allocation47_spill] sm:$0xff] }
 0x31b   : > { %1734 = vmatprep.mubr.f32.mxu0 %v5923_v25  ;;  %v5934_v25 = vld [vmem:[#allocation48_spill] sm:$0xff] }
 0x31e   : > { %1735 = vmatmul.mubr.f32.gmra.mxu0 %v5924_v24  ;;  %v5935_v24 = vld [vmem:[#allocation49_spill] sm:$0xff] }
 0x31f   : > { %1739 = vmatprep.mubr.f32.mxu0 %v5925_v34  ;;  %v5936_v34 = vld [vmem:[#allocation50_spill] sm:$0xff] }
 0x322   : > { %1740 = vmatmul.mubr.f32.gmra.mxu0 %v5926_v33  ;;  %v5937_v33 = vld [vmem:[#allocation51_spill] sm:$0xff] }
 0x323   : > { %1744 = vmatprep.mubr.f32.mxu0 %v5927_v49  ;;  %v5938_v49 = vld [vmem:[#allocation52_spill] sm:$0xff] }
 0x326   : > { %1745 = vmatmul.mubr.f32.gmra.mxu0 %v5928_v20  ;;  %v5939_v20 = vld [vmem:[#allocation53_spill] sm:$0xff] }
 0x327   : > { %1749 = vmatprep.mubr.f32.mxu0 %v5929_v55  ;;  %v5940_v55 = vld [vmem:[#allocation54_spill] sm:$0xff] }
 0x32a   : > { %1750 = vmatmul.mubr.f32.gmra.mxu0 %v5930_v60  ;;  %v5941_v60 = vld [vmem:[#allocation55_spill] sm:$0xff] }
 0x32b   : > { %1754 = vmatprep.mubr.f32.mxu0 %v5931_v37  ;;  %v5942_v37 = vld [vmem:[#allocation56_spill] sm:$0xff] }
 0x32e   : > { %1755 = vmatmul.mubr.f32.gmra.mxu0 %v5932_v38  ;;  %v5943_v38 = vld [vmem:[#allocation57_spill] sm:$0xff] }
 0x32f   : > { %1759 = vmatprep.mubr.f32.mxu0 %v5933_v7  ;;  %v5944_v7 = vld [vmem:[#allocation58_spill] sm:$0xff] }
 0x332   : > { %1760 = vmatmul.mubr.f32.gmra.mxu0 %v5934_v25  ;;  %v5945_v25 = vld [vmem:[#allocation59_spill] sm:$0xff] }
 0x333   : > { %1764 = vmatprep.mubr.f32.mxu0 %v5935_v24  ;;  %v5946_v24 = vld [vmem:[#allocation60_spill] sm:$0xff] }
 0x336   : > { %1765 = vmatmul.mubr.f32.gmra.mxu0 %v5936_v34  ;;  %v5947_v34 = vld [vmem:[#allocation61_spill] sm:$0xff] }
 0x337   : > { %1769 = vmatprep.mubr.f32.mxu0 %v5937_v33  ;;  %v5948_v33 = vld [vmem:[#allocation62_spill] sm:$0xff] }
 0x33a   : > { %1770 = vmatmul.mubr.f32.gmra.mxu0 %v5938_v49  ;;  %v5949_v49 = vld [vmem:[#allocation63_spill] sm:$0xff] }
 0x33b   : > { %1774 = vmatprep.mubr.f32.mxu0 %v5939_v20  ;;  %v5950_v20 = vld [vmem:[#allocation64_spill] sm:$0xff] }
 0x33e   : > { %1775 = vmatmul.mubr.f32.gmra.mxu0 %v5940_v55  ;;  %v5951_v55 = vld [vmem:[#allocation65_spill] sm:$0xff] }
 0x33f   : > { %1779 = vmatprep.mubr.f32.mxu0 %v5941_v60  ;;  %v5952_v60 = vld [vmem:[#allocation66_spill] sm:$0xff] }
 0x342   : > { %1780 = vmatmul.mubr.f32.gmra.mxu0 %v5942_v37  ;;  %v5953_v37 = vld [vmem:[#allocation67_spill] sm:$0xff] }
 0x343   : > { %1784 = vmatprep.mubr.f32.mxu0 %v5943_v38  ;;  %v5954_v38 = vld [vmem:[#allocation68_spill] sm:$0xff] }
 0x346   : > { %1785 = vmatmul.mubr.f32.gmra.mxu0 %v5944_v7  ;;  %v5955_v7 = vld [vmem:[#allocation69_spill] sm:$0xff] }
 0x347   : > { %1789 = vmatprep.mubr.f32.mxu0 %v5945_v25  ;;  %v5956_v25 = vld [vmem:[#allocation70_spill] sm:$0xff] }
 0x34a   : > { %1790 = vmatmul.mubr.f32.gmra.mxu0 %v5946_v24  ;;  %v5957_v24 = vld [vmem:[#allocation10_spill] sm:$0xff] }
 0x34b   : > { %1794 = vmatprep.mubr.f32.mxu0 %v5947_v34 }
 0x34e   : > { %1795 = vmatmul.mubr.f32.gmra.mxu0 %v5948_v33 }
 0x34f   : > { %1799 = vmatprep.mubr.f32.mxu0 %v5949_v49 }
 0x352   : > { %1800 = vmatmul.mubr.f32.gmra.mxu0 %v5950_v20 }
 0x353   : > { %1804 = vmatprep.mubr.f32.mxu0 %v5951_v55 }
 0x356   : > { %1805 = vmatmul.mubr.f32.gmra.mxu0 %v5952_v60 }
 0x357   : > { %1809 = vmatprep.mubr.f32.mxu0 %v5953_v37 }
 0x35a   : > { %1810 = vmatmul.mubr.f32.gmra.mxu0 %v5954_v38 }
 0x35b   : > { %1814 = vmatprep.mubr.f32.mxu0 %v5955_v7 }
 0x35e   : > { %1815 = vmatmul.mubr.f32.gmra.mxu0 %v5956_v25 }
 0x35f   : > { %1916 = vmatprep.mubr.f32.mxu0 %v5957_v24 }
 0x3a2   : > { %v5162_v34 = vpop.f32.mrf.mxu0 }
 0x3a4   : > { %v1663_v33 = vpop.f32.mrf.mxu0 }
 0x3a6   : > { %v5164_v49 = vpop.f32.mrf.mxu0 }
 0x3a8   : > { %v1668_v20 = vpop.f32.mrf.mxu0 }
 0x3aa   : > { %v5166_v10 = vpop.f32.mrf.mxu0 }
 0x3ac   : > { %v1673_v55 = vpop.f32.mrf.mxu0 }
 0x3ae   : > { %v5168_v60 = vpop.f32.mrf.mxu0 }
 0x3b0   : > { %v1678_v37 = vpop.f32.mrf.mxu0 }
 0x3b2   : > { %v5170_v50 = vpop.f32.mrf.mxu0 }
 0x3b4   : > { %v1683_v38 = vpop.f32.mrf.mxu0 }
 0x3b6   : > { %v5172_v7 = vpop.f32.mrf.mxu0 }
 0x3b8   : > { %v1688_v25 = vpop.f32.mrf.mxu0 }
 0x3ba   : > { %v5174_v40 = vpop.f32.mrf.mxu0 }
 0x3bc   : > { %v1693_v24 = vpop.f32.mrf.mxu0 }
 0x3be   : > { %v1696_v23 = vpop.f32.mrf.mxu0 }
 0x3c0   : > { %v1698_v33 = vpop.f32.mrf.mxu0 }
 0x3c2   : > { %v1701_v39 = vpop.f32.mrf.mxu0 }
 0x3c4   : > { %v1703_v9 = vpop.f32.mrf.mxu0 }
 0x3c6   : > { %v1706_v20 = vpop.f32.mrf.mxu0 }
 0x3c8   : > { %v1708_v48 = vpop.f32.mrf.mxu0 }
 0x3ca   : > { %v1711_v41 = vpop.f32.mrf.mxu0 }
 0x3cc   : > { %v1713_v55 = vpop.f32.mrf.mxu0 }
 0x3ce   : > { %v1716_v56 = vpop.f32.mrf.mxu0 }
 0x3d0   : > { %v1718_v63 = vpop.f32.mrf.mxu0 }
 0x3d2   : > { %v1721_v37 = vpop.f32.mrf.mxu0 }
 0x3d4   : > { %v1723_v15 = vpop.f32.mrf.mxu0 }
 0x3d6   : > { %v1726_v47 = vpop.f32.mrf.mxu0 }
 0x3d7   : > { %v1833_v15 = vmul.f32 %v4352_v30, %v1726_v47  ;;  %v1827_v47 = vmul.f32 %v4341_v21, %v1696_v23  ;;  %v1825_v21 = vmul.f32 %v4320_v4, %v5172_v7  ;;  %v1823_v4 = vmul.f32 %v4304_v46, %v5168_v60 }
 0x3d8   : > { %v1728_v38 = vpop.f32.mrf.mxu0  ;;  %v1821_v46 = vmul.f32 %v4296_v32, %v5164_v49 }
 0x3da   : > { %v1731_v59 = vpop.f32.mrf.mxu0 }
 0x3db   : > { %v1834_v33 = vmul.f32 %v4365_v43, %v1731_v59  ;;  %v1830_v59 = vmul.f32 %v4389_v5, %v1711_v41 }
 0x3dc   : > { %v1733_v61 = vpop.f32.mrf.mxu0 }
 0x3dd   : > { %v1829_v61 = vmul.f32 %v4385_v1, %v1706_v20 }
 0x3de   : > { %v1736_v25 = vpop.f32.mrf.mxu0 }
 0x3df   : > { %v1835_v62 = vmul.f32 %v4355_v36, %v1736_v25  ;;  %v1832_v36 = vmul.f32 %v4369_v52, %v1721_v37 }
 0x3e0   : > { %v1738_v24 = vpop.f32.mrf.mxu0 }
 0x3e1   : > { %1853 = vmatpush1.msra.mxu0 %v1835_v62  ;;  %3701 = vmatpush1.msra.mxu1 %v1835_v62  ;;  %v1831_v62 = vmul.f32 %v4374_v58, %v1716_v56  ;;  %v1828_v56 = vmul.f32 %v4349_v26, %v1701_v39  ;;  %v1826_v26 = vmul.f32 %v4330_v13, %v5174_v40 }
 0x3e2   : > { %v5178_v9 = vpop.f32.mrf.mxu0  ;;  %1854 = vmatprep.subr.mxu0 %v5899_v22  ;;  %3670 = vmatprep.subr.mxu1 %v5899_v22  ;;  %v1824_v13 = vmul.f32 %v4310_v57, %v5170_v50  ;;  %v1822_v57 = vmul.f32 %v4293_v28, %v5166_v10  ;;  %v5958_v28 = vld [vmem:[#allocation9_spill] sm:$0xff] }
 0x3e3   : > { %1855 = vmatpush1.msra.mxu0 %v1834_v33  ;;  %3702 = vmatpush1.msra.mxu1 %v1834_v33  ;;  %v1820_v10 = vmul.f32 %v5958_v28, %v5162_v34  ;;  %v5984_v28 = vld [vmem:[#allocation40_spill] sm:$0xff] }
 0x3e4   : > { %v1743_v63 = vpop.f32.mrf.mxu0  ;;  %1856 = vmatprep.subr.mxu0 %v5899_v22  ;;  %3671 = vmatprep.subr.mxu1 %v5899_v22 }
 0x3e5   : > { %1857 = vmatpush1.msra.mxu0 %v1833_v15  ;;  %3703 = vmatpush1.msra.mxu1 %v1833_v15 }
 0x3e6   : > { %v5186_v43 = vpop.f32.mrf.mxu0  ;;  %1858 = vmatprep.subr.mxu0 %v5899_v22  ;;  %3672 = vmatprep.subr.mxu1 %v5899_v22 }
 0x3e7   : > { %1859 = vmatpush1.msra.mxu0 %v1832_v36  ;;  %3704 = vmatpush1.msra.mxu1 %v1832_v36 }
 0x3e8   : > { %v1748_v30 = vpop.f32.mrf.mxu0  ;;  %1860 = vmatprep.subr.mxu0 %v5899_v22  ;;  %3673 = vmatprep.subr.mxu1 %v5899_v22 }
 0x3e9   : > { %1861 = vmatpush1.msra.mxu0 %v1831_v62  ;;  %3705 = vmatpush1.msra.mxu1 %v1831_v62 }
 0x3ea   : > { %v5194_v52 = vpop.f32.mrf.mxu0  ;;  %1862 = vmatprep.subr.mxu0 %v5899_v22  ;;  %3674 = vmatprep.subr.mxu1 %v5899_v22 }
 0x3eb   : > { %1863 = vmatpush1.msra.mxu0 %v1830_v59  ;;  %3706 = vmatpush1.msra.mxu1 %v1830_v59 }
 0x3ec   : > { %v1753_v58 = vpop.f32.mrf.mxu0  ;;  %1864 = vmatprep.subr.mxu0 %v5899_v22  ;;  %3675 = vmatprep.subr.mxu1 %v5899_v22 }
 0x3ed   : > { %1865 = vmatpush1.msra.mxu0 %v1829_v61  ;;  %3707 = vmatpush1.msra.mxu1 %v1829_v61 }
 0x3ee   : > { %v5202_v5 = vpop.f32.mrf.mxu0  ;;  %1866 = vmatprep.subr.mxu0 %v5899_v22  ;;  %3676 = vmatprep.subr.mxu1 %v5899_v22 }
 0x3ef   : > { %1867 = vmatpush1.msra.mxu0 %v1828_v56  ;;  %3708 = vmatpush1.msra.mxu1 %v1828_v56 }
 0x3f0   : > { %v1758_v1 = vpop.f32.mrf.mxu0  ;;  %1868 = vmatprep.subr.mxu0 %v5899_v22  ;;  %3677 = vmatprep.subr.mxu1 %v5899_v22 }
 0x3f1   : > { %1869 = vmatpush1.msra.mxu0 %v1827_v47  ;;  %3709 = vmatpush1.msra.mxu1 %v1827_v47  ;;  %v5971_v1 = vld [vmem:[#allocation27_spill] sm:$0xff] }
 0x3f2   : > { %v5211_v41 = vpop.f32.mrf.mxu0  ;;  %1870 = vmatprep.subr.mxu0 %v5899_v22  ;;  %3678 = vmatprep.subr.mxu1 %v5899_v22 }
 0x3f3   : > { %1871 = vmatpush1.msra.mxu0 %v1826_v26  ;;  %3710 = vmatpush1.msra.mxu1 %v1826_v26  ;;  %v5972_v26 = vld [vmem:[#allocation28_spill] sm:$0xff] }
 0x3f4   : > { %v1763_v48 = vpop.f32.mrf.mxu0  ;;  %1872 = vmatprep.subr.mxu0 %v5899_v22  ;;  %3679 = vmatprep.subr.mxu1 %v5899_v22 }
 0x3f5   : > { %1873 = vmatpush1.msra.mxu0 %v1825_v21  ;;  %3711 = vmatpush1.msra.mxu1 %v1825_v21  ;;  %v5974_v21 = vld [vmem:[#allocation30_spill] sm:$0xff]  ;;  %v5975_v48 = vld [vmem:[#allocation31_spill] sm:$0xff] }
 0x3f6   : > { %v5221_v39 = vpop.f32.mrf.mxu0  ;;  %1874 = vmatprep.subr.mxu0 %v5899_v22  ;;  %3680 = vmatprep.subr.mxu1 %v5899_v22 }
 0x3f7   : > { %1875 = vmatpush1.msra.mxu0 %v1824_v13  ;;  %3712 = vmatpush1.msra.mxu1 %v1824_v13  ;;  %v5976_v13 = vld [vmem:[#allocation32_spill] sm:$0xff] }
 0x3f8   : > { %v1768_v23 = vpop.f32.mrf.mxu0  ;;  %1876 = vmatprep.subr.mxu0 %v5899_v22  ;;  %3681 = vmatprep.subr.mxu1 %v5899_v22 }
 0x3f9   : > { %1877 = vmatpush1.msra.mxu0 %v1823_v4  ;;  %3713 = vmatpush1.msra.mxu1 %v1823_v4  ;;  %v5978_v4 = vld [vmem:[#allocation34_spill] sm:$0xff]  ;;  %v5979_v23 = vld [vmem:[#allocation35_spill] sm:$0xff] }
 0x3fa   : > { %v5231_v40 = vpop.f32.mrf.mxu0  ;;  %1878 = vmatprep.subr.mxu0 %v5899_v22  ;;  %3682 = vmatprep.subr.mxu1 %v5899_v22 }
 0x3fb   : > { %1879 = vmatpush1.msra.mxu0 %v1822_v57  ;;  %3714 = vmatpush1.msra.mxu1 %v1822_v57  ;;  %v5980_v57 = vld [vmem:[#allocation36_spill] sm:$0xff] }
 0x3fc   : > { %v1773_v50 = vpop.f32.mrf.mxu0  ;;  %1880 = vmatprep.subr.mxu0 %v5899_v22  ;;  %3683 = vmatprep.subr.mxu1 %v5899_v22 }
 0x3fd   : > { %1881 = vmatpush1.msra.mxu0 %v1821_v46  ;;  %3715 = vmatpush1.msra.mxu1 %v1821_v46  ;;  %v5982_v46 = vld [vmem:[#allocation38_spill] sm:$0xff]  ;;  %v5983_v50 = vld [vmem:[#allocation39_spill] sm:$0xff] }
 0x3fe   : > { %v1776_v60 = vpop.f32.mrf.mxu0  ;;  %1882 = vmatprep.subr.mxu0 %v5899_v22  ;;  %3684 = vmatprep.subr.mxu1 %v5899_v22 }
 0x3ff   : > { %1883 = vmatpush1.msra.mxu0 %v1820_v10  ;;  %3716 = vmatpush1.msra.mxu1 %v1820_v10  ;;  %v5985_v10 = vld [vmem:[#allocation41_spill] sm:$0xff] }
 0x400   : > { %v1778_v32 = vpop.f32.mrf.mxu0  ;;  %1884 = vmatprep.subr.mxu0 %v5899_v22  ;;  %3685 = vmatprep.subr.mxu1 %v5899_v22 }
 0x401   : > { %v5987_v32 = vld [vmem:[#allocation43_spill] sm:$0xff] }
 0x402   : > { %v1781_v49 = vpop.f32.mrf.mxu0 }
 0x404   : > { %v1783_v7 = vpop.f32.mrf.mxu0 }
 0x405   : > { %v5989_v7 = vld [vmem:[#allocation45_spill] sm:$0xff] }
 0x406   : > { %v1786_v20 = vpop.f32.mrf.mxu0 }
 0x408   : > { %v1788_v55 = vpop.f32.mrf.mxu0 }
 0x409   : > { %v5991_v55 = vld [vmem:[#allocation47_spill] sm:$0xff] }
 0x40a   : > { %v1791_v37 = vpop.f32.mrf.mxu0 }
 0x40c   : > { %v1793_v34 = vpop.f32.mrf.mxu0 }
 0x40d   : > { %v2078_v34 = vld [vmem:[%s5702_s8 + $0x8] sm:$0xff] }
 0x40e   : > { %v1796_v38 = vpop.f32.mrf.mxu0 }
 0x410   : > { %v1798_v25 = vpop.f32.mrf.mxu0 }
 0x411   : > { %v2077_v25 = vld [vmem:[%s5702_s8] sm:$0xff] }
 0x412   : > { %v1801_v24 = vpop.f32.mrf.mxu0 }
 0x413   : > { %v1848_v47 = vmul.f32 %v4481_v45, %v1801_v24  ;;  %v1844_v45 = vmul.f32 %v4514_v42, %v1781_v49  ;;  %v1840_v42 = vmul.f32 %v4542_v2, %v5211_v41  ;;  %v5960_v2 = vld [vmem:[#allocation19_spill] sm:$0xff]  ;;  %v5973_v41 = vld [vmem:[#allocation29_spill] sm:$0xff]  ;;  %v5988_v49 = vld [vmem:[#allocation44_spill] sm:$0xff] }
 0x414   : > { %v1803_v33 = vpop.f32.mrf.mxu0  ;;  %v5994_v24 = vld [vmem:[#allocation50_spill] sm:$0xff] }
 0x415   : > { %v5995_v33 = vld [vmem:[#allocation51_spill] sm:$0xff] }
 0x416   : > { %v1806_v15 = vpop.f32.mrf.mxu0 }
 0x417   : > { %v1849_v56 = vmul.f32 %v4464_v18, %v1806_v15  ;;  %v1846_v18 = vmul.f32 %v4498_v3, %v1791_v37  ;;  %v1842_v3 = vmul.f32 %v4530_v0, %v5231_v40  ;;  %v1838_v0 = vmul.f32 %v4510_v16, %v5194_v52  ;;  %v5959_v16 = vld [vmem:[#allocation11_spill] sm:$0xff]  ;;  %v5969_v52 = vld [vmem:[#allocation25_spill] sm:$0xff]  ;;  %v5992_v37 = vld [vmem:[#allocation48_spill] sm:$0xff] }
 0x418   : > { %v1808_v63 = vpop.f32.mrf.mxu0  ;;  %v5981_v40 = vld [vmem:[#allocation37_spill] sm:$0xff]  ;;  %v5996_v15 = vld [vmem:[#allocation52_spill] sm:$0xff] }
 0x419   : > { %v5997_v63 = vld [vmem:[#allocation53_spill] sm:$0xff] }
 0x41a   : > { %v1811_v36 = vpop.f32.mrf.mxu0 }
 0x41b   : > { %v1850_v58 = vmul.f32 %v4477_v27, %v1811_v36  ;;  %v1845_v27 = vmul.f32 %v4503_v31, %v1786_v20  ;;  %v1841_v31 = vmul.f32 %v4535_v17, %v5221_v39  ;;  %v1837_v17 = vmul.f32 %v4494_v54, %v5186_v43  ;;  %v2080_v54 = vld [vmem:[%s5702_s8 + $0x18] sm:$0xff]  ;;  %v5966_v43 = vld [vmem:[#allocation22_spill] sm:$0xff]  ;;  %v5977_v39 = vld [vmem:[#allocation33_spill] sm:$0xff] }
 0x41c   : > { %v1813_v62 = vpop.f32.mrf.mxu0  ;;  %v5990_v20 = vld [vmem:[#allocation46_spill] sm:$0xff] }
 0x41d   : > { %v5998_v36 = vld [vmem:[#allocation54_spill] sm:$0xff]  ;;  %v5999_v62 = vld [vmem:[#allocation55_spill] sm:$0xff] }
 0x41e   : > { %v1816_v30 = vpop.f32.mrf.mxu0 }
 0x41f   : > { %v1851_v59 = vmul.f32 %v4469_v53, %v1816_v30  ;;  %v1847_v53 = vmul.f32 %v4487_v12, %v1796_v38  ;;  %v1843_v12 = vmul.f32 %v4519_v44, %v1776_v60  ;;  %v1839_v44 = vmul.f32 %v4526_v8, %v5202_v5  ;;  %v5970_v5 = vld [vmem:[#allocation26_spill] sm:$0xff]  ;;  %v5993_v38 = vld [vmem:[#allocation49_spill] sm:$0xff]  ;;  %v6000_v30 = vld [vmem:[#allocation56_spill] sm:$0xff] }
 0x420   : > { %v1818_v61 = vpop.f32.mrf.mxu0  ;;  %v1836_v8 = vmul.f32 %v4460_v6, %v5178_v9  ;;  %v2079_v6 = vld [vmem:[%s5702_s8 + $0x10] sm:$0xff] }
 0x421   : > { %1885 = vmatpush2.msra.mxu0 %v1851_v59  ;;  %3717 = vmatpush2.msra.mxu1 %v1851_v59  ;;  %v5965_v9 = vld [vmem:[#allocation14_spill] sm:$0xff]  ;;  %v6001_v59 = vld [vmem:[#allocation57_spill] sm:$0xff] }
 0x422   : > { %1886 = vmatprep.subr.mxu0 %v5899_v22  ;;  %3686 = vmatprep.subr.mxu1 %v5899_v22  ;;  %v5986_v60 = vld [vmem:[#allocation42_spill] sm:$0xff] }
 0x423   : > { %1887 = vmatpush2.msra.mxu0 %v1850_v58  ;;  %3718 = vmatpush2.msra.mxu1 %v1850_v58  ;;  %v6002_v61 = vld [vmem:[#allocation58_spill] sm:$0xff]  ;;  %v6003_v58 = vld [vmem:[#allocation59_spill] sm:$0xff] }
 0x424   : > { %1888 = vmatprep.subr.mxu0 %v5899_v22  ;;  %3687 = vmatprep.subr.mxu1 %v5899_v22 }
 0x425   : > { %1889 = vmatpush2.msra.mxu0 %v1849_v56  ;;  %3719 = vmatpush2.msra.mxu1 %v1849_v56  ;;  %v6004_v56 = vld [vmem:[#allocation60_spill] sm:$0xff] }
 0x426   : > { %1890 = vmatprep.subr.mxu0 %v5899_v22  ;;  %3688 = vmatprep.subr.mxu1 %v5899_v22 }
 0x427   : > { %1891 = vmatpush2.msra.mxu0 %v1848_v47  ;;  %3720 = vmatpush2.msra.mxu1 %v1848_v47  ;;  %v6005_v47 = vld [vmem:[#allocation61_spill] sm:$0xff] }
 0x428   : > { %1892 = vmatprep.subr.mxu0 %v5899_v22  ;;  %3689 = vmatprep.subr.mxu1 %v5899_v22 }
 0x429   : > { %1893 = vmatpush2.msra.mxu0 %v1847_v53  ;;  %3721 = vmatpush2.msra.mxu1 %v1847_v53  ;;  %v6006_v53 = vld [vmem:[#allocation62_spill] sm:$0xff] }
 0x42a   : > { %1894 = vmatprep.subr.mxu0 %v5899_v22  ;;  %3690 = vmatprep.subr.mxu1 %v5899_v22 }
 0x42b   : > { %1895 = vmatpush2.msra.mxu0 %v1846_v18  ;;  %3722 = vmatpush2.msra.mxu1 %v1846_v18  ;;  %v6007_v18 = vld [vmem:[#allocation63_spill] sm:$0xff] }
 0x42c   : > { %1896 = vmatprep.subr.mxu0 %v5899_v22  ;;  %3691 = vmatprep.subr.mxu1 %v5899_v22 }
 0x42d   : > { %1897 = vmatpush2.msra.mxu0 %v1845_v27  ;;  %3723 = vmatpush2.msra.mxu1 %v1845_v27  ;;  %v6008_v27 = vld [vmem:[#allocation64_spill] sm:$0xff] }
 0x42e   : > { %1898 = vmatprep.subr.mxu0 %v5899_v22  ;;  %3692 = vmatprep.subr.mxu1 %v5899_v22 }
 0x42f   : > { %1899 = vmatpush2.msra.mxu0 %v1844_v45  ;;  %3724 = vmatpush2.msra.mxu1 %v1844_v45  ;;  %v6009_v45 = vld [vmem:[#allocation65_spill] sm:$0xff] }
 0x430   : > { %1900 = vmatprep.subr.mxu0 %v5899_v22  ;;  %3693 = vmatprep.subr.mxu1 %v5899_v22 }
 0x431   : > { %1901 = vmatpush2.msra.mxu0 %v1843_v12  ;;  %3725 = vmatpush2.msra.mxu1 %v1843_v12  ;;  %v6010_v12 = vld [vmem:[#allocation66_spill] sm:$0xff] }
 0x432   : > { %1902 = vmatprep.subr.mxu0 %v5899_v22  ;;  %3694 = vmatprep.subr.mxu1 %v5899_v22 }
 0x433   : > { %1903 = vmatpush2.msra.mxu0 %v1842_v3  ;;  %3726 = vmatpush2.msra.mxu1 %v1842_v3  ;;  %v6011_v3 = vld [vmem:[#allocation67_spill] sm:$0xff] }
 0x434   : > { %1904 = vmatprep.subr.mxu0 %v5899_v22  ;;  %3695 = vmatprep.subr.mxu1 %v5899_v22 }
 0x435   : > { %1905 = vmatpush2.msra.mxu0 %v1841_v31  ;;  %3727 = vmatpush2.msra.mxu1 %v1841_v31  ;;  %v6012_v31 = vld [vmem:[#allocation68_spill] sm:$0xff] }
 0x436   : > { %1906 = vmatprep.subr.mxu0 %v5899_v22  ;;  %3696 = vmatprep.subr.mxu1 %v5899_v22 }
 0x437   : > { %1907 = vmatpush2.msra.mxu0 %v1840_v42  ;;  %3728 = vmatpush2.msra.mxu1 %v1840_v42  ;;  %v6013_v42 = vld [vmem:[#allocation69_spill] sm:$0xff] }
 0x438   : > { %1908 = vmatprep.subr.mxu0 %v5899_v22  ;;  %3697 = vmatprep.subr.mxu1 %v5899_v22 }
 0x439   : > { %1909 = vmatpush2.msra.mxu0 %v1839_v44  ;;  %3729 = vmatpush2.msra.mxu1 %v1839_v44  ;;  %v6014_v44 = vld [vmem:[#allocation70_spill] sm:$0xff] }
 0x43a   : > { %1910 = vmatprep.subr.mxu0 %v5899_v22  ;;  %3698 = vmatprep.subr.mxu1 %v5899_v22 }
 0x43b   : > { %1911 = vmatpush2.msra.mxu0 %v1838_v0  ;;  %3730 = vmatpush2.msra.mxu1 %v1838_v0  ;;  %v2445_v0 = vld [vmem:[%s5704_s10 + $0x18] sm:$0xff] }
 0x43c   : > { %1912 = vmatprep.subr.mxu0 %v5899_v22  ;;  %3699 = vmatprep.subr.mxu1 %v5899_v22 }
 0x43d   : > { %1913 = vmatpush2.msra.mxu0 %v1837_v17  ;;  %3731 = vmatpush2.msra.mxu1 %v1837_v17 }
 0x43e   : > { %1914 = vmatprep.subr.mxu0 %v5899_v22  ;;  %3700 = vmatprep.subr.mxu1 %v5899_v22 }
 0x43f   : > { %1915 = vmatpush2.msra.mxu0 %v1836_v8  ;;  %3732 = vmatpush2.msra.mxu1 %v1836_v8 }
 0x440   : > { %1917 = vmatmul.mubr.f32.vlgmr.msra.gmra.mxu0 %v4623_v14  ;;  %1937 = vmatmul.mubr.f32.vlgmr.msra.gmra.mxu1 %v5902_v51  ;;  %v5961_v14 = vld [vmem:[#allocation12_spill] sm:$0xff]  ;;  %v5963_v51 = vld [vmem:[#allocation13_spill] sm:$0xff] }
 0x441   : > { %1921 = vmatprep.mubr.f32.mxu0 %v4634_v29  ;;  %1941 = vmatprep.mubr.f32.mxu1 %v5903_v11  ;;  %v5962_v29 = vld [vmem:[#allocation20_spill] sm:$0xff]  ;;  %v5964_v11 = vld [vmem:[#allocation21_spill] sm:$0xff] }
 0x442   : > { %3557 = vmatprep.subr.mxu0 %v2080_v54  ;;  %3613 = vmatprep.subr.mxu1 %v2445_v0 }
 0x443   : > { %3558 = vmatpush3.msra.mxu0 %v2080_v54  ;;  %3614 = vmatpush3.msra.mxu1 %v2445_v0 }
 0x444   : > { %1922 = vmatmul.mubr.f32.gmra.mxu0 %v4636_v19  ;;  %1942 = vmatmul.mubr.f32.gmra.mxu1 %v5904_v35  ;;  %v5967_v19 = vld [vmem:[#allocation23_spill] sm:$0xff]  ;;  %v5968_v35 = vld [vmem:[#allocation24_spill] sm:$0xff] }
 0x445   : > { %1926 = vmatprep.mubr.f32.mxu0 %v5959_v16  ;;  %1946 = vmatprep.mubr.f32.mxu1 %v5960_v2 }
 0x446   : > { %3559 = vmatprep.subr.mxu0 %v2079_v6 }
 0x447   : > { %3560 = vmatpush3.msra.mxu0 %v2079_v6 }
 0x448   : > { %1927 = vmatmul.mubr.f32.gmra.mxu0 %v5961_v14  ;;  %1947 = vmatmul.mubr.f32.gmra.mxu1 %v5962_v29 }
 0x449   : > { %1931 = vmatprep.mubr.f32.mxu0 %v5963_v51  ;;  %1951 = vmatprep.mubr.f32.mxu1 %v5964_v11 }
 0x44a   : > { %3561 = vmatprep.subr.mxu0 %v2078_v34 }
 0x44b   : > { %3562 = vmatpush3.msra.mxu0 %v2078_v34 }
 0x44c   : > { %1932 = vmatmul.mubr.f32.gmra.mxu0 %v5965_v9  ;;  %1952 = vmatmul.mubr.f32.gmra.mxu1 %v5966_v43 }
 0x44d   : > { %1956 = vmatprep.mubr.f32.mxu1 %v5967_v19  ;;  %3563 = vmatprep.subr.mxu0 %v2077_v25 }
 0x44e   : > { %3564 = vmatpush3.msra.mxu0 %v2077_v25 }
 0x450   : > { %1957 = vmatmul.mubr.f32.gmra.mxu1 %v5968_v35 }
 0x451   : > { %1961 = vmatprep.mubr.f32.mxu1 %v5969_v52 }
 0x454   : > { %1962 = vmatmul.mubr.f32.gmra.mxu1 %v5970_v5 }
 0x455   : > { %1966 = vmatprep.mubr.f32.mxu1 %v5971_v1 }
 0x458   : > { %1967 = vmatmul.mubr.f32.gmra.mxu1 %v5972_v26 }
 0x459   : > { %1971 = vmatprep.mubr.f32.mxu1 %v5973_v41 }
 0x45c   : > { %1972 = vmatmul.mubr.f32.gmra.mxu1 %v5974_v21 }
 0x45d   : > { %1976 = vmatprep.mubr.f32.mxu1 %v5975_v48 }
 0x460   : > { %1977 = vmatmul.mubr.f32.gmra.mxu1 %v5976_v13 }
 0x461   : > { %1981 = vmatprep.mubr.f32.mxu1 %v5977_v39 }
 0x464   : > { %1982 = vmatmul.mubr.f32.gmra.mxu1 %v5978_v4 }
 0x465   : > { %1986 = vmatprep.mubr.f32.mxu1 %v5979_v23 }
 0x468   : > { %1987 = vmatmul.mubr.f32.gmra.mxu1 %v5980_v57 }
 0x469   : > { %1991 = vmatprep.mubr.f32.mxu1 %v5981_v40 }
 0x46c   : > { %1992 = vmatmul.mubr.f32.gmra.mxu1 %v5982_v46 }
 0x46d   : > { %1996 = vmatprep.mubr.f32.mxu1 %v5983_v50 }
 0x470   : > { %1997 = vmatmul.mubr.f32.gmra.mxu1 %v5984_v28 }
 0x471   : > { %2001 = vmatprep.mubr.f32.mxu1 %v5985_v10 }
 0x474   : > { %2002 = vmatmul.mubr.f32.gmra.mxu1 %v5986_v60 }
 0x475   : > { %2006 = vmatprep.mubr.f32.mxu1 %v5987_v32 }
 0x478   : > { %2007 = vmatmul.mubr.f32.gmra.mxu1 %v5988_v49 }
 0x479   : > { %2011 = vmatprep.mubr.f32.mxu1 %v5989_v7 }
 0x47c   : > { %2012 = vmatmul.mubr.f32.gmra.mxu1 %v5990_v20 }
 0x47d   : > { %2016 = vmatprep.mubr.f32.mxu1 %v5991_v55 }
 0x480   : > { %2017 = vmatmul.mubr.f32.gmra.mxu1 %v5992_v37 }
 0x481   : > { %2021 = vmatprep.mubr.f32.mxu1 %v5993_v38 }
 0x484   : > { %2022 = vmatmul.mubr.f32.gmra.mxu1 %v5994_v24 }
 0x485   : > { %2026 = vmatprep.mubr.f32.mxu1 %v5995_v33 }
 0x488   : > { %2027 = vmatmul.mubr.f32.gmra.mxu1 %v5996_v15 }
 0x489   : > { %2031 = vmatprep.mubr.f32.mxu1 %v5997_v63  ;;  %v2444_v63 = vld [vmem:[%s5704_s10 + $0x10] sm:$0xff] }
 0x48a   : > { %3615 = vmatprep.subr.mxu1 %v2444_v63 }
 0x48b   : > { %3616 = vmatpush3.msra.mxu1 %v2444_v63 }
 0x48c   : > { %2032 = vmatmul.mubr.f32.gmra.mxu1 %v5998_v36 }
 0x48d   : > { %2036 = vmatprep.mubr.f32.mxu1 %v5999_v62  ;;  %v2443_v62 = vld [vmem:[%s5704_s10 + $0x8] sm:$0xff] }
 0x48e   : > { %3617 = vmatprep.subr.mxu1 %v2443_v62 }
 0x48f   : > { %3618 = vmatpush3.msra.mxu1 %v2443_v62 }
 0x490   : > { %2037 = vmatmul.mubr.f32.gmra.mxu1 %v6000_v30 }
 0x491   : > { %2041 = vmatprep.mubr.f32.mxu1 %v6001_v59  ;;  %v2442_v59 = vld [vmem:[%s5704_s10] sm:$0xff] }
 0x492   : > { %3619 = vmatprep.subr.mxu1 %v2442_v59 }
 0x493   : > { %3620 = vmatpush3.msra.mxu1 %v2442_v59 }
 0x494   : > { %2042 = vmatmul.mubr.f32.gmra.mxu1 %v6002_v61 }
 0x495   : > { %2046 = vmatprep.mubr.f32.mxu1 %v6003_v58 }
 0x498   : > { %2047 = vmatmul.mubr.f32.gmra.mxu1 %v6004_v56 }
 0x499   : > { %2051 = vmatprep.mubr.f32.mxu1 %v6005_v47 }
 0x49c   : > { %2052 = vmatmul.mubr.f32.gmra.mxu1 %v6006_v53 }
 0x49d   : > { %2056 = vmatprep.mubr.f32.mxu1 %v6007_v18 }
 0x4a0   : > { %2057 = vmatmul.mubr.f32.gmra.mxu1 %v6008_v27 }
 0x4a1   : > { %2061 = vmatprep.mubr.f32.mxu1 %v6009_v45 }
 0x4a4   : > { %2062 = vmatmul.mubr.f32.gmra.mxu1 %v6010_v12 }
 0x4a5   : > { %2066 = vmatprep.mubr.f32.mxu1 %v6011_v3 }
 0x4a8   : > { %2067 = vmatmul.mubr.f32.gmra.mxu1 %v6012_v31 }
 0x4a9   : > { %2071 = vmatprep.mubr.f32.mxu1 %v6013_v42 }
 0x4ac   : > { %2072 = vmatmul.mubr.f32.gmra.mxu1 %v6014_v44 }
 0x500   : > { %v1918_v17 = vpop.f32.mrf.mxu0  ;;  %v1938_v8 = vpop.f32.mrf.mxu1 }
 0x501   : > { %3565 = vmatprep.mubr.msk.f32.mxu0 %vm2088_vm1, %v1918_v17 }
 0x502   : > { %v1920_v54 = vpop.f32.mrf.mxu0  ;;  %v1940_v6 = vpop.f32.mrf.mxu1 }
 0x504   : > { %v1923_v16 = vpop.f32.mrf.mxu0  ;;  %v1943_v2 = vpop.f32.mrf.mxu1 }
 0x505   : > { %3566 = vmatmul.mubr.msk.f32.vlgmr.msra.gmra.mxu0 %vm2088_vm1, %v1923_v16  ;;  %v5419_v16 = vld [vmem:[%s5703_s9] ss:$0 sm:$0xff] }
 0x506   : > { %v1925_v14 = vpop.f32.mrf.mxu0  ;;  %v1945_v29 = vpop.f32.mrf.mxu1 }
 0x508   : > { %v1928_v51 = vpop.f32.mrf.mxu0  ;;  %v1948_v11 = vpop.f32.mrf.mxu1 }
 0x509   : > { %3568 = vmatprep.mubr.msk.f32.mxu0 %vm2088_vm1, %v1928_v51 }
 0x50a   : > { %v1930_v9 = vpop.f32.mrf.mxu0  ;;  %v1950_v43 = vpop.f32.mrf.mxu1 }
 0x50c   : > { %v1933_v19 = vpop.f32.mrf.mxu0  ;;  %v1953_v35 = vpop.f32.mrf.mxu1 }
 0x50d   : > { %3569 = vmatmul.mubr.msk.f32.gmra.mxu0 %vm2088_vm1, %v1933_v19 }
 0x50e   : > { %v1935_v52 = vpop.f32.mrf.mxu0  ;;  %v1955_v5 = vpop.f32.mrf.mxu1  ;;  %3571 = vmatprep.mubr.msk.f32.mxu0 %vm2088_vm1, %v1938_v8 }
 0x510   : > { %v1958_v1 = vpop.f32.mrf.mxu1 }
 0x511   : > { %3572 = vmatmul.mubr.msk.f32.gmra.mxu0 %vm2088_vm1, %v1943_v2 }
 0x512   : > { %v1960_v26 = vpop.f32.mrf.mxu1  ;;  %3574 = vmatprep.mubr.msk.f32.mxu0 %vm2088_vm1, %v1948_v11 }
 0x514   : > { %v1963_v41 = vpop.f32.mrf.mxu1 }
 0x515   : > { %3575 = vmatmul.mubr.msk.f32.gmra.mxu0 %vm2088_vm1, %v1953_v35 }
 0x516   : > { %v1965_v21 = vpop.f32.mrf.mxu1  ;;  %3577 = vmatprep.mubr.msk.f32.mxu0 %vm2088_vm1, %v1958_v1 }
 0x518   : > { %v1968_v48 = vpop.f32.mrf.mxu1 }
 0x519   : > { %3578 = vmatmul.mubr.msk.f32.gmra.mxu0 %vm2088_vm1, %v1963_v41 }
 0x51a   : > { %v1970_v13 = vpop.f32.mrf.mxu1  ;;  %3580 = vmatprep.mubr.msk.f32.mxu0 %vm2088_vm1, %v1968_v48 }
 0x51c   : > { %v1973_v39 = vpop.f32.mrf.mxu1 }
 0x51d   : > { %3581 = vmatmul.mubr.msk.f32.gmra.mxu0 %vm2088_vm1, %v1973_v39 }
 0x51e   : > { %v1975_v4 = vpop.f32.mrf.mxu1 }
 0x520   : > { %v1978_v23 = vpop.f32.mrf.mxu1 }
 0x521   : > { %3583 = vmatprep.mubr.msk.f32.mxu0 %vm2088_vm1, %v1978_v23 }
 0x522   : > { %v1980_v57 = vpop.f32.mrf.mxu1 }
 0x524   : > { %v1983_v40 = vpop.f32.mrf.mxu1 }
 0x525   : > { %3584 = vmatmul.mubr.msk.f32.gmra.mxu0 %vm2088_vm1, %v1983_v40 }
 0x526   : > { %v1985_v46 = vpop.f32.mrf.mxu1 }
 0x528   : > { %v1988_v50 = vpop.f32.mrf.mxu1 }
 0x529   : > { %3586 = vmatprep.mubr.msk.f32.mxu0 %vm2088_vm1, %v1988_v50 }
 0x52a   : > { %v1990_v28 = vpop.f32.mrf.mxu1 }
 0x52c   : > { %v1993_v10 = vpop.f32.mrf.mxu1 }
 0x52d   : > { %3587 = vmatmul.mubr.msk.f32.gmra.mxu0 %vm2088_vm1, %v1993_v10 }
 0x52e   : > { %v1995_v60 = vpop.f32.mrf.mxu1 }
 0x530   : > { %v1998_v32 = vpop.f32.mrf.mxu1 }
 0x531   : > { %3589 = vmatprep.mubr.msk.f32.mxu0 %vm2088_vm1, %v1998_v32 }
 0x532   : > { %v2000_v49 = vpop.f32.mrf.mxu1 }
 0x534   : > { %v2003_v7 = vpop.f32.mrf.mxu1 }
 0x535   : > { %3590 = vmatmul.mubr.msk.f32.gmra.mxu0 %vm2088_vm1, %v2003_v7 }
 0x536   : > { %v2005_v20 = vpop.f32.mrf.mxu1 }
 0x538   : > { %v2008_v55 = vpop.f32.mrf.mxu1 }
 0x539   : > { %3592 = vmatprep.mubr.msk.f32.mxu0 %vm2088_vm1, %v2008_v55 }
 0x53a   : > { %v2010_v37 = vpop.f32.mrf.mxu1 }
 0x53c   : > { %v2013_v34 = vpop.f32.mrf.mxu1 }
 0x53d   : > { %3593 = vmatmul.mubr.msk.f32.gmra.mxu0 %vm2088_vm1, %v2013_v34 }
 0x53e   : > { %v2015_v38 = vpop.f32.mrf.mxu1 }
 0x540   : > { %v2018_v25 = vpop.f32.mrf.mxu1 }
 0x541   : > { %3595 = vmatprep.mubr.msk.f32.mxu0 %vm2088_vm1, %v2018_v25 }
 0x542   : > { %v2020_v24 = vpop.f32.mrf.mxu1 }
 0x544   : > { %v2023_v33 = vpop.f32.mrf.mxu1 }
 0x545   : > { %3596 = vmatmul.mubr.msk.f32.gmra.mxu0 %vm2088_vm1, %v2023_v33 }
 0x546   : > { %v2025_v15 = vpop.f32.mrf.mxu1 }
 0x548   : > { %v2028_v36 = vpop.f32.mrf.mxu1 }
 0x549   : > { %3598 = vmatprep.mubr.msk.f32.mxu0 %vm2088_vm1, %v2028_v36 }
 0x54a   : > { %v2030_v30 = vpop.f32.mrf.mxu1 }
 0x54c   : > { %v2033_v61 = vpop.f32.mrf.mxu1 }
 0x54d   : > { %3599 = vmatmul.mubr.msk.f32.gmra.mxu0 %vm2088_vm1, %v2033_v61 }
 0x54e   : > { %v2035_v58 = vpop.f32.mrf.mxu1 }
 0x550   : > { %v2038_v56 = vpop.f32.mrf.mxu1 }
 0x551   : > { %3601 = vmatprep.mubr.msk.f32.mxu0 %vm2088_vm1, %v2038_v56 }
 0x552   : > { %v2040_v47 = vpop.f32.mrf.mxu1 }
 0x554   : > { %v2043_v53 = vpop.f32.mrf.mxu1 }
 0x555   : > { %3602 = vmatmul.mubr.msk.f32.gmra.mxu0 %vm2088_vm1, %v2043_v53 }
 0x556   : > { %v2045_v18 = vpop.f32.mrf.mxu1 }
 0x558   : > { %v2048_v27 = vpop.f32.mrf.mxu1 }
 0x559   : > { %3604 = vmatprep.mubr.msk.f32.mxu0 %vm2088_vm1, %v2048_v27 }
 0x55a   : > { %v2050_v45 = vpop.f32.mrf.mxu1 }
 0x55c   : > { %v2053_v12 = vpop.f32.mrf.mxu1 }
 0x55d   : > { %3605 = vmatmul.mubr.msk.f32.gmra.mxu0 %vm2088_vm1, %v2053_v12 }
 0x55e   : > { %v2055_v3 = vpop.f32.mrf.mxu1 }
 0x560   : > { %v2058_v31 = vpop.f32.mrf.mxu1 }
 0x561   : > { %3607 = vmatprep.mubr.msk.f32.mxu0 %vm2088_vm1, %v2058_v31 }
 0x562   : > { %v2060_v42 = vpop.f32.mrf.mxu1 }
 0x564   : > { %v2063_v44 = vpop.f32.mrf.mxu1 }
 0x565   : > { %3608 = vmatmul.mubr.msk.f32.gmra.mxu0 %vm2088_vm1, %v2063_v44 }
 0x566   : > { %v2065_v0 = vpop.f32.mrf.mxu1 }
 0x568   : > { %v2068_v17 = vpop.f32.mrf.mxu1 }
 0x569   : > { %3610 = vmatprep.mubr.msk.f32.mxu0 %vm2088_vm1, %v2068_v17 }
 0x56a   : > { %v2070_v8 = vpop.f32.mrf.mxu1 }
 0x56c   : > { %v2073_v54 = vpop.f32.mrf.mxu1 }
 0x56d   : > { %3611 = vmatmul.mubr.msk.f32.gmra.mxu0 %vm2088_vm1, %v2073_v54 }
 0x56e   : > { %v2075_v6 = vpop.f32.mrf.mxu1 }
 0x5c5   : > { %v3567_v2 = vpop.f32.mrf.mxu0 }
 0x5c6   : > { %v2257_v14 = vadd.f32 %v3567_v2, %v5419_v16 }
 0x5c7   : > { %v2251_v29 = vpop.f32.mrf.mxu0 }
 0x5c8   : > { %v2252_v51 = vadd.f32 %v5419_v16, %v2251_v29  ;;  %v2411_v9 = vmax.f32 %v2257_v14, 0.0 }
 0x5ca   : > { %v2410_v11 = vmax.f32 %v2252_v51, 0.0 }
 0x5cc   : > { %3621 = vmatprep.mubr.msk.f32.mxu1 %vm2088_vm1, %v2410_v11 }
 0x5cd   : > { %v3570_v43 = vpop.f32.mrf.mxu0  ;;  %3622 = vmatmul.mubr.msk.f32.vlgmr.msra.gmra.mxu1 %vm2088_vm1, %v2411_v9 }
 0x5ce   : > { %v2267_v19 = vadd.f32 %v3570_v43, %v5419_v16 }
 0x5cf   : > { %v2261_v35 = vpop.f32.mrf.mxu0 }
 0x5d0   : > { %v2262_v52 = vadd.f32 %v5419_v16, %v2261_v35  ;;  %v2413_v26 = vmax.f32 %v2267_v19, 0.0 }
 0x5d1   : > { %v3573_v5 = vpop.f32.mrf.mxu0 }
 0x5d2   : > { %v2412_v1 = vmax.f32 %v2262_v52, 0.0  ;;  %v2277_v41 = vadd.f32 %v3573_v5, %v5419_v16 }
 0x5d3   : > { %v2271_v21 = vpop.f32.mrf.mxu0 }
 0x5d4   : > { %v2272_v48 = vadd.f32 %v5419_v16, %v2271_v21  ;;  %3624 = vmatprep.mubr.msk.f32.mxu1 %vm2088_vm1, %v2412_v1  ;;  %v2415_v4 = vmax.f32 %v2277_v41, 0.0 }
 0x5d5   : > { %v3576_v13 = vpop.f32.mrf.mxu0  ;;  %3625 = vmatmul.mubr.msk.f32.gmra.mxu1 %vm2088_vm1, %v2413_v26 }
 0x5d6   : > { %v2414_v39 = vmax.f32 %v2272_v48, 0.0  ;;  %v2287_v23 = vadd.f32 %v3576_v13, %v5419_v16 }
 0x5d7   : > { %v2281_v57 = vpop.f32.mrf.mxu0 }
 0x5d8   : > { %v2282_v40 = vadd.f32 %v5419_v16, %v2281_v57  ;;  %3627 = vmatprep.mubr.msk.f32.mxu1 %vm2088_vm1, %v2414_v39  ;;  %v2417_v28 = vmax.f32 %v2287_v23, 0.0 }
 0x5d9   : > { %v3579_v46 = vpop.f32.mrf.mxu0  ;;  %3628 = vmatmul.mubr.msk.f32.gmra.mxu1 %vm2088_vm1, %v2415_v4 }
 0x5da   : > { %v2416_v50 = vmax.f32 %v2282_v40, 0.0  ;;  %v2297_v10 = vadd.f32 %v3579_v46, %v5419_v16 }
 0x5db   : > { %v2291_v60 = vpop.f32.mrf.mxu0 }
 0x5dc   : > { %v2292_v32 = vadd.f32 %v5419_v16, %v2291_v60  ;;  %3630 = vmatprep.mubr.msk.f32.mxu1 %vm2088_vm1, %v2416_v50  ;;  %v2419_v20 = vmax.f32 %v2297_v10, 0.0 }
 0x5dd   : > { %v3582_v49 = vpop.f32.mrf.mxu0  ;;  %3631 = vmatmul.mubr.msk.f32.gmra.mxu1 %vm2088_vm1, %v2417_v28 }
 0x5de   : > { %v2418_v7 = vmax.f32 %v2292_v32, 0.0  ;;  %v2307_v55 = vadd.f32 %v3582_v49, %v5419_v16 }
 0x5df   : > { %v2301_v37 = vpop.f32.mrf.mxu0 }
 0x5e0   : > { %v2302_v34 = vadd.f32 %v5419_v16, %v2301_v37  ;;  %3633 = vmatprep.mubr.msk.f32.mxu1 %vm2088_vm1, %v2418_v7  ;;  %v2421_v25 = vmax.f32 %v2307_v55, 0.0 }
 0x5e1   : > { %3634 = vmatmul.mubr.msk.f32.gmra.mxu1 %vm2088_vm1, %v2419_v20 }
 0x5e2   : > { %v2420_v38 = vmax.f32 %v2302_v34, 0.0 }
 0x5e4   : > { %3636 = vmatprep.mubr.msk.f32.mxu1 %vm2088_vm1, %v2420_v38 }
 0x5e5   : > { %v3585_v24 = vpop.f32.mrf.mxu0  ;;  %3637 = vmatmul.mubr.msk.f32.gmra.mxu1 %vm2088_vm1, %v2421_v25 }
 0x5e6   : > { %v2317_v33 = vadd.f32 %v3585_v24, %v5419_v16  ;;  %v2807_v24 = vld [vmem:[%s5699_s5 + $0x8] sm:$0xff] }
 0x5e7   : > { %v2311_v15 = vpop.f32.mrf.mxu0  ;;  %2874 = vmatprep.mubr.f32.mxu0 %v2807_v24 }
 0x5e8   : > { %v2312_v63 = vadd.f32 %v5419_v16, %v2311_v15  ;;  %v2423_v62 = vmax.f32 %v2317_v33, 0.0 }
 0x5ea   : > { %v2422_v36 = vmax.f32 %v2312_v63, 0.0 }
 0x5ec   : > { %3639 = vmatprep.mubr.msk.f32.mxu1 %vm2088_vm1, %v2422_v36 }
 0x5ed   : > { %v3588_v30 = vpop.f32.mrf.mxu0  ;;  %3640 = vmatmul.mubr.msk.f32.gmra.mxu1 %vm2088_vm1, %v2423_v62 }
 0x5ee   : > { %v2327_v59 = vadd.f32 %v3588_v30, %v5419_v16 }
 0x5ef   : > { %v2321_v61 = vpop.f32.mrf.mxu0 }
 0x5f0   : > { %v2322_v58 = vadd.f32 %v5419_v16, %v2321_v61  ;;  %v2425_v47 = vmax.f32 %v2327_v59, 0.0 }
 0x5f2   : > { %v2424_v56 = vmax.f32 %v2322_v58, 0.0 }
 0x5f4   : > { %3642 = vmatprep.mubr.msk.f32.mxu1 %vm2088_vm1, %v2424_v56 }
 0x5f5   : > { %v3591_v53 = vpop.f32.mrf.mxu0  ;;  %3643 = vmatmul.mubr.msk.f32.gmra.mxu1 %vm2088_vm1, %v2425_v47 }
 0x5f6   : > { %v2337_v18 = vadd.f32 %v3591_v53, %v5419_v16 }
 0x5f7   : > { %v2331_v27 = vpop.f32.mrf.mxu0 }
 0x5f8   : > { %v2332_v45 = vadd.f32 %v5419_v16, %v2331_v27  ;;  %v2427_v3 = vmax.f32 %v2337_v18, 0.0 }
 0x5fa   : > { %v2426_v12 = vmax.f32 %v2332_v45, 0.0 }
 0x5fc   : > { %3645 = vmatprep.mubr.msk.f32.mxu1 %vm2088_vm1, %v2426_v12 }
 0x5fd   : > { %v3594_v31 = vpop.f32.mrf.mxu0  ;;  %3646 = vmatmul.mubr.msk.f32.gmra.mxu1 %vm2088_vm1, %v2427_v3 }
 0x5fe   : > { %v2347_v42 = vadd.f32 %v3594_v31, %v5419_v16 }
 0x5ff   : > { %v2341_v44 = vpop.f32.mrf.mxu0 }
 0x600   : > { %v2342_v0 = vadd.f32 %v5419_v16, %v2341_v44  ;;  %v2429_v8 = vmax.f32 %v2347_v42, 0.0 }
 0x602   : > { %v2428_v17 = vmax.f32 %v2342_v0, 0.0 }
 0x604   : > { %3648 = vmatprep.mubr.msk.f32.mxu1 %vm2088_vm1, %v2428_v17 }
 0x605   : > { %v3597_v54 = vpop.f32.mrf.mxu0  ;;  %3649 = vmatmul.mubr.msk.f32.gmra.mxu1 %vm2088_vm1, %v2429_v8 }
 0x606   : > { %v2357_v6 = vadd.f32 %v3597_v54, %v5419_v16 }
 0x607   : > { %v2351_v2 = vpop.f32.mrf.mxu0 }
 0x608   : > { %v2352_v14 = vadd.f32 %v5419_v16, %v2351_v2  ;;  %v2431_v51 = vmax.f32 %v2357_v6, 0.0 }
 0x60a   : > { %v2430_v29 = vmax.f32 %v2352_v14, 0.0 }
 0x60c   : > { %3651 = vmatprep.mubr.msk.f32.mxu1 %vm2088_vm1, %v2430_v29  ;;  %v5519_v29 = vld [vmem:[%s5705_s11] ss:$0 sm:$0xff] }
 0x60d   : > { %v3600_v11 = vpop.f32.mrf.mxu0  ;;  %3652 = vmatmul.mubr.msk.f32.gmra.mxu1 %vm2088_vm1, %v2431_v51 }
 0x60e   : > { %v2367_v9 = vadd.f32 %v3600_v11, %v5419_v16 }
 0x60f   : > { %v2361_v43 = vpop.f32.mrf.mxu0 }
 0x610   : > { %v2362_v19 = vadd.f32 %v5419_v16, %v2361_v43  ;;  %v2433_v52 = vmax.f32 %v2367_v9, 0.0 }
 0x612   : > { %v2432_v35 = vmax.f32 %v2362_v19, 0.0 }
 0x614   : > { %3654 = vmatprep.mubr.msk.f32.mxu1 %vm2088_vm1, %v2432_v35 }
 0x615   : > { %v3603_v5 = vpop.f32.mrf.mxu0  ;;  %3655 = vmatmul.mubr.msk.f32.gmra.mxu1 %vm2088_vm1, %v2433_v52 }
 0x616   : > { %v2377_v1 = vadd.f32 %v3603_v5, %v5419_v16 }
 0x617   : > { %v2371_v26 = vpop.f32.mrf.mxu0 }
 0x618   : > { %v2372_v41 = vadd.f32 %v5419_v16, %v2371_v26  ;;  %v2435_v48 = vmax.f32 %v2377_v1, 0.0 }
 0x61a   : > { %v2434_v21 = vmax.f32 %v2372_v41, 0.0 }
 0x61c   : > { %3657 = vmatprep.mubr.msk.f32.mxu1 %vm2088_vm1, %v2434_v21 }
 0x61d   : > { %v3606_v13 = vpop.f32.mrf.mxu0  ;;  %3658 = vmatmul.mubr.msk.f32.gmra.mxu1 %vm2088_vm1, %v2435_v48 }
 0x61e   : > { %v2387_v39 = vadd.f32 %v3606_v13, %v5419_v16 }
 0x61f   : > { %v2381_v4 = vpop.f32.mrf.mxu0 }
 0x620   : > { %v2382_v23 = vadd.f32 %v5419_v16, %v2381_v4  ;;  %v2437_v40 = vmax.f32 %v2387_v39, 0.0 }
 0x622   : > { %v2436_v57 = vmax.f32 %v2382_v23, 0.0 }
 0x624   : > { %3660 = vmatprep.mubr.msk.f32.mxu1 %vm2088_vm1, %v2436_v57 }
 0x625   : > { %v3609_v46 = vpop.f32.mrf.mxu0  ;;  %3661 = vmatmul.mubr.msk.f32.gmra.mxu1 %vm2088_vm1, %v2437_v40 }
 0x626   : > { %v2397_v50 = vadd.f32 %v3609_v46, %v5419_v16 }
 0x627   : > { %v2391_v28 = vpop.f32.mrf.mxu0 }
 0x628   : > { %v2392_v10 = vadd.f32 %v5419_v16, %v2391_v28  ;;  %v2439_v32 = vmax.f32 %v2397_v50, 0.0 }
 0x62a   : > { %v2438_v60 = vmax.f32 %v2392_v10, 0.0 }
 0x62c   : > { %3663 = vmatprep.mubr.msk.f32.mxu1 %vm2088_vm1, %v2438_v60 }
 0x62d   : > { %v3612_v49 = vpop.f32.mrf.mxu0  ;;  %3664 = vmatmul.mubr.msk.f32.gmra.mxu1 %vm2088_vm1, %v2439_v32 }
 0x62e   : > { %v2407_v7 = vadd.f32 %v3612_v49, %v5419_v16 }
 0x62f   : > { %v2401_v20 = vpop.f32.mrf.mxu0 }
 0x630   : > { %v2402_v55 = vadd.f32 %v5419_v16, %v2401_v20  ;;  %v2441_v34 = vmax.f32 %v2407_v7, 0.0 }
 0x632   : > { %v2440_v37 = vmax.f32 %v2402_v55, 0.0 }
 0x634   : > { %3666 = vmatprep.mubr.msk.f32.mxu1 %vm2088_vm1, %v2440_v37 }
 0x635   : > { %3667 = vmatmul.mubr.msk.f32.gmra.mxu1 %vm2088_vm1, %v2441_v34 }
 0x68d   : > { %v5485_v38 = vpop.f32.mrf.mxu1 }
 0x68f   : > { %v5487_v25 = vpop.f32.mrf.mxu1 }
 0x695   : > { %v5492_v33 = vpop.f32.mrf.mxu1 }
 0x697   : > { %v5494_v15 = vpop.f32.mrf.mxu1 }
 0x699   : > { %v5496_v16 = vpop.f32.mrf.mxu1 }
 0x69b   : > { %v5498_v63 = vpop.f32.mrf.mxu1 }
 0x69d   : > { %v5500_v36 = vpop.f32.mrf.mxu1 }
 0x69f   : > { %v5502_v62 = vpop.f32.mrf.mxu1 }
 0x6a1   : > { %v3635_v30 = vpop.f32.mrf.mxu1 }
 0x6a2   : > { %v2661_v32 = vadd.f32 %v3635_v30, %v5519_v29 }
 0x6a3   : > { %v2655_v59 = vpop.f32.mrf.mxu1 }
 0x6a4   : > { %v2656_v55 = vadd.f32 %v5519_v29, %v2655_v59 }
 0x6a5   : > { %v3638_v61 = vpop.f32.mrf.mxu1 }
 0x6a6   : > { %v2671_v23 = vadd.f32 %v3638_v61, %v5519_v29  ;;  %v2651_v61 = vadd.f32 %v5500_v36, %v5519_v29 }
 0x6a7   : > { %v2665_v58 = vpop.f32.mrf.mxu1 }
 0x6a8   : > { %v2666_v50 = vadd.f32 %v5519_v29, %v2665_v58  ;;  %v2785_v49 = vmax.f32 %v2671_v23, 0.0  ;;  %v2783_v58 = vmax.f32 %v2661_v32, 0.0  ;;  %v2781_v36 = vmax.f32 %v2651_v61, 0.0  ;;  %v2912_v61 = vld [vmem:[%s5700_s6 + $0x8] sm:$0xff] }
 0x6aa   : > { %v2784_v37 = vmax.f32 %v2666_v50, 0.0 }
 0x6ad   : > { %v3641_v56 = vpop.f32.mrf.mxu1 }
 0x6ae   : > { %v2681_v1 = vadd.f32 %v3641_v56, %v5519_v29 }
 0x6af   : > { %v2675_v47 = vpop.f32.mrf.mxu1 }
 0x6b0   : > { %v2676_v48 = vadd.f32 %v5519_v29, %v2675_v47  ;;  %v2787_v57 = vmax.f32 %v2681_v1, 0.0  ;;  %v2646_v47 = vadd.f32 %v5519_v29, %v5502_v62  ;;  %v2636_v62 = vadd.f32 %v5519_v29, %v5498_v63 }
 0x6b1   : > { %v2626_v63 = vadd.f32 %v5519_v29, %v5494_v15  ;;  %v2616_v15 = vadd.f32 %v5519_v29, %v5487_v25  ;;  %v2808_v25 = vld [vmem:[%s5699_s5 + $0x10] sm:$0xff] }
 0x6b2   : > { %v2786_v28 = vmax.f32 %v2676_v48, 0.0 }
 0x6b5   : > { %v3644_v53 = vpop.f32.mrf.mxu1 }
 0x6b6   : > { %v2691_v51 = vadd.f32 %v3644_v53, %v5519_v29  ;;  %v2782_v53 = vmax.f32 %v2656_v55, 0.0  ;;  %v2920_v55 = vld [vmem:[%s5700_s6 + $0x48] sm:$0xff] }
 0x6b7   : > { %v2685_v18 = vpop.f32.mrf.mxu1 }
 0x6b8   : > { %v2686_v43 = vadd.f32 %v5519_v29, %v2685_v18  ;;  %v2789_v26 = vmax.f32 %v2691_v51, 0.0 }
 0x6ba   : > { %v2788_v13 = vmax.f32 %v2686_v43, 0.0  ;;  %v2776_v43 = vmax.f32 %v2626_v63, 0.0 }
 0x6bd   : > { %v5504_v27 = vpop.f32.mrf.mxu1 }
 0x6bf   : > { %v5506_v45 = vpop.f32.mrf.mxu1 }
 0x6c5   : > { %v5508_v12 = vpop.f32.mrf.mxu1 }
 0x6c7   : > { %v5510_v3 = vpop.f32.mrf.mxu1 }
 0x6cd   : > { %v5512_v31 = vpop.f32.mrf.mxu1 }
 0x6ce   : > { %v2721_v59 = vadd.f32 %v5512_v31, %v5519_v29  ;;  %v2711_v31 = vadd.f32 %v5508_v12, %v5519_v29  ;;  %v2701_v12 = vadd.f32 %v5504_v27, %v5519_v29 }
 0x6cf   : > { %v5514_v42 = vpop.f32.mrf.mxu1 }
 0x6d0   : > { %v2793_v51 = vmax.f32 %v2711_v31, 0.0 }
 0x6d5   : > { %v3656_v44 = vpop.f32.mrf.mxu1 }
 0x6d6   : > { %v2731_v34 = vadd.f32 %v3656_v44, %v5519_v29  ;;  %v2641_v44 = vadd.f32 %v5496_v16, %v5519_v29  ;;  %v2631_v16 = vadd.f32 %v5492_v33, %v5519_v29  ;;  %v2621_v33 = vadd.f32 %v5485_v38, %v5519_v29  ;;  %v2806_v38 = vld [vmem:[%s5699_s5] sm:$0xff] }
 0x6d7   : > { %v2725_v0 = vpop.f32.mrf.mxu1 }
 0x6d8   : > { %v2726_v30 = vadd.f32 %v5519_v29, %v2725_v0  ;;  %v2797_v18 = vmax.f32 %v2731_v34, 0.0  ;;  %v2716_v0 = vadd.f32 %v5519_v29, %v5514_v42  ;;  %v2706_v42 = vadd.f32 %v5519_v29, %v5510_v3  ;;  %v2916_v34 = vld [vmem:[%s5700_s6 + $0x28] sm:$0xff] }
 0x6d9   : > { %v2696_v3 = vadd.f32 %v5519_v29, %v5506_v45  ;;  %v2775_v27 = vmax.f32 %v2621_v33, 0.0  ;;  %v2809_v45 = vld [vmem:[%s5699_s5 + $0x18] sm:$0xff] }
 0x6dd   : > { %v3659_v17 = vpop.f32.mrf.mxu1 }
 0x6de   : > { %v2741_v10 = vadd.f32 %v3659_v17, %v5519_v29  ;;  %v2796_v17 = vmax.f32 %v2726_v30, 0.0  ;;  %v2926_v30 = vld [vmem:[%s5700_s6 + $0x78] sm:$0xff] }
 0x6df   : > { %v2735_v8 = vpop.f32.mrf.mxu1 }
 0x6e0   : > { %v2736_v7 = vadd.f32 %v5519_v29, %v2735_v8  ;;  %v2799_v24 = vmax.f32 %v2741_v10, 0.0  ;;  %v2780_v8 = vmax.f32 %v2646_v47, 0.0 }
 0x6e2   : > { %v2798_v56 = vmax.f32 %v2736_v7, 0.0  ;;  %v2924_v7 = vld [vmem:[%s5700_s6 + $0x68] sm:$0xff] }
 0x6e5   : > { %v3662_v54 = vpop.f32.mrf.mxu1 }
 0x6e6   : > { %v2751_v39 = vadd.f32 %v3662_v54, %v5519_v29  ;;  %v2795_v54 = vmax.f32 %v2721_v59, 0.0 }
 0x6e7   : > { %v2745_v6 = vpop.f32.mrf.mxu1 }
 0x6e8   : > { %v2746_v40 = vadd.f32 %v5519_v29, %v2745_v6  ;;  %v2801_v60 = vmax.f32 %v2751_v39, 0.0  ;;  %v2779_v6 = vmax.f32 %v2641_v44, 0.0  ;;  %v2925_v44 = vld [vmem:[%s5700_s6 + $0x70] sm:$0xff] }
 0x6ea   : > { %v2800_v20 = vmax.f32 %v2746_v40, 0.0 }
 0x6ed   : > { %v3665_v2 = vpop.f32.mrf.mxu1 }
 0x6ee   : > { %v2761_v35 = vadd.f32 %v3665_v2, %v5519_v29  ;;  %v2794_v2 = vmax.f32 %v2716_v0, 0.0  ;;  %v2922_v0 = vld [vmem:[%s5700_s6 + $0x58] sm:$0xff] }
 0x6ef   : > { %v2755_v14 = vpop.f32.mrf.mxu1 }
 0x6f0   : > { %v2756_v41 = vadd.f32 %v5519_v29, %v2755_v14  ;;  %v2803_v4 = vmax.f32 %v2761_v35, 0.0  ;;  %v2778_v14 = vmax.f32 %v2636_v62, 0.0  ;;  %v2790_v35 = vmax.f32 %v2696_v3, 0.0  ;;  %v2921_v62 = vld [vmem:[%s5700_s6 + $0x50] sm:$0xff] }
 0x6f2   : > { %v2802_v46 = vmax.f32 %v2756_v41, 0.0 }
 0x6f5   : > { %v3668_v11 = vpop.f32.mrf.mxu1 }
 0x6f6   : > { %v2771_v9 = vadd.f32 %v3668_v11, %v5519_v29  ;;  %v2777_v11 = vmax.f32 %v2631_v16, 0.0  ;;  %v2914_v16 = vld [vmem:[%s5700_s6 + $0x18] sm:$0xff] }
 0x6f7   : > { %v2765_v19 = vpop.f32.mrf.mxu1 }
 0x6f8   : > { %v2805_v52 = vmax.f32 %v2771_v9, 0.0  ;;  %v2766_v5 = vadd.f32 %v5519_v29, %v2765_v19  ;;  %v2792_v9 = vmax.f32 %v2706_v42, 0.0  ;;  %v2791_v19 = vmax.f32 %v2701_v12, 0.0  ;;  %v3088_v12 = vld [vmem:[%s5701_s7 + $0x8] sm:$0xff] }
 0x6fa   : > { %v2804_v21 = vmax.f32 %v2766_v5, 0.0  ;;  %3519 = vmatprep.subr.mxu0 %v2805_v52  ;;  %v2774_v52 = vmax.f32 %v2616_v15, 0.0 }
 0x6fb   : > { %3520 = vmatpush3.msra.mxu0 %v2789_v26 }
 0x6fc   : > { %3521 = vmatprep.subr.mxu0 %v2804_v21 }
 0x6fd   : > { %3522 = vmatpush3.msra.mxu0 %v2788_v13 }
 0x6fe   : > { %3523 = vmatprep.subr.mxu0 %v2803_v4 }
 0x6ff   : > { %3524 = vmatpush3.msra.mxu0 %v2787_v57 }
 0x700   : > { %3525 = vmatprep.subr.mxu0 %v2802_v46 }
 0x701   : > { %3526 = vmatpush3.msra.mxu0 %v2786_v28 }
 0x702   : > { %3527 = vmatprep.subr.mxu0 %v2801_v60 }
 0x703   : > { %3528 = vmatpush3.msra.mxu0 %v2785_v49 }
 0x704   : > { %3529 = vmatprep.subr.mxu0 %v2800_v20  ;;  %v2923_v20 = vld [vmem:[%s5700_s6 + $0x60] sm:$0xff] }
 0x705   : > { %3530 = vmatpush3.msra.mxu0 %v2784_v37  ;;  %v2919_v37 = vld [vmem:[%s5700_s6 + $0x40] sm:$0xff] }
 0x706   : > { %3531 = vmatprep.subr.mxu0 %v2799_v24  ;;  %v2915_v24 = vld [vmem:[%s5700_s6 + $0x20] sm:$0xff] }
 0x707   : > { %3532 = vmatpush3.msra.mxu0 %v2783_v58  ;;  %v2911_v58 = vld [vmem:[%s5700_s6] sm:$0xff] }
 0x708   : > { %3533 = vmatprep.subr.mxu0 %v2798_v56 }
 0x709   : > { %3534 = vmatpush3.msra.mxu0 %v2782_v53 }
 0x70a   : > { %3535 = vmatprep.subr.mxu0 %v2797_v18 }
 0x70b   : > { %3536 = vmatpush3.msra.mxu0 %v2781_v36 }
 0x70c   : > { %3537 = vmatprep.subr.mxu0 %v2796_v17 }
 0x70d   : > { %3538 = vmatpush3.msra.mxu0 %v2780_v8  ;;  %v2918_v8 = vld [vmem:[%s5700_s6 + $0x38] sm:$0xff] }
 0x70e   : > { %3539 = vmatprep.subr.mxu0 %v2795_v54  ;;  %v2917_v54 = vld [vmem:[%s5700_s6 + $0x30] sm:$0xff] }
 0x70f   : > { %3540 = vmatpush3.msra.mxu0 %v2779_v6  ;;  %v2913_v6 = vld [vmem:[%s5700_s6 + $0x10] sm:$0xff] }
 0x710   : > { %3541 = vmatprep.subr.mxu0 %v2794_v2  ;;  %v3087_v2 = vld [vmem:[%s5701_s7] sm:$0xff] }
 0x711   : > { %3542 = vmatpush3.msra.mxu0 %v2778_v14  ;;  %v3091_v14 = vld [vmem:[%s5701_s7 + $0x20] sm:$0xff] }
 0x712   : > { %3543 = vmatprep.subr.mxu0 %v2793_v51 }
 0x713   : > { %3544 = vmatpush3.msra.mxu0 %v2777_v11 }
 0x714   : > { %3545 = vmatprep.subr.mxu0 %v2792_v9 }
 0x715   : > { %3546 = vmatpush3.msra.mxu0 %v2776_v43 }
 0x716   : > { %3547 = vmatprep.subr.mxu0 %v2791_v19 }
 0x717   : > { %3548 = vmatpush3.msra.mxu0 %v2775_v27 }
 0x718   : > { %3549 = vmatprep.subr.mxu0 %v2790_v35 }
 0x719   : > { %3550 = vmatpush3.msra.mxu0 %v2774_v52  ;;  %v3089_v52 = vld [vmem:[%s5701_s7 + $0x10] sm:$0xff] }
 0x71a   : > { %2875 = vmatmul.mubr.f32.vlgmr.msra.gmra.mxu0 %v2806_v38  ;;  %2957 = vmatprep.subr.mxu0 %v2924_v7 }
 0x71b   : > { %2879 = vmatprep.mubr.f32.mxu0 %v2809_v45  ;;  %2958 = vmatpush1.msra.mxu0 %v2923_v20  ;;  %v3093_v45 = vld [vmem:[%s5701_s7 + $0x30] sm:$0xff] }
 0x71c   : > { %2959 = vmatprep.subr.mxu0 %v2920_v55 }
 0x71d   : > { %2960 = vmatpush1.msra.mxu0 %v2919_v37 }
 0x71e   : > { %2880 = vmatmul.mubr.f32.gmra.mxu0 %v2808_v25  ;;  %2961 = vmatprep.subr.mxu0 %v2916_v34  ;;  %v3140_v34 = vlaneseq }
 0x71f   : > { %2997 = vmatprep.mubr.f32.mxu0 %v5899_v22  ;;  %2962 = vmatpush1.msra.mxu0 %v2915_v24 }
 0x720   : > { %2963 = vmatprep.subr.mxu0 %v2912_v61  ;;  %vm3162_vm3 = vcmp.lt.s32.totalorder %v3140_v34, 512 }
 0x721   : > { %2964 = vmatpush1.msra.mxu0 %v2911_v58 }
 0x722   : > { %3034 = vmatprep.subr.mxu0 %v2926_v30 }
 0x7da   : > { %v3551_v29 = vpop.f32.mrf.mxu0 }
 0x7dc   : > { %v3552_v5 = vpop.f32.mrf.mxu0 }
 0x7dd   : > { %v3553_v1 = vadd.f32 %v3552_v5, %v3551_v29  ;;  %v3090_v5 = vld [vmem:[%s5701_s7 + $0x18] sm:$0xff] }
 0x7de   : > { %v3554_v26 = vpop.f32.mrf.mxu0 }
 0x7df   : > { %v2885_v41 = vmul.f32 0.0625, %v3553_v1 }
 0x7e0   : > { %v3555_v21 = vpop.f32.mrf.mxu0 }
 0x7e1   : > { %v3556_v48 = vadd.f32 %v3555_v21, %v3554_v26  ;;  %v2887_v13 = vsel %vm2088_vm1, %v2885_v41, -inf  ;;  %v3094_v26 = vld [vmem:[%s5701_s7 + $0x38] sm:$0xff] }
 0x7e2   : > { %2888 = vmax.xlane.f32.xlu0 %v2887_v13 }
 0x7e3   : > { %v2886_v39 = vmul.f32 0.0625, %v3556_v48 }
 0x7e5   : > { %v2890_v4 = vsel %vm2088_vm1, %v2886_v39, -inf }
 0x7e6   : > { %2891 = vmax.xlane.f32.xlu1 %v2890_v4 }
 0x86b   : > { %v2889_v23 = vpop.xlane.xlu0 %2888 }
 0x86c   : > { %v2893_v57 = vsub.f32 %v2885_v41, %v2889_v23 }
 0x86e   : > { %v2895_v40 = vmul.f32 1.442695, %v2893_v57 }
 0x86f   : > { %v2892_v46 = vpop.xlane.xlu1 %2891 }
 0x870   : > { %3838 = vpow2.f32 %v2895_v40  ;;  %v2894_v50 = vsub.f32 %v2886_v39, %v2892_v46 }
 0x872   : > { %v2897_v28 = vmul.f32 1.442695, %v2894_v50 }
 0x874   : > { %3840 = vpow2.f32 %v2897_v28 }
 0x87d   : > { %v3839_v10 = vpop.eup %3838 }
 0x87e   : > { %v2899_v60 = vsel %vm2088_vm1, %v3839_v10, 0.0 }
 0x87f   : > { %2900 = vadd.xlane.f32.xlu0 %v2899_v60 }
 0x881   : > { %v3841_v32 = vpop.eup %3840 }
 0x882   : > { %v2902_v49 = vsel %vm2088_vm1, %v3841_v32, 0.0 }
 0x883   : > { %2903 = vadd.xlane.f32.xlu1 %v2902_v49  ;;  %v3909_v49 = vmov 1966171168  }
 0x884   : > { %v3138_v7 = vunpack.c.l.s4 %v3909_v49 }
 0x886   : > { %v3139_v30 = vunpack.c.0.s8 %v3138_v7 }
 0x908   : > { %v2901_v56 = vpop.xlane.xlu0 %2900 }
 0x909   : > { %3842 = vlog2.f32 %v2901_v56 }
 0x90c   : > { %v2904_v47 = vpop.xlane.xlu1 %2903 }
 0x90d   : > { %3844 = vlog2.f32 %v2904_v47 }
 0x916   : > { %v3843_v53 = vpop.eup %3842 }
 0x917   : > { %v2906_v59 = vmul.f32 0.6931472, %v3843_v53 }
 0x919   : > { %v2909_v18 = vsub.f32 %v2893_v57, %v2906_v59  ;;  %v3141_v59 = vshrl.u32 %v3140_v34, 7 }
 0x91a   : > { %v3845_v36 = vpop.eup %3844 }
 0x91b   : > { %v2908_v17 = vmul.f32 0.6931472, %v3845_v36  ;;  %3358 = vmatmul.mubr.msk.f32.vlgmr.msra.gmra.mxu0 %vm2088_vm1, %v2909_v18 }
 0x91c   : > { %3035 = vmatpush1.msra.mxu0 %v2925_v44  ;;  %3003 = vmatprep.mubr.f32.mxu0 %v5899_v22 }
 0x91d   : > { %v2910_v31 = vsub.f32 %v2894_v50, %v2908_v17  ;;  %3036 = vmatprep.subr.mxu0 %v2922_v0 }
 0x91e   : > { %3037 = vmatpush1.msra.mxu0 %v2921_v62  ;;  %v3142_v62 = vsub.s32 %v3139_v30, %v3141_v59 }
 0x91f   : > { %3359 = vmatmul.mubr.msk.f32.gmra.mxu0 %vm2088_vm1, %v2910_v31  ;;  %3038 = vmatprep.subr.mxu0 %v2918_v8 }
 0x920   : > { %3039 = vmatpush1.msra.mxu0 %v2917_v54  ;;  %3074 = vmatprep.mubr.f32.mxu0 %v5899_v22 }
 0x921   : > { %3040 = vmatprep.subr.mxu0 %v2914_v16 }
 0x922   : > { %3041 = vmatpush1.msra.mxu0 %v2913_v6 }
 0x923   : > { %3360 = vmatmul.mubr.msk.f32.vlgmr.msra.gmra.mxu0 %vm2088_vm1, %v2909_v18 }
 0x924   : > { %3080 = vmatprep.mubr.f32.mxu0 %v5899_v22  ;;  %v3092_v22 = vld [vmem:[%s5701_s7 + $0x28] sm:$0xff] }
 0x927   : > { %3361 = vmatmul.mubr.msk.f32.gmra.mxu0 %vm2088_vm1, %v2910_v31 }
 0x9db   : > { %v2999_v42 = vpop.f32.mrf.mxu0 }
 0x9dc   : > { %v3095_v33 = vmul.f32 %v3087_v2, %v2999_v42 }
 0x9dd   : > { %v3001_v63 = vpop.f32.mrf.mxu0 }
 0x9de   : > { %v3096_v9 = vmul.f32 %v3088_v12, %v3001_v63 }
 0x9df   : > { %v3005_v51 = vpop.f32.mrf.mxu0 }
 0x9e0   : > { %v3099_v11 = vmul.f32 %v3091_v14, %v3005_v51 }
 0x9e1   : > { %v3007_v3 = vpop.f32.mrf.mxu0 }
 0x9e2   : > { %v3103_v15 = vadd.f32 %v3099_v11, %v3095_v33  ;;  %v3100_v43 = vmul.f32 %v3092_v22, %v3007_v3 }
 0x9e3   : > { %v3076_v19 = vpop.f32.mrf.mxu0 }
 0x9e4   : > { %v3104_v27 = vrot.slane %v3103_v15, 4  ;;  %v3110_v35 = vadd.f32 %v3100_v43, %v3096_v9  ;;  %v3097_v21 = vmul.f32 %v3089_v52, %v3076_v19 }
 0x9e5   : > { %v3078_v38 = vpop.f32.mrf.mxu0 }
 0x9e6   : > { %v3105_v25 = vadd.f32 %v3104_v27, %v3103_v15  ;;  %v3111_v29 = vrot.slane %v3110_v35, 4  ;;  %v3098_v13 = vmul.f32 %v3090_v5, %v3078_v38 }
 0x9e7   : > { %v3082_v1 = vpop.f32.mrf.mxu0 }
 0x9e8   : > { %v3112_v41 = vadd.f32 %v3111_v29, %v3110_v35  ;;  %v3101_v48 = vmul.f32 %v3093_v45, %v3082_v1  ;;  %v3106_v4 = vrot.slane %v3105_v25, 2 }
 0x9e9   : > { %v3084_v39 = vpop.f32.mrf.mxu0 }
 0x9ea   : > { %v3113_v23 = vrot.slane %v3112_v41, 2  ;;  %v3117_v57 = vadd.f32 %v3101_v48, %v3097_v21  ;;  %v3102_v40 = vmul.f32 %v3094_v26, %v3084_v39  ;;  %v3107_v10 = vadd.f32 %v3106_v4, %v3105_v25 }
 0x9ec   : > { %v3114_v46 = vadd.f32 %v3113_v23, %v3112_v41  ;;  %v3118_v50 = vrot.slane %v3117_v57, 4  ;;  %v3124_v28 = vadd.f32 %v3102_v40, %v3098_v13  ;;  %v3108_v24 = vrot.slane %v3107_v10, 1 }
 0x9ee   : > { %v3119_v60 = vadd.f32 %v3118_v50, %v3117_v57  ;;  %v3125_v32 = vrot.slane %v3124_v28, 4  ;;  %v3115_v20 = vrot.slane %v3114_v46, 1  ;;  %v3109_v18 = vadd.f32 %v3108_v24, %v3107_v10 }
 0x9f0   : > { %v3120_v55 = vrot.slane %v3119_v60, 2  ;;  %v3126_v37 = vadd.f32 %v3125_v32, %v3124_v28  ;;  %v3116_v56 = vadd.f32 %v3115_v20, %v3114_v46 }
 0x9f2   : > { %v3121_v61 = vadd.f32 %v3120_v55, %v3119_v60  ;;  %v3127_v58 = vrot.slane %v3126_v37, 2  ;;  %v3135_v36 = vcombine.low %v3109_v18, %v3116_v56 }
 0x9f4   : > { %v3122_v47 = vrot.slane %v3121_v61, 1  ;;  %v3128_v53 = vadd.f32 %v3127_v58, %v3126_v37  ;;  %v3143_v31 = vrot.slane %v3135_v36, %v3142_v62 }
 0x9f6   : > { %v3129_v44 = vrot.slane %v3128_v53, 1  ;;  %v3123_v0 = vadd.f32 %v3122_v47, %v3121_v61 }
 0x9f8   : > { %v3130_v17 = vadd.f32 %v3129_v44, %v3128_v53 }
 0x9fa   : > { %v3136_v8 = vcombine.low %v3123_v0, %v3130_v17 }
 0x9fc   : > { %v3150_v54 = vrot.slane %v3136_v8, %v3142_v62 }
 0x9fe   : > { %v3151_v16 = vcombine.low %v3143_v31, %v3150_v54 }
 0xa00   : > { %v3158_v6 = vrot.slane %v3151_v16, %v3142_v62 }
 0xa02   : > { %3164 = vst.msk [vmem:[%s423_s16] sm:$0xf] %vm3162_vm3, %v3158_v6 }
 0xa03   : > { %3859 = shalt.err (!%p3856_p3)
}
 0xa04   : > { %s3860_s26 = scalar_lea.hbm %s3178_s30, 64  ;;  %s3864_s29 = scalar_lea.hbm %s5706_s12, 256 }
 0xa05   : > { %p3861_p4 = scmp.ne.s32.totalorder %s3178_s30, %s3860_s26  ;;  %p3865_p9 = scmp.lt.s32.totalorder %s3178_s30, %s5706_s12 }
 0xa06   : > { %p3866_p10 = scmp.lt.s32.totalorder %s3864_s29, %s3860_s26 }
 0xa07   : > { %p3862_p7 = pnand %p3861_p4, %p4014_p5 }
 0xa08   : > { %p3867_p11 = por %p3866_p10, %p3865_p9 }
 0xa09   : > { %p3863_p8 = pneg %p3862_p7 }
 0xa0b   : > { %p3868_p12 = pnand %p3867_p11, %p3863_p8 }
 0xa0d   : > { %3871 = shalt.err (!%p3868_p12)
}
 0xa0e   : > { %3733 = dma.vmem_to_hbm [thread:$0]  (%p4014_p5), %s3181_s15, 64, %s3178_s30, %s3166_s17  }
 0xa0f PF: > { %p3739_p13 = scmp.ge.s32.totalorder %s3906_s24, 2  ;;  %s3192_s18 = sand.u32 1, %s3894_s21  }
 0xa10   : > { %s3193_s19 = scalar_lea.sflag [#allocation3], %s3192_s18 }
 0xa11   : > { %p3736_p0 = pnand %p3739_p13, %p4018_p6 }
 0xa13   : > { %p3737_p1 = pneg %p3736_p0 }
 0xa15   : > { %3889 = dma.done.wait (%p3737_p1), %s3193_s19, 64  }
 0xa16   : > { %3891 = vsyncadd (%p3737_p1), %s3193_s19, 4294967232  ;;  %s6016_s24 = sld [smem:[#allocation6_spill]]  ;;  %s6019_s21 = smov %s3898_s22 }
 0xa17   : > { %s6017_s20 = sld [smem:[#allocation5_spill]] }
 0xa18   : > { %s6018_s23 = sld [smem:[#allocation7_spill]] }
 0xa1c   : > { %p22_p2 = scmp.ge.s32.totalorder %s6016_s24, 6  }
 0xa1d   : > { %s6020_s22 = smov %s6017_s20 }
 0xa1e   :  { %24 = sbr.rel (!%p22_p2) target bundleno = 3 (0x3), region = 106 }
 0xa23   :  { %3198 = vsyncpa [#allocation3], 1 }
 0xa24   :  { %3200 = vsyncpa [#allocation3 + $0x1], 1 }

</bundles_post_ra>
